<compile_context>
chip_gen: v5e
topology: v5e:2x2
jax: 0.10.0
libtpu: 0.0.40
codegen_flags: <defaults>
</compile_context>

<pallas_src>
import functools
import math

import jax
import jax.numpy as jnp
from jax.experimental import pallas as pl
from jax.experimental.pallas import tpu as pltpu

_NEG_INF = -1e9                      # matches torch masked_fill(mask == 0, -1e9)
_VMEM_LIMIT = 32 * 1024 * 1024       # modest cap (real per-kernel footprint is a few MiB)
_TILE_M = 512                        # token-tile target for the mem-bound kernels


def _cp(dims):
    return pltpu.CompilerParams(dimension_semantics=dims,
                                vmem_limit_bytes=_VMEM_LIMIT)


def _tile(n, target, mult=16):
    """Largest tile <= target dividing n and multiple of `mult`; falls back to
    the full dimension (always a legal block)."""
    if n <= target:
        return n
    for t in range(target, 0, -1):
        if n % t == 0 and t % mult == 0:
            return t
    return n


def _layer_norm(x, a, b, eps):
    # spec: a*(x-mean)/sqrt(var_unbiased + eps) + b  (torch.std is unbiased)
    mean = jnp.mean(x, axis=-1, keepdims=True)
    diff = x - mean
    var = jnp.sum(diff * diff, axis=-1, keepdims=True) / (x.shape[-1] - 1)
    return a * diff * jax.lax.rsqrt(var + eps) + b


# -----------------------------------------------------------------------------
# Pallas kernels
# -----------------------------------------------------------------------------
def _layernorm_kernel(x_ref, a_ref, b_ref, o_ref, *, eps):
    o_ref[...] = _layer_norm(x_ref[...].astype(jnp.float32),
                             a_ref[...], b_ref[...], eps).astype(o_ref.dtype)


def _ln_qkv_kernel(x_ref, a_ref, b_ref, w_ref, bias_ref, q_ref, kv_ref, *, eps, d_model):
    # LayerNorm -> fused (D, 3D) projection -> split into Q and packed KV.
    y = _layer_norm(x_ref[...].astype(jnp.float32), a_ref[...], b_ref[...], eps)
    out = jnp.dot(y.astype(jnp.bfloat16), w_ref[...],
                  preferred_element_type=jnp.float32) + bias_ref[...]
    q_ref[...] = out[:, :d_model].astype(q_ref.dtype)
    kv_ref[...] = out[:, d_model:].astype(kv_ref.dtype)


def _ln_linear_kernel(x_ref, a_ref, b_ref, w_ref, bias_ref, o_ref, *, eps):
    y = _layer_norm(x_ref[...].astype(jnp.float32), a_ref[...], b_ref[...], eps)
    o_ref[...] = (jnp.dot(y.astype(jnp.bfloat16), w_ref[...],
                          preferred_element_type=jnp.float32)
                  + bias_ref[...]).astype(o_ref.dtype)


def _linear_kernel(x_ref, w_ref, bias_ref, o_ref):
    o_ref[...] = (jnp.dot(x_ref[...].astype(jnp.bfloat16), w_ref[...],
                          preferred_element_type=jnp.float32)
                  + bias_ref[...]).astype(o_ref.dtype)


def _ln_ffn_kernel(x_ref, a_ref, b_ref, w1_ref, b1_ref, w2_ref, b2_ref, o_ref,
                   y_sc, acc_sc, *, eps):
    # Whole FFN sublayer: x + W2 @ relu(W1 @ LN(x) + b1) + b2, with the d_ff
    # dimension tiled on an "arbitrary" grid axis so w1/w2 blocks stay small.
    f = pl.program_id(1)

    @pl.when(f == 0)
    def _():
        y_sc[...] = _layer_norm(x_ref[...].astype(jnp.float32),
                                a_ref[...], b_ref[...], eps).astype(jnp.bfloat16)
        acc_sc[...] = jnp.zeros_like(acc_sc)

    h = jnp.maximum(jnp.dot(y_sc[...], w1_ref[...],
                            preferred_element_type=jnp.float32) + b1_ref[...], 0.0)
    acc_sc[...] += jnp.dot(h.astype(jnp.bfloat16), w2_ref[...],
                           preferred_element_type=jnp.float32)

    @pl.when(f == pl.num_programs(1) - 1)
    def _():
        o_ref[...] = (x_ref[...].astype(jnp.float32) + acc_sc[...]
                      + b2_ref[...]).astype(o_ref.dtype)


def _flash_attn_kernel(q_ref, kv_ref, kmask_ref, res_ref, wo_ref, bo_ref, o_ref,
                       m_sc, l_sc, acc_sc, *,
                       heads, d_k, d_model, scale, causal, tq, tk):
    qi = pl.program_id(1)
    ki = pl.program_id(2)

    @pl.when(ki == 0)
    def _():
        m_sc[...] = jnp.full_like(m_sc, -jnp.inf)
        l_sc[...] = jnp.zeros_like(l_sc)
        acc_sc[...] = jnp.zeros_like(acc_sc)

    q = q_ref[0]        # (tq, D)   bf16
    kv = kv_ref[0]      # (tk, 2D)  bf16

    # Additive mask bias, computed once per (q,k) tile and shared across heads.
    km = kmask_ref[0].astype(jnp.float32)                       # (1, tk)
    bias = jnp.where(km > 0, 0.0, _NEG_INF)                     # key padding
    if causal:
        rows = qi * tq + jax.lax.broadcasted_iota(jnp.int32, (tq, tk), 0)
        cols = ki * tk + jax.lax.broadcasted_iota(jnp.int32, (tq, tk), 1)
        bias = bias + jnp.where(cols <= rows, 0.0, _NEG_INF)    # (tq, tk)

    for h in range(heads):                       # static unroll over heads
        lo = h * d_k
        qh = q[:, lo:lo + d_k]
        kh = kv[:, lo:lo + d_k]
        vh = kv[:, d_model + lo:d_model + lo + d_k]
        s = jax.lax.dot_general(qh, kh, (((1,), (1,)), ((), ())),
                                preferred_element_type=jnp.float32) * scale + bias
        m_prev = m_sc[h]                                        # (tq, 1)
        m_new = jnp.maximum(m_prev, jnp.max(s, axis=-1, keepdims=True))
        alpha = jnp.exp(m_prev - m_new)
        p = jnp.exp(s - m_new)
        l_sc[h] = alpha * l_sc[h] + jnp.sum(p, axis=-1, keepdims=True)
        # full-slab per-head accumulator store (no lane-offset RMW slices)
        acc_sc[h] = alpha * acc_sc[h] + jnp.dot(p.astype(jnp.bfloat16), vh,
                                                preferred_element_type=jnp.float32)
        m_sc[h] = m_new

    @pl.when(ki == pl.num_programs(2) - 1)
    def _():
        # Fused epilogue: softmax normalization + output projection + residual.
        out = res_ref[0].astype(jnp.float32) + bo_ref[...]      # (tq, D)
        for h in range(heads):
            inv = pl.reciprocal(l_sc[h], approx=True)           # EUP, (tq, 1)
            nh = (acc_sc[h] * inv).astype(jnp.bfloat16)         # (tq, d_k)
            out = out + jnp.dot(nh, wo_ref[h * d_k:(h + 1) * d_k, :],
                                preferred_element_type=jnp.float32)
        o_ref[0] = out.astype(o_ref.dtype)                      # lane-dense store


# -----------------------------------------------------------------------------
# pallas_call wrappers (all tiled over M = B*S; weights stay resident)
# -----------------------------------------------------------------------------
def layernorm(x, a2, b2, eps=1e-6):
    B, S, D = x.shape
    M = B * S
    tm = _tile(M, _TILE_M)
    out = pl.pallas_call(
        functools.partial(_layernorm_kernel, eps=eps),
        out_shape=jax.ShapeDtypeStruct((M, D), jnp.float32),
        grid=(M // tm,),
        in_specs=[pl.BlockSpec((tm, D), lambda i: (i, 0)),
                  pl.BlockSpec((1, D), lambda i: (0, 0)),
                  pl.BlockSpec((1, D), lambda i: (0, 0))],
        out_specs=pl.BlockSpec((tm, D), lambda i: (i, 0)),
        compiler_params=_cp(("parallel",)),
    )(x.reshape(M, D), a2.reshape(1, D), b2.reshape(1, D))
    return out.reshape(B, S, D)


def ln_qkv(x, ln_a, ln_b, w_qkv, b_qkv, eps=1e-6):
    B, S, D = x.shape
    M = B * S
    tm = _tile(M, _TILE_M)
    q, kv = pl.pallas_call(
        functools.partial(_ln_qkv_kernel, eps=eps, d_model=D),
        out_shape=(jax.ShapeDtypeStruct((M, D), jnp.bfloat16),
                   jax.ShapeDtypeStruct((M, 2 * D), jnp.bfloat16)),
        grid=(M // tm,),
        in_specs=[pl.BlockSpec((tm, D), lambda i: (i, 0)),
                  pl.BlockSpec((1, D), lambda i: (0, 0)),
                  pl.BlockSpec((1, D), lambda i: (0, 0)),
                  pl.BlockSpec((D, 3 * D), lambda i: (0, 0)),
                  pl.BlockSpec((1, 3 * D), lambda i: (0, 0))],
        out_specs=(pl.BlockSpec((tm, D), lambda i: (i, 0)),
                   pl.BlockSpec((tm, 2 * D), lambda i: (i, 0))),
        compiler_params=_cp(("parallel",)),
    )(x.reshape(M, D), ln_a.reshape(1, D), ln_b.reshape(1, D),
      w_qkv, b_qkv.reshape(1, 3 * D))
    return q.reshape(B, S, D), kv.reshape(B, S, 2 * D)


def ln_linear(x, ln_a, ln_b, w, b, eps=1e-6):
    B, S, D = x.shape
    Dout = w.shape[-1]
    M = B * S
    tm = _tile(M, _TILE_M)
    out = pl.pallas_call(
        functools.partial(_ln_linear_kernel, eps=eps),
        out_shape=jax.ShapeDtypeStruct((M, Dout), jnp.bfloat16),
        grid=(M // tm,),
        in_specs=[pl.BlockSpec((tm, D), lambda i: (i, 0)),
                  pl.BlockSpec((1, D), lambda i: (0, 0)),
                  pl.BlockSpec((1, D), lambda i: (0, 0)),
                  pl.BlockSpec((D, Dout), lambda i: (0, 0)),
                  pl.BlockSpec((1, Dout), lambda i: (0, 0))],
        out_specs=pl.BlockSpec((tm, Dout), lambda i: (i, 0)),
        compiler_params=_cp(("parallel",)),
    )(x.reshape(M, D), ln_a.reshape(1, D), ln_b.reshape(1, D), w, b.reshape(1, Dout))
    return out.reshape(B, S, Dout)


def linear(x, w, b):
    B, S, D = x.shape
    Dout = w.shape[-1]
    M = B * S
    tm = _tile(M, _TILE_M)
    out = pl.pallas_call(
        _linear_kernel,
        out_shape=jax.ShapeDtypeStruct((M, Dout), jnp.bfloat16),
        grid=(M // tm,),
        in_specs=[pl.BlockSpec((tm, D), lambda i: (i, 0)),
                  pl.BlockSpec((D, Dout), lambda i: (0, 0)),
                  pl.BlockSpec((1, Dout), lambda i: (0, 0))],
        out_specs=pl.BlockSpec((tm, Dout), lambda i: (i, 0)),
        compiler_params=_cp(("parallel",)),
    )(x.reshape(M, D), w, b.reshape(1, Dout))
    return out.reshape(B, S, Dout)


def ln_ffn_residual(x, ln_a, ln_b, w1, b1, w2, b2, eps=1e-6):
    B, S, D = x.shape
    Dff = w1.shape[-1]
    M = B * S
    tm = _tile(M, _TILE_M)
    tf = _tile(Dff, 1024, mult=128)      # d_ff tiled -> w1/w2 blocks stay small
    out = pl.pallas_call(
        functools.partial(_ln_ffn_kernel, eps=eps),
        out_shape=jax.ShapeDtypeStruct((M, D), jnp.bfloat16),
        grid=(M // tm, Dff // tf),
        in_specs=[pl.BlockSpec((tm, D), lambda i, f: (i, 0)),
                  pl.BlockSpec((1, D), lambda i, f: (0, 0)),
                  pl.BlockSpec((1, D), lambda i, f: (0, 0)),
                  pl.BlockSpec((D, tf), lambda i, f: (0, f)),
                  pl.BlockSpec((1, tf), lambda i, f: (0, f)),
                  pl.BlockSpec((tf, D), lambda i, f: (f, 0)),
                  pl.BlockSpec((1, D), lambda i, f: (0, 0))],
        out_specs=pl.BlockSpec((tm, D), lambda i, f: (i, 0)),
        scratch_shapes=[pltpu.VMEM((tm, D), jnp.bfloat16),   # LN(x), reused per f
                        pltpu.VMEM((tm, D), jnp.float32)],   # FFN accumulator
        compiler_params=_cp(("parallel", "arbitrary")),
    )(x.reshape(M, D), ln_a.reshape(1, D), ln_b.reshape(1, D),
      w1, b1.reshape(1, Dff), w2, b2.reshape(1, D))
    return out.reshape(B, S, D)


def flash_attention(q, kv, key_mask, res, wo, bo, heads, d_k, *, causal):
    # q:   (B, Sq, D)  bf16          kv: (B, Sk, 2D) bf16 (K | V)
    # key_mask: (B, 1, Sk) int8 key-padding mask (causal part generated in-kernel)
    # res: (B, Sq, D)  bf16 residual; wo: (D, D) bf16; bo: (D,) f32
    # returns res + attention_out @ wo + bo  (bf16)
    B, Sq, D = q.shape
    Sk = kv.shape[1]
    tq = _tile(Sq, 256, mult=16)
    tk = _tile(Sk, 512, mult=128)
    scale = 1.0 / math.sqrt(d_k)
    return pl.pallas_call(
        functools.partial(_flash_attn_kernel, heads=heads, d_k=d_k, d_model=D,
                          scale=scale, causal=causal, tq=tq, tk=tk),
        out_shape=jax.ShapeDtypeStruct((B, Sq, D), jnp.bfloat16),
        grid=(B, Sq // tq, Sk // tk),
        in_specs=[pl.BlockSpec((1, tq, D), lambda b, qi, ki: (b, qi, 0)),
                  pl.BlockSpec((1, tk, 2 * D), lambda b, qi, ki: (b, ki, 0)),
                  pl.BlockSpec((1, 1, tk), lambda b, qi, ki: (b, 0, ki)),
                  pl.BlockSpec((1, tq, D), lambda b, qi, ki: (b, qi, 0)),
                  pl.BlockSpec((D, D), lambda b, qi, ki: (0, 0)),
                  pl.BlockSpec((1, D), lambda b, qi, ki: (0, 0))],
        out_specs=pl.BlockSpec((1, tq, D), lambda b, qi, ki: (b, qi, 0)),
        scratch_shapes=[pltpu.VMEM((heads, tq, 1), jnp.float32),
                        pltpu.VMEM((heads, tq, 1), jnp.float32),
                        pltpu.VMEM((heads, tq, d_k), jnp.float32)],
        compiler_params=_cp(("parallel", "parallel", "arbitrary")),
    )(q, kv, key_mask, res, wo, bo.reshape(1, D))


# -----------------------------------------------------------------------------
# Decoder forward (glue)
# -----------------------------------------------------------------------------
def decoder_layer_forward(p, x, memory_bf16, src_kmask, tgt_kmask, h, d_model):
    # TODO(synk): dropout inside the residual sublayers is omitted (eval / p=0).
    d_k = d_model // h
    # --- self-attention sublayer: LN+QKV fused, flash attn w/ fused out-proj+residual
    q, kv = ln_qkv(x, p["ln0_a"], p["ln0_b"], p["sa_wqkv"], p["sa_bqkv"])
    x = flash_attention(q, kv, tgt_kmask, x, p["sa_wo"], p["sa_bo"], h, d_k, causal=True)
    # --- source-attention sublayer
    q = ln_linear(x, p["ln1_a"], p["ln1_b"], p["ca_wq"], p["ca_bq"])
    kv_mem = linear(memory_bf16, p["ca_wkv"], p["ca_bkv"])
    x = flash_attention(q, kv_mem, src_kmask, x, p["ca_wo"], p["ca_bo"], h, d_k, causal=False)
    # --- feed-forward sublayer (LN + FFN + residual fused, d_ff tiled)
    x = ln_ffn_residual(x, p["ln2_a"], p["ln2_b"],
                        p["ff_w1"], p["ff_b1"], p["ff_w2"], p["ff_b2"])
    return x


@functools.partial(jax.jit, static_argnames=("h", "d_model"))
def decoder_forward(params, x, memory, src_mask, tgt_mask, *, h, d_model):
    # Residual stream carried in bf16; memory cast once for all layers.
    x = x.astype(jnp.bfloat16)
    memory_bf16 = memory.astype(jnp.bfloat16)
    # Only (B, 1, S) int8 key-padding masks are passed to the kernels; the
    # causal component of tgt_mask is regenerated in-kernel from iota.
    # TODO(synk): tgt_mask is assumed to be (causal AND key-padding), the
    # standard annotated-transformer form; arbitrary dense masks unsupported.
    src_km = (src_mask[:, -1:, :] != 0).astype(jnp.int8)
    tgt_km = (tgt_mask[:, -1:, :] != 0).astype(jnp.int8)
    for p in params["layers"]:
        x = decoder_layer_forward(p, x, memory_bf16, src_km, tgt_km, h, d_model)
    return layernorm(x, params["norm_a"], params["norm_b"])


# -----------------------------------------------------------------------------
# Deterministic parameter init (matmul weights stored in bf16, LN/bias in f32)
# -----------------------------------------------------------------------------
def _w(key, shape):
    return (0.02 * jax.random.normal(key, shape, jnp.float32)).astype(jnp.bfloat16)


def init_params(key, N, d_model, d_ff):
    layers = []
    for i in range(N):
        ks = jax.random.split(jax.random.fold_in(key, i), 7)
        layers.append({
            "sa_wqkv": _w(ks[0], (d_model, 3 * d_model)),
            "sa_bqkv": jnp.zeros((3 * d_model,), jnp.float32),
            "sa_wo": _w(ks[1], (d_model, d_model)),
            "sa_bo": jnp.zeros((d_model,), jnp.float32),
            "ca_wq": _w(ks[2], (d_model, d_model)),
            "ca_bq": jnp.zeros((d_model,), jnp.float32),
            "ca_wkv": _w(ks[3], (d_model, 2 * d_model)),
            "ca_bkv": jnp.zeros((2 * d_model,), jnp.float32),
            "ca_wo": _w(ks[4], (d_model, d_model)),
            "ca_bo": jnp.zeros((d_model,), jnp.float32),
            "ff_w1": _w(ks[5], (d_model, d_ff)),
            "ff_b1": jnp.zeros((d_ff,), jnp.float32),
            "ff_w2": _w(ks[6], (d_ff, d_model)),
            "ff_b2": jnp.zeros((d_model,), jnp.float32),
            "ln0_a": jnp.ones((d_model,), jnp.float32),
            "ln0_b": jnp.zeros((d_model,), jnp.float32),
            "ln1_a": jnp.ones((d_model,), jnp.float32),
            "ln1_b": jnp.zeros((d_model,), jnp.float32),
            "ln2_a": jnp.ones((d_model,), jnp.float32),
            "ln2_b": jnp.zeros((d_model,), jnp.float32),
        })
    return {"layers": layers,
            "norm_a": jnp.ones((d_model,), jnp.float32),
            "norm_b": jnp.zeros((d_model,), jnp.float32)}


# -----------------------------------------------------------------------------
if __name__ == "__main__":
    B, S_TGT, S_SRC = 2, 8, 8
    D_MODEL, H, D_FF, N_LAYERS = 128, 4, 256, 2   # lane-dense (multiples of 128)

    root = jax.random.PRNGKey(0)
    k_x, k_mem, k_p = jax.random.split(root, 3)

    x = jax.random.normal(k_x, (B, S_TGT, D_MODEL), jnp.float32)
    memory = jax.random.normal(k_mem, (B, S_SRC, D_MODEL), jnp.float32)
    src_mask = jnp.ones((B, 1, S_SRC), jnp.float32)                        # (B,1,S_src)
    tgt_mask = jnp.tile(jnp.tril(jnp.ones((S_TGT, S_TGT), jnp.float32))[None],
                        (B, 1, 1))                                          # (B,S,S)

    params = init_params(k_p, N_LAYERS, D_MODEL, D_FF)

    out = decoder_forward(params, x, memory, src_mask, tgt_mask,
                          h=H, d_model=D_MODEL)
    jax.block_until_ready(out)
    assert out.shape == (B, S_TGT, D_MODEL)
    assert bool(jnp.all(jnp.isfinite(out)))
    print("KERNEL_OK")
</pallas_src>

<mosaic_0001>
module attributes {stable_mosaic.version = 11 : i64} {
  func.func @_ln_qkv_kernel(%arg0: i32, %arg1: memref<16x128xbf16, #tpu.memory_space<vmem>>, %arg2: memref<1x128xf32, #tpu.memory_space<vmem>>, %arg3: memref<1x128xf32, #tpu.memory_space<vmem>>, %arg4: memref<128x384xbf16, #tpu.memory_space<vmem>>, %arg5: memref<1x384xf32, #tpu.memory_space<vmem>>, %arg6: memref<16x128xbf16, #tpu.memory_space<vmem>>, %arg7: memref<16x256xbf16, #tpu.memory_space<vmem>>) attributes {dimension_semantics = [#tpu.dimension_semantics<parallel>], iteration_bounds = array<i64: 1>, scalar_prefetch = 0 : i64, scratch_operands = 0 : i64, tpu.core_type = #tpu.core_type<tc>, window_params = [{transform_indices = @transform_0, window_bounds = array<i64: 16, 128>}, {pipeline_mode = #tpu.pipeline_mode<synchronous>, transform_indices = @transform_1, window_bounds = array<i64: 1, 128>}, {pipeline_mode = #tpu.pipeline_mode<synchronous>, transform_indices = @transform_2, window_bounds = array<i64: 1, 128>}, {pipeline_mode = #tpu.pipeline_mode<synchronous>, transform_indices = @transform_3, window_bounds = array<i64: 128, 384>}, {pipeline_mode = #tpu.pipeline_mode<synchronous>, transform_indices = @transform_4, window_bounds = array<i64: 1, 384>}, {transform_indices = @transform_5, window_bounds = array<i64: 16, 128>}, {transform_indices = @transform_6, window_bounds = array<i64: 16, 256>}]} {
    %c0 = arith.constant 0 : index
    %c0_0 = arith.constant 0 : index
    %0 = vector.load %arg1[%c0, %c0_0] : memref<16x128xbf16, #tpu.memory_space<vmem>>, vector<16x128xbf16>
    %1 = arith.extf %0 : vector<16x128xbf16> to vector<16x128xf32>
    %c0_1 = arith.constant 0 : index
    %c0_2 = arith.constant 0 : index
    %2 = vector.load %arg2[%c0_1, %c0_2] : memref<1x128xf32, #tpu.memory_space<vmem>>, vector<1x128xf32>
    %c0_3 = arith.constant 0 : index
    %c0_4 = arith.constant 0 : index
    %3 = vector.load %arg3[%c0_3, %c0_4] : memref<1x128xf32, #tpu.memory_space<vmem>>, vector<1x128xf32>
    %cst = arith.constant dense<0.000000e+00> : vector<16xf32>
    %4 = vector.multi_reduction <add>, %1, %cst [1] : vector<16x128xf32> to vector<16xf32>
    %5 = vector.shape_cast %4 : vector<16xf32> to vector<16x1xf32>
    %cst_5 = arith.constant 1.280000e+02 : f32
    %6 = vector.broadcast %cst_5 : f32 to vector<16x1xf32>
    %7 = arith.divf %5, %6 : vector<16x1xf32>
    %8 = vector.broadcast %7 : vector<16x1xf32> to vector<16x128xf32>
    %9 = arith.subf %1, %8 : vector<16x128xf32>
    %10 = arith.mulf %9, %9 : vector<16x128xf32>
    %cst_6 = arith.constant dense<0.000000e+00> : vector<16xf32>
    %11 = vector.multi_reduction <add>, %10, %cst_6 [1] : vector<16x128xf32> to vector<16xf32>
    %12 = vector.shape_cast %11 : vector<16xf32> to vector<16x1xf32>
    %cst_7 = arith.constant 1.270000e+02 : f32
    %13 = vector.broadcast %cst_7 : f32 to vector<16x1xf32>
    %14 = arith.divf %12, %13 : vector<16x1xf32>
    %15 = vector.broadcast %2 : vector<1x128xf32> to vector<16x128xf32>
    %16 = arith.mulf %15, %9 : vector<16x128xf32>
    %cst_8 = arith.constant 9.99999997E-7 : f32
    %17 = vector.broadcast %cst_8 : f32 to vector<16x1xf32>
    %18 = arith.addf %14, %17 : vector<16x1xf32>
    %19 = math.rsqrt %18 : vector<16x1xf32>
    %20 = vector.broadcast %19 : vector<16x1xf32> to vector<16x128xf32>
    %21 = arith.mulf %16, %20 : vector<16x128xf32>
    %22 = vector.broadcast %3 : vector<1x128xf32> to vector<16x128xf32>
    %23 = arith.addf %21, %22 : vector<16x128xf32>
    %24 = arith.truncf %23 : vector<16x128xf32> to vector<16x128xbf16>
    %c0_9 = arith.constant 0 : index
    %c0_10 = arith.constant 0 : index
    %25 = vector.load %arg4[%c0_9, %c0_10] : memref<128x384xbf16, #tpu.memory_space<vmem>>, vector<128x384xbf16>
    %cst_11 = arith.constant dense<0.000000e+00> : vector<16x384xf32>
    %26 = tpu.matmul %24, %25, %cst_11 {dimension_numbers = #tpu.dot_dimension_numbers<[1], [0], [0], [1], [0, 0, 1, 1], [], []>} : vector<16x128xbf16>, vector<128x384xbf16>, vector<16x384xf32> -> vector<16x384xf32>
    %c0_12 = arith.constant 0 : index
    %c0_13 = arith.constant 0 : index
    %27 = vector.load %arg5[%c0_12, %c0_13] : memref<1x384xf32, #tpu.memory_space<vmem>>, vector<1x384xf32>
    %28 = vector.broadcast %27 : vector<1x384xf32> to vector<16x384xf32>
    %29 = arith.addf %26, %28 : vector<16x384xf32>
    %30 = vector.extract_strided_slice %29 {offsets = [0, 0], sizes = [16, 128], strides = [1, 1]} : vector<16x384xf32> to vector<16x128xf32>
    %31 = arith.truncf %30 : vector<16x128xf32> to vector<16x128xbf16>
    %c0_14 = arith.constant 0 : index
    %c0_15 = arith.constant 0 : index
    %32 = vector.load %arg6[%c0_14, %c0_15] : memref<16x128xbf16, #tpu.memory_space<vmem>>, vector<16x128xbf16>
    tpu.vector_store %arg6[%c0_14, %c0_15], %31 {strides = array<i32>} : memref<16x128xbf16, #tpu.memory_space<vmem>>, vector<16x128xbf16>,
    %33 = vector.extract_strided_slice %29 {offsets = [0, 128], sizes = [16, 256], strides = [1, 1]} : vector<16x384xf32> to vector<16x256xf32>
    %34 = arith.truncf %33 : vector<16x256xf32> to vector<16x256xbf16>
    %c0_16 = arith.constant 0 : index
    %c0_17 = arith.constant 0 : index
    %35 = vector.load %arg7[%c0_16, %c0_17] : memref<16x256xbf16, #tpu.memory_space<vmem>>, vector<16x256xbf16>
    tpu.vector_store %arg7[%c0_16, %c0_17], %34 {strides = array<i32>} : memref<16x256xbf16, #tpu.memory_space<vmem>>, vector<16x256xbf16>,
    return
  }
  func.func @transform_0(%arg0: i32) -> (i32, i32) {
    %c0_i32 = arith.constant 0 : i32
    %c0_i32_0 = arith.constant 0 : i32
    return %arg0, %c0_i32 : i32, i32
  }
  func.func @transform_1(%arg0: i32) -> (i32, i32) {
    %c0_i32 = arith.constant 0 : i32
    %c0_i32_0 = arith.constant 0 : i32
    %c0_i32_1 = arith.constant 0 : i32
    return %c0_i32, %c0_i32_0 : i32, i32
  }
  func.func @transform_2(%arg0: i32) -> (i32, i32) {
    %c0_i32 = arith.constant 0 : i32
    %c0_i32_0 = arith.constant 0 : i32
    %c0_i32_1 = arith.constant 0 : i32
    return %c0_i32, %c0_i32_0 : i32, i32
  }
  func.func @transform_3(%arg0: i32) -> (i32, i32) {
    %c0_i32 = arith.constant 0 : i32
    %c0_i32_0 = arith.constant 0 : i32
    %c0_i32_1 = arith.constant 0 : i32
    return %c0_i32, %c0_i32_0 : i32, i32
  }
  func.func @transform_4(%arg0: i32) -> (i32, i32) {
    %c0_i32 = arith.constant 0 : i32
    %c0_i32_0 = arith.constant 0 : i32
    %c0_i32_1 = arith.constant 0 : i32
    return %c0_i32, %c0_i32_0 : i32, i32
  }
  func.func @transform_5(%arg0: i32) -> (i32, i32) {
    %c0_i32 = arith.constant 0 : i32
    %c0_i32_0 = arith.constant 0 : i32
    return %arg0, %c0_i32 : i32, i32
  }
  func.func @transform_6(%arg0: i32) -> (i32, i32) {
    %c0_i32 = arith.constant 0 : i32
    %c0_i32_0 = arith.constant 0 : i32
    return %arg0, %c0_i32 : i32, i32
  }
}

module attributes {stable_mosaic.version = 11 : i64} {
  func.func @_linear_kernel(%arg0: i32, %arg1: memref<16x128xbf16, #tpu.memory_space<vmem>>, %arg2: memref<128x256xbf16, #tpu.memory_space<vmem>>, %arg3: memref<1x256xf32, #tpu.memory_space<vmem>>, %arg4: memref<16x256xbf16, #tpu.memory_space<vmem>>) attributes {dimension_semantics = [#tpu.dimension_semantics<parallel>], iteration_bounds = array<i64: 1>, scalar_prefetch = 0 : i64, scratch_operands = 0 : i64, tpu.core_type = #tpu.core_type<tc>, window_params = [{transform_indices = @transform_0, window_bounds = array<i64: 16, 128>}, {pipeline_mode = #tpu.pipeline_mode<synchronous>, transform_indices = @transform_1, window_bounds = array<i64: 128, 256>}, {pipeline_mode = #tpu.pipeline_mode<synchronous>, transform_indices = @transform_2, window_bounds = array<i64: 1, 256>}, {transform_indices = @transform_3, window_bounds = array<i64: 16, 256>}]} {
    %c0 = arith.constant 0 : index
    %c0_0 = arith.constant 0 : index
    %0 = vector.load %arg1[%c0, %c0_0] : memref<16x128xbf16, #tpu.memory_space<vmem>>, vector<16x128xbf16>
    %c0_1 = arith.constant 0 : index
    %c0_2 = arith.constant 0 : index
    %1 = vector.load %arg2[%c0_1, %c0_2] : memref<128x256xbf16, #tpu.memory_space<vmem>>, vector<128x256xbf16>
    %cst = arith.constant dense<0.000000e+00> : vector<16x256xf32>
    %2 = tpu.matmul %0, %1, %cst {dimension_numbers = #tpu.dot_dimension_numbers<[1], [0], [0], [1], [0, 0, 1, 1], [], []>} : vector<16x128xbf16>, vector<128x256xbf16>, vector<16x256xf32> -> vector<16x256xf32>
    %c0_3 = arith.constant 0 : index
    %c0_4 = arith.constant 0 : index
    %3 = vector.load %arg3[%c0_3, %c0_4] : memref<1x256xf32, #tpu.memory_space<vmem>>, vector<1x256xf32>
    %4 = vector.broadcast %3 : vector<1x256xf32> to vector<16x256xf32>
    %5 = arith.addf %2, %4 : vector<16x256xf32>
    %6 = arith.truncf %5 : vector<16x256xf32> to vector<16x256xbf16>
    %c0_5 = arith.constant 0 : index
    %c0_6 = arith.constant 0 : index
    %7 = vector.load %arg4[%c0_5, %c0_6] : memref<16x256xbf16, #tpu.memory_space<vmem>>, vector<16x256xbf16>
    tpu.vector_store %arg4[%c0_5, %c0_6], %6 {strides = array<i32>} : memref<16x256xbf16, #tpu.memory_space<vmem>>, vector<16x256xbf16>,
    return
  }
  func.func @transform_0(%arg0: i32) -> (i32, i32) {
    %c0_i32 = arith.constant 0 : i32
    %c0_i32_0 = arith.constant 0 : i32
    return %arg0, %c0_i32 : i32, i32
  }
  func.func @transform_1(%arg0: i32) -> (i32, i32) {
    %c0_i32 = arith.constant 0 : i32
    %c0_i32_0 = arith.constant 0 : i32
    %c0_i32_1 = arith.constant 0 : i32
    return %c0_i32, %c0_i32_0 : i32, i32
  }
  func.func @transform_2(%arg0: i32) -> (i32, i32) {
    %c0_i32 = arith.constant 0 : i32
    %c0_i32_0 = arith.constant 0 : i32
    %c0_i32_1 = arith.constant 0 : i32
    return %c0_i32, %c0_i32_0 : i32, i32
  }
  func.func @transform_3(%arg0: i32) -> (i32, i32) {
    %c0_i32 = arith.constant 0 : i32
    %c0_i32_0 = arith.constant 0 : i32
    return %arg0, %c0_i32 : i32, i32
  }
}

module attributes {stable_mosaic.version = 11 : i64} {
  func.func @_ln_linear_kernel(%arg0: i32, %arg1: memref<16x128xbf16, #tpu.memory_space<vmem>>, %arg2: memref<1x128xf32, #tpu.memory_space<vmem>>, %arg3: memref<1x128xf32, #tpu.memory_space<vmem>>, %arg4: memref<128x128xbf16, #tpu.memory_space<vmem>>, %arg5: memref<1x128xf32, #tpu.memory_space<vmem>>, %arg6: memref<16x128xbf16, #tpu.memory_space<vmem>>) attributes {dimension_semantics = [#tpu.dimension_semantics<parallel>], iteration_bounds = array<i64: 1>, scalar_prefetch = 0 : i64, scratch_operands = 0 : i64, tpu.core_type = #tpu.core_type<tc>, window_params = [{transform_indices = @transform_0, window_bounds = array<i64: 16, 128>}, {pipeline_mode = #tpu.pipeline_mode<synchronous>, transform_indices = @transform_1, window_bounds = array<i64: 1, 128>}, {pipeline_mode = #tpu.pipeline_mode<synchronous>, transform_indices = @transform_2, window_bounds = array<i64: 1, 128>}, {pipeline_mode = #tpu.pipeline_mode<synchronous>, transform_indices = @transform_3, window_bounds = array<i64: 128, 128>}, {pipeline_mode = #tpu.pipeline_mode<synchronous>, transform_indices = @transform_4, window_bounds = array<i64: 1, 128>}, {transform_indices = @transform_5, window_bounds = array<i64: 16, 128>}]} {
    %c0 = arith.constant 0 : index
    %c0_0 = arith.constant 0 : index
    %0 = vector.load %arg1[%c0, %c0_0] : memref<16x128xbf16, #tpu.memory_space<vmem>>, vector<16x128xbf16>
    %1 = arith.extf %0 : vector<16x128xbf16> to vector<16x128xf32>
    %c0_1 = arith.constant 0 : index
    %c0_2 = arith.constant 0 : index
    %2 = vector.load %arg2[%c0_1, %c0_2] : memref<1x128xf32, #tpu.memory_space<vmem>>, vector<1x128xf32>
    %c0_3 = arith.constant 0 : index
    %c0_4 = arith.constant 0 : index
    %3 = vector.load %arg3[%c0_3, %c0_4] : memref<1x128xf32, #tpu.memory_space<vmem>>, vector<1x128xf32>
    %cst = arith.constant dense<0.000000e+00> : vector<16xf32>
    %4 = vector.multi_reduction <add>, %1, %cst [1] : vector<16x128xf32> to vector<16xf32>
    %5 = vector.shape_cast %4 : vector<16xf32> to vector<16x1xf32>
    %cst_5 = arith.constant 1.280000e+02 : f32
    %6 = vector.broadcast %cst_5 : f32 to vector<16x1xf32>
    %7 = arith.divf %5, %6 : vector<16x1xf32>
    %8 = vector.broadcast %7 : vector<16x1xf32> to vector<16x128xf32>
    %9 = arith.subf %1, %8 : vector<16x128xf32>
    %10 = arith.mulf %9, %9 : vector<16x128xf32>
    %cst_6 = arith.constant dense<0.000000e+00> : vector<16xf32>
    %11 = vector.multi_reduction <add>, %10, %cst_6 [1] : vector<16x128xf32> to vector<16xf32>
    %12 = vector.shape_cast %11 : vector<16xf32> to vector<16x1xf32>
    %cst_7 = arith.constant 1.270000e+02 : f32
    %13 = vector.broadcast %cst_7 : f32 to vector<16x1xf32>
    %14 = arith.divf %12, %13 : vector<16x1xf32>
    %15 = vector.broadcast %2 : vector<1x128xf32> to vector<16x128xf32>
    %16 = arith.mulf %15, %9 : vector<16x128xf32>
    %cst_8 = arith.constant 9.99999997E-7 : f32
    %17 = vector.broadcast %cst_8 : f32 to vector<16x1xf32>
    %18 = arith.addf %14, %17 : vector<16x1xf32>
    %19 = math.rsqrt %18 : vector<16x1xf32>
    %20 = vector.broadcast %19 : vector<16x1xf32> to vector<16x128xf32>
    %21 = arith.mulf %16, %20 : vector<16x128xf32>
    %22 = vector.broadcast %3 : vector<1x128xf32> to vector<16x128xf32>
    %23 = arith.addf %21, %22 : vector<16x128xf32>
    %24 = arith.truncf %23 : vector<16x128xf32> to vector<16x128xbf16>
    %c0_9 = arith.constant 0 : index
    %c0_10 = arith.constant 0 : index
    %25 = vector.load %arg4[%c0_9, %c0_10] : memref<128x128xbf16, #tpu.memory_space<vmem>>, vector<128x128xbf16>
    %cst_11 = arith.constant dense<0.000000e+00> : vector<16x128xf32>
    %26 = tpu.matmul %24, %25, %cst_11 {dimension_numbers = #tpu.dot_dimension_numbers<[1], [0], [0], [1], [0, 0, 1, 1], [], []>} : vector<16x128xbf16>, vector<128x128xbf16>, vector<16x128xf32> -> vector<16x128xf32>
    %c0_12 = arith.constant 0 : index
    %c0_13 = arith.constant 0 : index
    %27 = vector.load %arg5[%c0_12, %c0_13] : memref<1x128xf32, #tpu.memory_space<vmem>>, vector<1x128xf32>
    %28 = vector.broadcast %27 : vector<1x128xf32> to vector<16x128xf32>
    %29 = arith.addf %26, %28 : vector<16x128xf32>
    %30 = arith.truncf %29 : vector<16x128xf32> to vector<16x128xbf16>
    %c0_14 = arith.constant 0 : index
    %c0_15 = arith.constant 0 : index
    %31 = vector.load %arg6[%c0_14, %c0_15] : memref<16x128xbf16, #tpu.memory_space<vmem>>, vector<16x128xbf16>
    tpu.vector_store %arg6[%c0_14, %c0_15], %30 {strides = array<i32>} : memref<16x128xbf16, #tpu.memory_space<vmem>>, vector<16x128xbf16>,
    return
  }
  func.func @transform_0(%arg0: i32) -> (i32, i32) {
    %c0_i32 = arith.constant 0 : i32
    %c0_i32_0 = arith.constant 0 : i32
    return %arg0, %c0_i32 : i32, i32
  }
  func.func @transform_1(%arg0: i32) -> (i32, i32) {
    %c0_i32 = arith.constant 0 : i32
    %c0_i32_0 = arith.constant 0 : i32
    %c0_i32_1 = arith.constant 0 : i32
    return %c0_i32, %c0_i32_0 : i32, i32
  }
  func.func @transform_2(%arg0: i32) -> (i32, i32) {
    %c0_i32 = arith.constant 0 : i32
    %c0_i32_0 = arith.constant 0 : i32
    %c0_i32_1 = arith.constant 0 : i32
    return %c0_i32, %c0_i32_0 : i32, i32
  }
  func.func @transform_3(%arg0: i32) -> (i32, i32) {
    %c0_i32 = arith.constant 0 : i32
    %c0_i32_0 = arith.constant 0 : i32
    %c0_i32_1 = arith.constant 0 : i32
    return %c0_i32, %c0_i32_0 : i32, i32
  }
  func.func @transform_4(%arg0: i32) -> (i32, i32) {
    %c0_i32 = arith.constant 0 : i32
    %c0_i32_0 = arith.constant 0 : i32
    %c0_i32_1 = arith.constant 0 : i32
    return %c0_i32, %c0_i32_0 : i32, i32
  }
  func.func @transform_5(%arg0: i32) -> (i32, i32) {
    %c0_i32 = arith.constant 0 : i32
    %c0_i32_0 = arith.constant 0 : i32
    return %arg0, %c0_i32 : i32, i32
  }
}

module attributes {stable_mosaic.version = 11 : i64} {
  func.func @_flash_attn_kernel(%arg0: i32, %arg1: i32, %arg2: i32, %arg3: memref<1x8x128xbf16, #tpu.memory_space<vmem>>, %arg4: memref<1x8x256xbf16, #tpu.memory_space<vmem>>, %arg5: memref<1x1x8xi8, #tpu.memory_space<vmem>>, %arg6: memref<1x8x128xbf16, #tpu.memory_space<vmem>>, %arg7: memref<128x128xbf16, #tpu.memory_space<vmem>>, %arg8: memref<1x128xf32, #tpu.memory_space<vmem>>, %arg9: memref<1x8x128xbf16, #tpu.memory_space<vmem>>, %arg10: memref<4x8x1xf32, #tpu.memory_space<vmem>>, %arg11: memref<4x8x1xf32, #tpu.memory_space<vmem>>, %arg12: memref<4x8x32xf32, #tpu.memory_space<vmem>>) attributes {dimension_semantics = [#tpu.dimension_semantics<parallel>, #tpu.dimension_semantics<parallel>, #tpu.dimension_semantics<arbitrary>], iteration_bounds = array<i64: 2, 1, 1>, scalar_prefetch = 0 : i64, scratch_operands = 3 : i64, tpu.core_type = #tpu.core_type<tc>, window_params = [{transform_indices = @transform_0, window_bounds = array<i64: 1, 8, 128>}, {transform_indices = @transform_1, window_bounds = array<i64: 1, 8, 256>}, {transform_indices = @transform_2, window_bounds = array<i64: 1, 1, 8>}, {transform_indices = @transform_3, window_bounds = array<i64: 1, 8, 128>}, {pipeline_mode = #tpu.pipeline_mode<synchronous>, transform_indices = @transform_4, window_bounds = array<i64: 128, 128>}, {pipeline_mode = #tpu.pipeline_mode<synchronous>, transform_indices = @transform_5, window_bounds = array<i64: 1, 128>}, {transform_indices = @transform_6, window_bounds = array<i64: 1, 8, 128>}]} {
    %c0_i32 = arith.constant 0 : i32
    %0 = arith.cmpi eq, %arg2, %c0_i32 : i32
    %1 = arith.extui %0 : i1 to i32
    %c0_i32_0 = arith.constant 0 : i32
    %2 = arith.cmpi ne, %1, %c0_i32_0 : i32
    scf.if %2 {
      %cst_105 = arith.constant 0xFF800000 : f32
      %188 = vector.broadcast %cst_105 : f32 to vector<4x8x1xf32>
      %c0_106 = arith.constant 0 : index
      %c0_107 = arith.constant 0 : index
      %c0_108 = arith.constant 0 : index
      %189 = vector.load %arg10[%c0_106, %c0_107, %c0_108] : memref<4x8x1xf32, #tpu.memory_space<vmem>>, vector<4x8x1xf32>
      tpu.vector_store %arg10[%c0_106, %c0_107, %c0_108], %188 {strides = array<i32>} : memref<4x8x1xf32, #tpu.memory_space<vmem>>, vector<4x8x1xf32>,
      %cst_109 = arith.constant 0.000000e+00 : f32
      %190 = vector.broadcast %cst_109 : f32 to vector<4x8x1xf32>
      %c0_110 = arith.constant 0 : index
      %c0_111 = arith.constant 0 : index
      %c0_112 = arith.constant 0 : index
      %191 = vector.load %arg11[%c0_110, %c0_111, %c0_112] : memref<4x8x1xf32, #tpu.memory_space<vmem>>, vector<4x8x1xf32>
      tpu.vector_store %arg11[%c0_110, %c0_111, %c0_112], %190 {strides = array<i32>} : memref<4x8x1xf32, #tpu.memory_space<vmem>>, vector<4x8x1xf32>,
      %cst_113 = arith.constant 0.000000e+00 : f32
      %192 = vector.broadcast %cst_113 : f32 to vector<4x8x32xf32>
      %c0_114 = arith.constant 0 : index
      %c0_115 = arith.constant 0 : index
      %c0_116 = arith.constant 0 : index
      %193 = vector.load %arg12[%c0_114, %c0_115, %c0_116] : memref<4x8x32xf32, #tpu.memory_space<vmem>>, vector<4x8x32xf32>
      tpu.vector_store %arg12[%c0_114, %c0_115, %c0_116], %192 {strides = array<i32>} : memref<4x8x32xf32, #tpu.memory_space<vmem>>, vector<4x8x32xf32>,
    } else {
    }
    %c0 = arith.constant 0 : index
    %c0_1 = arith.constant 0 : index
    %c0_2 = arith.constant 0 : index
    %3 = vector.load %arg3[%c0, %c0_1, %c0_2] : memref<1x8x128xbf16, #tpu.memory_space<vmem>>, vector<1x8x128xbf16>
    %4 = vector.shape_cast %3 : vector<1x8x128xbf16> to vector<8x128xbf16>
    %c0_3 = arith.constant 0 : index
    %c0_4 = arith.constant 0 : index
    %c0_5 = arith.constant 0 : index
    %5 = vector.load %arg4[%c0_3, %c0_4, %c0_5] : memref<1x8x256xbf16, #tpu.memory_space<vmem>>, vector<1x8x256xbf16>
    %6 = vector.shape_cast %5 : vector<1x8x256xbf16> to vector<8x256xbf16>
    %c0_6 = arith.constant 0 : index
    %c0_7 = arith.constant 0 : index
    %c0_8 = arith.constant 0 : index
    %7 = vector.load %arg5[%c0_6, %c0_7, %c0_8] : memref<1x1x8xi8, #tpu.memory_space<vmem>>, vector<1x1x8xi8>
    %8 = vector.shape_cast %7 : vector<1x1x8xi8> to vector<1x8xi8>
    %9 = arith.sitofp %8 : vector<1x8xi8> to vector<1x8xf32>
    %cst = arith.constant 0.000000e+00 : f32
    %10 = vector.broadcast %cst : f32 to vector<1x8xf32>
    %11 = arith.cmpf ogt, %9, %10 : vector<1x8xf32>
    %cst_9 = arith.constant 0.000000e+00 : f32
    %cst_10 = arith.constant -1.000000e+09 : f32
    %12 = vector.broadcast %cst_9 : f32 to vector<1x8xf32>
    %13 = vector.broadcast %cst_10 : f32 to vector<1x8xf32>
    %14 = arith.select %11, %12, %13 : vector<1x8xi1>, vector<1x8xf32>
    %c8_i32 = arith.constant 8 : i32
    %15 = arith.muli %arg1, %c8_i32 : i32
    %16 = tpu.iota {dimensions = array<i32: 0>} : vector<8x8xi32>
    %17 = vector.broadcast %15 : i32 to vector<8x8xi32>
    %18 = arith.addi %17, %16 : vector<8x8xi32>
    %c8_i32_11 = arith.constant 8 : i32
    %19 = arith.muli %arg2, %c8_i32_11 : i32
    %20 = tpu.iota {dimensions = array<i32: 1>} : vector<8x8xi32>
    %21 = vector.broadcast %19 : i32 to vector<8x8xi32>
    %22 = arith.addi %21, %20 : vector<8x8xi32>
    %23 = arith.cmpi sle, %22, %18 : vector<8x8xi32>
    %cst_12 = arith.constant 0.000000e+00 : f32
    %cst_13 = arith.constant -1.000000e+09 : f32
    %24 = vector.broadcast %cst_12 : f32 to vector<8x8xf32>
    %25 = vector.broadcast %cst_13 : f32 to vector<8x8xf32>
    %26 = arith.select %23, %24, %25 : vector<8x8xi1>, vector<8x8xf32>
    %27 = vector.broadcast %14 : vector<1x8xf32> to vector<8x8xf32>
    %28 = arith.addf %27, %26 : vector<8x8xf32>
    %29 = vector.extract_strided_slice %4 {offsets = [0, 0], sizes = [8, 32], strides = [1, 1]} : vector<8x128xbf16> to vector<8x32xbf16>
    %30 = vector.extract_strided_slice %6 {offsets = [0, 0], sizes = [8, 32], strides = [1, 1]} : vector<8x256xbf16> to vector<8x32xbf16>
    %31 = vector.extract_strided_slice %6 {offsets = [0, 128], sizes = [8, 32], strides = [1, 1]} : vector<8x256xbf16> to vector<8x32xbf16>
    %cst_14 = arith.constant dense<0.000000e+00> : vector<8x8xf32>
    %32 = tpu.matmul %29, %30, %cst_14 {dimension_numbers = #tpu.dot_dimension_numbers<[1], [1], [0], [0], [0, 0, 1, 0], [], []>} : vector<8x32xbf16>, vector<8x32xbf16>, vector<8x8xf32> -> vector<8x8xf32>
    %cst_15 = arith.constant 0.176776692 : f32
    %33 = vector.broadcast %cst_15 : f32 to vector<8x8xf32>
    %34 = arith.mulf %32, %33 : vector<8x8xf32>
    %35 = arith.addf %34, %28 : vector<8x8xf32>
    %c0_16 = arith.constant 0 : index
    %c0_17 = arith.constant 0 : index
    %c0_18 = arith.constant 0 : index
    %36 = vector.load %arg10[%c0_16, %c0_17, %c0_18] : memref<4x8x1xf32, #tpu.memory_space<vmem>>, vector<1x8x1xf32>
    %37 = vector.shape_cast %36 : vector<1x8x1xf32> to vector<8x1xf32>
    %cst_19 = arith.constant dense<0xFF800000> : vector<8xf32>
    %38 = vector.multi_reduction <maximumf>, %35, %cst_19 [1] : vector<8x8xf32> to vector<8xf32>
    %39 = vector.shape_cast %38 : vector<8xf32> to vector<8x1xf32>
    %40 = arith.maximumf %37, %39 : vector<8x1xf32>
    %41 = arith.subf %37, %40 : vector<8x1xf32>
    %42 = math.exp %41 : vector<8x1xf32>
    %43 = vector.broadcast %40 : vector<8x1xf32> to vector<8x8xf32>
    %44 = arith.subf %35, %43 : vector<8x8xf32>
    %45 = math.exp %44 : vector<8x8xf32>
    %c0_20 = arith.constant 0 : index
    %c0_21 = arith.constant 0 : index
    %c0_22 = arith.constant 0 : index
    %46 = vector.load %arg11[%c0_20, %c0_21, %c0_22] : memref<4x8x1xf32, #tpu.memory_space<vmem>>, vector<1x8x1xf32>
    %47 = vector.shape_cast %46 : vector<1x8x1xf32> to vector<8x1xf32>
    %48 = arith.mulf %42, %47 : vector<8x1xf32>
    %cst_23 = arith.constant dense<0.000000e+00> : vector<8xf32>
    %49 = vector.multi_reduction <add>, %45, %cst_23 [1] : vector<8x8xf32> to vector<8xf32>
    %50 = vector.shape_cast %49 : vector<8xf32> to vector<8x1xf32>
    %51 = arith.addf %48, %50 : vector<8x1xf32>
    %c0_24 = arith.constant 0 : index
    %c0_25 = arith.constant 0 : index
    %c0_26 = arith.constant 0 : index
    %52 = vector.load %arg11[%c0_24, %c0_25, %c0_26] : memref<4x8x1xf32, #tpu.memory_space<vmem>>, vector<1x8x1xf32>
    %53 = vector.shape_cast %52 : vector<1x8x1xf32> to vector<8x1xf32>
    %54 = vector.shape_cast %51 : vector<8x1xf32> to vector<1x8x1xf32>
    tpu.vector_store %arg11[%c0_24, %c0_25, %c0_26], %54 {strides = array<i32>} : memref<4x8x1xf32, #tpu.memory_space<vmem>>, vector<1x8x1xf32>,
    %c0_27 = arith.constant 0 : index
    %c0_28 = arith.constant 0 : index
    %c0_29 = arith.constant 0 : index
    %55 = vector.load %arg12[%c0_27, %c0_28, %c0_29] : memref<4x8x32xf32, #tpu.memory_space<vmem>>, vector<1x8x32xf32>
    %56 = vector.shape_cast %55 : vector<1x8x32xf32> to vector<8x32xf32>
    %57 = vector.broadcast %42 : vector<8x1xf32> to vector<8x32xf32>
    %58 = arith.mulf %57, %56 : vector<8x32xf32>
    %59 = arith.truncf %45 : vector<8x8xf32> to vector<8x8xbf16>
    %cst_30 = arith.constant dense<0.000000e+00> : vector<8x32xf32>
    %60 = tpu.matmul %59, %31, %cst_30 {dimension_numbers = #tpu.dot_dimension_numbers<[1], [0], [0], [1], [0, 0, 1, 1], [], []>} : vector<8x8xbf16>, vector<8x32xbf16>, vector<8x32xf32> -> vector<8x32xf32>
    %61 = arith.addf %58, %60 : vector<8x32xf32>
    %c0_31 = arith.constant 0 : index
    %c0_32 = arith.constant 0 : index
    %c0_33 = arith.constant 0 : index
    %62 = vector.load %arg12[%c0_31, %c0_32, %c0_33] : memref<4x8x32xf32, #tpu.memory_space<vmem>>, vector<1x8x32xf32>
    %63 = vector.shape_cast %62 : vector<1x8x32xf32> to vector<8x32xf32>
    %64 = vector.shape_cast %61 : vector<8x32xf32> to vector<1x8x32xf32>
    tpu.vector_store %arg12[%c0_31, %c0_32, %c0_33], %64 {strides = array<i32>} : memref<4x8x32xf32, #tpu.memory_space<vmem>>, vector<1x8x32xf32>,
    %c0_34 = arith.constant 0 : index
    %c0_35 = arith.constant 0 : index
    %c0_36 = arith.constant 0 : index
    %65 = vector.load %arg10[%c0_34, %c0_35, %c0_36] : memref<4x8x1xf32, #tpu.memory_space<vmem>>, vector<1x8x1xf32>
    %66 = vector.shape_cast %65 : vector<1x8x1xf32> to vector<8x1xf32>
    %67 = vector.shape_cast %40 : vector<8x1xf32> to vector<1x8x1xf32>
    tpu.vector_store %arg10[%c0_34, %c0_35, %c0_36], %67 {strides = array<i32>} : memref<4x8x1xf32, #tpu.memory_space<vmem>>, vector<1x8x1xf32>,
    %68 = vector.extract_strided_slice %4 {offsets = [0, 32], sizes = [8, 32], strides = [1, 1]} : vector<8x128xbf16> to vector<8x32xbf16>
    %69 = vector.extract_strided_slice %6 {offsets = [0, 32], sizes = [8, 32], strides = [1, 1]} : vector<8x256xbf16> to vector<8x32xbf16>
    %70 = vector.extract_strided_slice %6 {offsets = [0, 160], sizes = [8, 32], strides = [1, 1]} : vector<8x256xbf16> to vector<8x32xbf16>
    %cst_37 = arith.constant dense<0.000000e+00> : vector<8x8xf32>
    %71 = tpu.matmul %68, %69, %cst_37 {dimension_numbers = #tpu.dot_dimension_numbers<[1], [1], [0], [0], [0, 0, 1, 0], [], []>} : vector<8x32xbf16>, vector<8x32xbf16>, vector<8x8xf32> -> vector<8x8xf32>
    %cst_38 = arith.constant 0.176776692 : f32
    %72 = vector.broadcast %cst_38 : f32 to vector<8x8xf32>
    %73 = arith.mulf %71, %72 : vector<8x8xf32>
    %74 = arith.addf %73, %28 : vector<8x8xf32>
    %c1 = arith.constant 1 : index
    %c0_39 = arith.constant 0 : index
    %c0_40 = arith.constant 0 : index
    %75 = vector.load %arg10[%c1, %c0_39, %c0_40] : memref<4x8x1xf32, #tpu.memory_space<vmem>>, vector<1x8x1xf32>
    %76 = vector.shape_cast %75 : vector<1x8x1xf32> to vector<8x1xf32>
    %cst_41 = arith.constant dense<0xFF800000> : vector<8xf32>
    %77 = vector.multi_reduction <maximumf>, %74, %cst_41 [1] : vector<8x8xf32> to vector<8xf32>
    %78 = vector.shape_cast %77 : vector<8xf32> to vector<8x1xf32>
    %79 = arith.maximumf %76, %78 : vector<8x1xf32>
    %80 = arith.subf %76, %79 : vector<8x1xf32>
    %81 = math.exp %80 : vector<8x1xf32>
    %82 = vector.broadcast %79 : vector<8x1xf32> to vector<8x8xf32>
    %83 = arith.subf %74, %82 : vector<8x8xf32>
    %84 = math.exp %83 : vector<8x8xf32>
    %c1_42 = arith.constant 1 : index
    %c0_43 = arith.constant 0 : index
    %c0_44 = arith.constant 0 : index
    %85 = vector.load %arg11[%c1_42, %c0_43, %c0_44] : memref<4x8x1xf32, #tpu.memory_space<vmem>>, vector<1x8x1xf32>
    %86 = vector.shape_cast %85 : vector<1x8x1xf32> to vector<8x1xf32>
    %87 = arith.mulf %81, %86 : vector<8x1xf32>
    %cst_45 = arith.constant dense<0.000000e+00> : vector<8xf32>
    %88 = vector.multi_reduction <add>, %84, %cst_45 [1] : vector<8x8xf32> to vector<8xf32>
    %89 = vector.shape_cast %88 : vector<8xf32> to vector<8x1xf32>
    %90 = arith.addf %87, %89 : vector<8x1xf32>
    %c1_46 = arith.constant 1 : index
    %c0_47 = arith.constant 0 : index
    %c0_48 = arith.constant 0 : index
    %91 = vector.load %arg11[%c1_46, %c0_47, %c0_48] : memref<4x8x1xf32, #tpu.memory_space<vmem>>, vector<1x8x1xf32>
    %92 = vector.shape_cast %91 : vector<1x8x1xf32> to vector<8x1xf32>
    %93 = vector.shape_cast %90 : vector<8x1xf32> to vector<1x8x1xf32>
    tpu.vector_store %arg11[%c1_46, %c0_47, %c0_48], %93 {strides = array<i32>} : memref<4x8x1xf32, #tpu.memory_space<vmem>>, vector<1x8x1xf32>,
    %c1_49 = arith.constant 1 : index
    %c0_50 = arith.constant 0 : index
    %c0_51 = arith.constant 0 : index
    %94 = vector.load %arg12[%c1_49, %c0_50, %c0_51] : memref<4x8x32xf32, #tpu.memory_space<vmem>>, vector<1x8x32xf32>
    %95 = vector.shape_cast %94 : vector<1x8x32xf32> to vector<8x32xf32>
    %96 = vector.broadcast %81 : vector<8x1xf32> to vector<8x32xf32>
    %97 = arith.mulf %96, %95 : vector<8x32xf32>
    %98 = arith.truncf %84 : vector<8x8xf32> to vector<8x8xbf16>
    %cst_52 = arith.constant dense<0.000000e+00> : vector<8x32xf32>
    %99 = tpu.matmul %98, %70, %cst_52 {dimension_numbers = #tpu.dot_dimension_numbers<[1], [0], [0], [1], [0, 0, 1, 1], [], []>} : vector<8x8xbf16>, vector<8x32xbf16>, vector<8x32xf32> -> vector<8x32xf32>
    %100 = arith.addf %97, %99 : vector<8x32xf32>
    %c1_53 = arith.constant 1 : index
    %c0_54 = arith.constant 0 : index
    %c0_55 = arith.constant 0 : index
    %101 = vector.load %arg12[%c1_53, %c0_54, %c0_55] : memref<4x8x32xf32, #tpu.memory_space<vmem>>, vector<1x8x32xf32>
    %102 = vector.shape_cast %101 : vector<1x8x32xf32> to vector<8x32xf32>
    %103 = vector.shape_cast %100 : vector<8x32xf32> to vector<1x8x32xf32>
    tpu.vector_store %arg12[%c1_53, %c0_54, %c0_55], %103 {strides = array<i32>} : memref<4x8x32xf32, #tpu.memory_space<vmem>>, vector<1x8x32xf32>,
    %c1_56 = arith.constant 1 : index
    %c0_57 = arith.constant 0 : index
    %c0_58 = arith.constant 0 : index
    %104 = vector.load %arg10[%c1_56, %c0_57, %c0_58] : memref<4x8x1xf32, #tpu.memory_space<vmem>>, vector<1x8x1xf32>
    %105 = vector.shape_cast %104 : vector<1x8x1xf32> to vector<8x1xf32>
    %106 = vector.shape_cast %79 : vector<8x1xf32> to vector<1x8x1xf32>
    tpu.vector_store %arg10[%c1_56, %c0_57, %c0_58], %106 {strides = array<i32>} : memref<4x8x1xf32, #tpu.memory_space<vmem>>, vector<1x8x1xf32>,
    %107 = vector.extract_strided_slice %4 {offsets = [0, 64], sizes = [8, 32], strides = [1, 1]} : vector<8x128xbf16> to vector<8x32xbf16>
    %108 = vector.extract_strided_slice %6 {offsets = [0, 64], sizes = [8, 32], strides = [1, 1]} : vector<8x256xbf16> to vector<8x32xbf16>
    %109 = vector.extract_strided_slice %6 {offsets = [0, 192], sizes = [8, 32], strides = [1, 1]} : vector<8x256xbf16> to vector<8x32xbf16>
    %cst_59 = arith.constant dense<0.000000e+00> : vector<8x8xf32>
    %110 = tpu.matmul %107, %108, %cst_59 {dimension_numbers = #tpu.dot_dimension_numbers<[1], [1], [0], [0], [0, 0, 1, 0], [], []>} : vector<8x32xbf16>, vector<8x32xbf16>, vector<8x8xf32> -> vector<8x8xf32>
    %cst_60 = arith.constant 0.176776692 : f32
    %111 = vector.broadcast %cst_60 : f32 to vector<8x8xf32>
    %112 = arith.mulf %110, %111 : vector<8x8xf32>
    %113 = arith.addf %112, %28 : vector<8x8xf32>
    %c2 = arith.constant 2 : index
    %c0_61 = arith.constant 0 : index
    %c0_62 = arith.constant 0 : index
    %114 = vector.load %arg10[%c2, %c0_61, %c0_62] : memref<4x8x1xf32, #tpu.memory_space<vmem>>, vector<1x8x1xf32>
    %115 = vector.shape_cast %114 : vector<1x8x1xf32> to vector<8x1xf32>
    %cst_63 = arith.constant dense<0xFF800000> : vector<8xf32>
    %116 = vector.multi_reduction <maximumf>, %113, %cst_63 [1] : vector<8x8xf32> to vector<8xf32>
    %117 = vector.shape_cast %116 : vector<8xf32> to vector<8x1xf32>
    %118 = arith.maximumf %115, %117 : vector<8x1xf32>
    %119 = arith.subf %115, %118 : vector<8x1xf32>
    %120 = math.exp %119 : vector<8x1xf32>
    %121 = vector.broadcast %118 : vector<8x1xf32> to vector<8x8xf32>
    %122 = arith.subf %113, %121 : vector<8x8xf32>
    %123 = math.exp %122 : vector<8x8xf32>
    %c2_64 = arith.constant 2 : index
    %c0_65 = arith.constant 0 : index
    %c0_66 = arith.constant 0 : index
    %124 = vector.load %arg11[%c2_64, %c0_65, %c0_66] : memref<4x8x1xf32, #tpu.memory_space<vmem>>, vector<1x8x1xf32>
    %125 = vector.shape_cast %124 : vector<1x8x1xf32> to vector<8x1xf32>
    %126 = arith.mulf %120, %125 : vector<8x1xf32>
    %cst_67 = arith.constant dense<0.000000e+00> : vector<8xf32>
    %127 = vector.multi_reduction <add>, %123, %cst_67 [1] : vector<8x8xf32> to vector<8xf32>
    %128 = vector.shape_cast %127 : vector<8xf32> to vector<8x1xf32>
    %129 = arith.addf %126, %128 : vector<8x1xf32>
    %c2_68 = arith.constant 2 : index
    %c0_69 = arith.constant 0 : index
    %c0_70 = arith.constant 0 : index
    %130 = vector.load %arg11[%c2_68, %c0_69, %c0_70] : memref<4x8x1xf32, #tpu.memory_space<vmem>>, vector<1x8x1xf32>
    %131 = vector.shape_cast %130 : vector<1x8x1xf32> to vector<8x1xf32>
    %132 = vector.shape_cast %129 : vector<8x1xf32> to vector<1x8x1xf32>
    tpu.vector_store %arg11[%c2_68, %c0_69, %c0_70], %132 {strides = array<i32>} : memref<4x8x1xf32, #tpu.memory_space<vmem>>, vector<1x8x1xf32>,
    %c2_71 = arith.constant 2 : index
    %c0_72 = arith.constant 0 : index
    %c0_73 = arith.constant 0 : index
    %133 = vector.load %arg12[%c2_71, %c0_72, %c0_73] : memref<4x8x32xf32, #tpu.memory_space<vmem>>, vector<1x8x32xf32>
    %134 = vector.shape_cast %133 : vector<1x8x32xf32> to vector<8x32xf32>
    %135 = vector.broadcast %120 : vector<8x1xf32> to vector<8x32xf32>
    %136 = arith.mulf %135, %134 : vector<8x32xf32>
    %137 = arith.truncf %123 : vector<8x8xf32> to vector<8x8xbf16>
    %cst_74 = arith.constant dense<0.000000e+00> : vector<8x32xf32>
    %138 = tpu.matmul %137, %109, %cst_74 {dimension_numbers = #tpu.dot_dimension_numbers<[1], [0], [0], [1], [0, 0, 1, 1], [], []>} : vector<8x8xbf16>, vector<8x32xbf16>, vector<8x32xf32> -> vector<8x32xf32>
    %139 = arith.addf %136, %138 : vector<8x32xf32>
    %c2_75 = arith.constant 2 : index
    %c0_76 = arith.constant 0 : index
    %c0_77 = arith.constant 0 : index
    %140 = vector.load %arg12[%c2_75, %c0_76, %c0_77] : memref<4x8x32xf32, #tpu.memory_space<vmem>>, vector<1x8x32xf32>
    %141 = vector.shape_cast %140 : vector<1x8x32xf32> to vector<8x32xf32>
    %142 = vector.shape_cast %139 : vector<8x32xf32> to vector<1x8x32xf32>
    tpu.vector_store %arg12[%c2_75, %c0_76, %c0_77], %142 {strides = array<i32>} : memref<4x8x32xf32, #tpu.memory_space<vmem>>, vector<1x8x32xf32>,
    %c2_78 = arith.constant 2 : index
    %c0_79 = arith.constant 0 : index
    %c0_80 = arith.constant 0 : index
    %143 = vector.load %arg10[%c2_78, %c0_79, %c0_80] : memref<4x8x1xf32, #tpu.memory_space<vmem>>, vector<1x8x1xf32>
    %144 = vector.shape_cast %143 : vector<1x8x1xf32> to vector<8x1xf32>
    %145 = vector.shape_cast %118 : vector<8x1xf32> to vector<1x8x1xf32>
    tpu.vector_store %arg10[%c2_78, %c0_79, %c0_80], %145 {strides = array<i32>} : memref<4x8x1xf32, #tpu.memory_space<vmem>>, vector<1x8x1xf32>,
    %146 = vector.extract_strided_slice %4 {offsets = [0, 96], sizes = [8, 32], strides = [1, 1]} : vector<8x128xbf16> to vector<8x32xbf16>
    %147 = vector.extract_strided_slice %6 {offsets = [0, 96], sizes = [8, 32], strides = [1, 1]} : vector<8x256xbf16> to vector<8x32xbf16>
    %148 = vector.extract_strided_slice %6 {offsets = [0, 224], sizes = [8, 32], strides = [1, 1]} : vector<8x256xbf16> to vector<8x32xbf16>
    %cst_81 = arith.constant dense<0.000000e+00> : vector<8x8xf32>
    %149 = tpu.matmul %146, %147, %cst_81 {dimension_numbers = #tpu.dot_dimension_numbers<[1], [1], [0], [0], [0, 0, 1, 0], [], []>} : vector<8x32xbf16>, vector<8x32xbf16>, vector<8x8xf32> -> vector<8x8xf32>
    %cst_82 = arith.constant 0.176776692 : f32
    %150 = vector.broadcast %cst_82 : f32 to vector<8x8xf32>
    %151 = arith.mulf %149, %150 : vector<8x8xf32>
    %152 = arith.addf %151, %28 : vector<8x8xf32>
    %c3 = arith.constant 3 : index
    %c0_83 = arith.constant 0 : index
    %c0_84 = arith.constant 0 : index
    %153 = vector.load %arg10[%c3, %c0_83, %c0_84] : memref<4x8x1xf32, #tpu.memory_space<vmem>>, vector<1x8x1xf32>
    %154 = vector.shape_cast %153 : vector<1x8x1xf32> to vector<8x1xf32>
    %cst_85 = arith.constant dense<0xFF800000> : vector<8xf32>
    %155 = vector.multi_reduction <maximumf>, %152, %cst_85 [1] : vector<8x8xf32> to vector<8xf32>
    %156 = vector.shape_cast %155 : vector<8xf32> to vector<8x1xf32>
    %157 = arith.maximumf %154, %156 : vector<8x1xf32>
    %158 = arith.subf %154, %157 : vector<8x1xf32>
    %159 = math.exp %158 : vector<8x1xf32>
    %160 = vector.broadcast %157 : vector<8x1xf32> to vector<8x8xf32>
    %161 = arith.subf %152, %160 : vector<8x8xf32>
    %162 = math.exp %161 : vector<8x8xf32>
    %c3_86 = arith.constant 3 : index
    %c0_87 = arith.constant 0 : index
    %c0_88 = arith.constant 0 : index
    %163 = vector.load %arg11[%c3_86, %c0_87, %c0_88] : memref<4x8x1xf32, #tpu.memory_space<vmem>>, vector<1x8x1xf32>
    %164 = vector.shape_cast %163 : vector<1x8x1xf32> to vector<8x1xf32>
    %165 = arith.mulf %159, %164 : vector<8x1xf32>
    %cst_89 = arith.constant dense<0.000000e+00> : vector<8xf32>
    %166 = vector.multi_reduction <add>, %162, %cst_89 [1] : vector<8x8xf32> to vector<8xf32>
    %167 = vector.shape_cast %166 : vector<8xf32> to vector<8x1xf32>
    %168 = arith.addf %165, %167 : vector<8x1xf32>
    %c3_90 = arith.constant 3 : index
    %c0_91 = arith.constant 0 : index
    %c0_92 = arith.constant 0 : index
    %169 = vector.load %arg11[%c3_90, %c0_91, %c0_92] : memref<4x8x1xf32, #tpu.memory_space<vmem>>, vector<1x8x1xf32>
    %170 = vector.shape_cast %169 : vector<1x8x1xf32> to vector<8x1xf32>
    %171 = vector.shape_cast %168 : vector<8x1xf32> to vector<1x8x1xf32>
    tpu.vector_store %arg11[%c3_90, %c0_91, %c0_92], %171 {strides = array<i32>} : memref<4x8x1xf32, #tpu.memory_space<vmem>>, vector<1x8x1xf32>,
    %c3_93 = arith.constant 3 : index
    %c0_94 = arith.constant 0 : index
    %c0_95 = arith.constant 0 : index
    %172 = vector.load %arg12[%c3_93, %c0_94, %c0_95] : memref<4x8x32xf32, #tpu.memory_space<vmem>>, vector<1x8x32xf32>
    %173 = vector.shape_cast %172 : vector<1x8x32xf32> to vector<8x32xf32>
    %174 = vector.broadcast %159 : vector<8x1xf32> to vector<8x32xf32>
    %175 = arith.mulf %174, %173 : vector<8x32xf32>
    %176 = arith.truncf %162 : vector<8x8xf32> to vector<8x8xbf16>
    %cst_96 = arith.constant dense<0.000000e+00> : vector<8x32xf32>
    %177 = tpu.matmul %176, %148, %cst_96 {dimension_numbers = #tpu.dot_dimension_numbers<[1], [0], [0], [1], [0, 0, 1, 1], [], []>} : vector<8x8xbf16>, vector<8x32xbf16>, vector<8x32xf32> -> vector<8x32xf32>
    %178 = arith.addf %175, %177 : vector<8x32xf32>
    %c3_97 = arith.constant 3 : index
    %c0_98 = arith.constant 0 : index
    %c0_99 = arith.constant 0 : index
    %179 = vector.load %arg12[%c3_97, %c0_98, %c0_99] : memref<4x8x32xf32, #tpu.memory_space<vmem>>, vector<1x8x32xf32>
    %180 = vector.shape_cast %179 : vector<1x8x32xf32> to vector<8x32xf32>
    %181 = vector.shape_cast %178 : vector<8x32xf32> to vector<1x8x32xf32>
    tpu.vector_store %arg12[%c3_97, %c0_98, %c0_99], %181 {strides = array<i32>} : memref<4x8x32xf32, #tpu.memory_space<vmem>>, vector<1x8x32xf32>,
    %c3_100 = arith.constant 3 : index
    %c0_101 = arith.constant 0 : index
    %c0_102 = arith.constant 0 : index
    %182 = vector.load %arg10[%c3_100, %c0_101, %c0_102] : memref<4x8x1xf32, #tpu.memory_space<vmem>>, vector<1x8x1xf32>
    %183 = vector.shape_cast %182 : vector<1x8x1xf32> to vector<8x1xf32>
    %184 = vector.shape_cast %157 : vector<8x1xf32> to vector<1x8x1xf32>
    tpu.vector_store %arg10[%c3_100, %c0_101, %c0_102], %184 {strides = array<i32>} : memref<4x8x1xf32, #tpu.memory_space<vmem>>, vector<1x8x1xf32>,
    %c0_i32_103 = arith.constant 0 : i32
    %185 = arith.cmpi eq, %arg2, %c0_i32_103 : i32
    %186 = arith.extui %185 : i1 to i32
    %c0_i32_104 = arith.constant 0 : i32
    %187 = arith.cmpi ne, %186, %c0_i32_104 : i32
    scf.if %187 {
      %c0_105 = arith.constant 0 : index
      %c0_106 = arith.constant 0 : index
      %c0_107 = arith.constant 0 : index
      %188 = vector.load %arg6[%c0_105, %c0_106, %c0_107] : memref<1x8x128xbf16, #tpu.memory_space<vmem>>, vector<1x8x128xbf16>
      %189 = vector.shape_cast %188 : vector<1x8x128xbf16> to vector<8x128xbf16>
      %190 = arith.extf %189 : vector<8x128xbf16> to vector<8x128xf32>
      %c0_108 = arith.constant 0 : index
      %c0_109 = arith.constant 0 : index
      %191 = vector.load %arg8[%c0_108, %c0_109] : memref<1x128xf32, #tpu.memory_space<vmem>>, vector<1x128xf32>
      %192 = vector.broadcast %191 : vector<1x128xf32> to vector<8x128xf32>
      %193 = arith.addf %190, %192 : vector<8x128xf32>
      %c0_110 = arith.constant 0 : index
      %c0_111 = arith.constant 0 : index
      %c0_112 = arith.constant 0 : index
      %194 = vector.load %arg11[%c0_110, %c0_111, %c0_112] : memref<4x8x1xf32, #tpu.memory_space<vmem>>, vector<1x8x1xf32>
      %195 = vector.shape_cast %194 : vector<1x8x1xf32> to vector<8x1xf32>
      %196 = tpu.reciprocal %195 {approx = true} : vector<8x1xf32> -> vector<8x1xf32>
      %c0_113 = arith.constant 0 : index
      %c0_114 = arith.constant 0 : index
      %c0_115 = arith.constant 0 : index
      %197 = vector.load %arg12[%c0_113, %c0_114, %c0_115] : memref<4x8x32xf32, #tpu.memory_space<vmem>>, vector<1x8x32xf32>
      %198 = vector.shape_cast %197 : vector<1x8x32xf32> to vector<8x32xf32>
      %199 = vector.broadcast %196 : vector<8x1xf32> to vector<8x32xf32>
      %200 = arith.mulf %198, %199 : vector<8x32xf32>
      %201 = arith.truncf %200 : vector<8x32xf32> to vector<8x32xbf16>
      %c0_116 = arith.constant 0 : index
      %c0_117 = arith.constant 0 : index
      %202 = vector.load %arg7[%c0_116, %c0_117] : memref<128x128xbf16, #tpu.memory_space<vmem>>, vector<32x128xbf16>
      %cst_118 = arith.constant dense<0.000000e+00> : vector<8x128xf32>
      %203 = tpu.matmul %201, %202, %cst_118 {dimension_numbers = #tpu.dot_dimension_numbers<[1], [0], [0], [1], [0, 0, 1, 1], [], []>} : vector<8x32xbf16>, vector<32x128xbf16>, vector<8x128xf32> -> vector<8x128xf32>
      %204 = arith.addf %193, %203 : vector<8x128xf32>
      %c1_119 = arith.constant 1 : index
      %c0_120 = arith.constant 0 : index
      %c0_121 = arith.constant 0 : index
      %205 = vector.load %arg11[%c1_119, %c0_120, %c0_121] : memref<4x8x1xf32, #tpu.memory_space<vmem>>, vector<1x8x1xf32>
      %206 = vector.shape_cast %205 : vector<1x8x1xf32> to vector<8x1xf32>
      %207 = tpu.reciprocal %206 {approx = true} : vector<8x1xf32> -> vector<8x1xf32>
      %c1_122 = arith.constant 1 : index
      %c0_123 = arith.constant 0 : index
      %c0_124 = arith.constant 0 : index
      %208 = vector.load %arg12[%c1_122, %c0_123, %c0_124] : memref<4x8x32xf32, #tpu.memory_space<vmem>>, vector<1x8x32xf32>
      %209 = vector.shape_cast %208 : vector<1x8x32xf32> to vector<8x32xf32>
      %210 = vector.broadcast %207 : vector<8x1xf32> to vector<8x32xf32>
      %211 = arith.mulf %209, %210 : vector<8x32xf32>
      %212 = arith.truncf %211 : vector<8x32xf32> to vector<8x32xbf16>
      %c32 = arith.constant 32 : index
      %c0_125 = arith.constant 0 : index
      %213 = vector.load %arg7[%c32, %c0_125] : memref<128x128xbf16, #tpu.memory_space<vmem>>, vector<32x128xbf16>
      %cst_126 = arith.constant dense<0.000000e+00> : vector<8x128xf32>
      %214 = tpu.matmul %212, %213, %cst_126 {dimension_numbers = #tpu.dot_dimension_numbers<[1], [0], [0], [1], [0, 0, 1, 1], [], []>} : vector<8x32xbf16>, vector<32x128xbf16>, vector<8x128xf32> -> vector<8x128xf32>
      %215 = arith.addf %204, %214 : vector<8x128xf32>
      %c2_127 = arith.constant 2 : index
      %c0_128 = arith.constant 0 : index
      %c0_129 = arith.constant 0 : index
      %216 = vector.load %arg11[%c2_127, %c0_128, %c0_129] : memref<4x8x1xf32, #tpu.memory_space<vmem>>, vector<1x8x1xf32>
      %217 = vector.shape_cast %216 : vector<1x8x1xf32> to vector<8x1xf32>
      %218 = tpu.reciprocal %217 {approx = true} : vector<8x1xf32> -> vector<8x1xf32>
      %c2_130 = arith.constant 2 : index
      %c0_131 = arith.constant 0 : index
      %c0_132 = arith.constant 0 : index
      %219 = vector.load %arg12[%c2_130, %c0_131, %c0_132] : memref<4x8x32xf32, #tpu.memory_space<vmem>>, vector<1x8x32xf32>
      %220 = vector.shape_cast %219 : vector<1x8x32xf32> to vector<8x32xf32>
      %221 = vector.broadcast %218 : vector<8x1xf32> to vector<8x32xf32>
      %222 = arith.mulf %220, %221 : vector<8x32xf32>
      %223 = arith.truncf %222 : vector<8x32xf32> to vector<8x32xbf16>
      %c64 = arith.constant 64 : index
      %c0_133 = arith.constant 0 : index
      %224 = vector.load %arg7[%c64, %c0_133] : memref<128x128xbf16, #tpu.memory_space<vmem>>, vector<32x128xbf16>
      %cst_134 = arith.constant dense<0.000000e+00> : vector<8x128xf32>
      %225 = tpu.matmul %223, %224, %cst_134 {dimension_numbers = #tpu.dot_dimension_numbers<[1], [0], [0], [1], [0, 0, 1, 1], [], []>} : vector<8x32xbf16>, vector<32x128xbf16>, vector<8x128xf32> -> vector<8x128xf32>
      %226 = arith.addf %215, %225 : vector<8x128xf32>
      %c3_135 = arith.constant 3 : index
      %c0_136 = arith.constant 0 : index
      %c0_137 = arith.constant 0 : index
      %227 = vector.load %arg11[%c3_135, %c0_136, %c0_137] : memref<4x8x1xf32, #tpu.memory_space<vmem>>, vector<1x8x1xf32>
      %228 = vector.shape_cast %227 : vector<1x8x1xf32> to vector<8x1xf32>
      %229 = tpu.reciprocal %228 {approx = true} : vector<8x1xf32> -> vector<8x1xf32>
      %c3_138 = arith.constant 3 : index
      %c0_139 = arith.constant 0 : index
      %c0_140 = arith.constant 0 : index
      %230 = vector.load %arg12[%c3_138, %c0_139, %c0_140] : memref<4x8x32xf32, #tpu.memory_space<vmem>>, vector<1x8x32xf32>
      %231 = vector.shape_cast %230 : vector<1x8x32xf32> to vector<8x32xf32>
      %232 = vector.broadcast %229 : vector<8x1xf32> to vector<8x32xf32>
      %233 = arith.mulf %231, %232 : vector<8x32xf32>
      %234 = arith.truncf %233 : vector<8x32xf32> to vector<8x32xbf16>
      %c96 = arith.constant 96 : index
      %c0_141 = arith.constant 0 : index
      %235 = vector.load %arg7[%c96, %c0_141] : memref<128x128xbf16, #tpu.memory_space<vmem>>, vector<32x128xbf16>
      %cst_142 = arith.constant dense<0.000000e+00> : vector<8x128xf32>
      %236 = tpu.matmul %234, %235, %cst_142 {dimension_numbers = #tpu.dot_dimension_numbers<[1], [0], [0], [1], [0, 0, 1, 1], [], []>} : vector<8x32xbf16>, vector<32x128xbf16>, vector<8x128xf32> -> vector<8x128xf32>
      %237 = arith.addf %226, %236 : vector<8x128xf32>
      %238 = arith.truncf %237 : vector<8x128xf32> to vector<8x128xbf16>
      %c0_143 = arith.constant 0 : index
      %c0_144 = arith.constant 0 : index
      %c0_145 = arith.constant 0 : index
      %239 = vector.load %arg9[%c0_143, %c0_144, %c0_145] : memref<1x8x128xbf16, #tpu.memory_space<vmem>>, vector<1x8x128xbf16>
      %240 = vector.shape_cast %239 : vector<1x8x128xbf16> to vector<8x128xbf16>
      %241 = vector.shape_cast %238 : vector<8x128xbf16> to vector<1x8x128xbf16>
      tpu.vector_store %arg9[%c0_143, %c0_144, %c0_145], %241 {strides = array<i32>} : memref<1x8x128xbf16, #tpu.memory_space<vmem>>, vector<1x8x128xbf16>,
    } else {
    }
    return
  }
  func.func @transform_0(%arg0: i32, %arg1: i32, %arg2: i32) -> (i32, i32, i32) {
    %c0_i32 = arith.constant 0 : i32
    %c0_i32_0 = arith.constant 0 : i32
    return %arg0, %arg1, %c0_i32 : i32, i32, i32
  }
  func.func @transform_1(%arg0: i32, %arg1: i32, %arg2: i32) -> (i32, i32, i32) {
    %c0_i32 = arith.constant 0 : i32
    %c0_i32_0 = arith.constant 0 : i32
    return %arg0, %arg2, %c0_i32 : i32, i32, i32
  }
  func.func @transform_2(%arg0: i32, %arg1: i32, %arg2: i32) -> (i32, i32, i32) {
    %c0_i32 = arith.constant 0 : i32
    %c0_i32_0 = arith.constant 0 : i32
    return %arg0, %c0_i32, %arg2 : i32, i32, i32
  }
  func.func @transform_3(%arg0: i32, %arg1: i32, %arg2: i32) -> (i32, i32, i32) {
    %c0_i32 = arith.constant 0 : i32
    %c0_i32_0 = arith.constant 0 : i32
    return %arg0, %arg1, %c0_i32 : i32, i32, i32
  }
  func.func @transform_4(%arg0: i32, %arg1: i32, %arg2: i32) -> (i32, i32) {
    %c0_i32 = arith.constant 0 : i32
    %c0_i32_0 = arith.constant 0 : i32
    %c0_i32_1 = arith.constant 0 : i32
    return %c0_i32, %c0_i32_0 : i32, i32
  }
  func.func @transform_5(%arg0: i32, %arg1: i32, %arg2: i32) -> (i32, i32) {
    %c0_i32 = arith.constant 0 : i32
    %c0_i32_0 = arith.constant 0 : i32
    %c0_i32_1 = arith.constant 0 : i32
    return %c0_i32, %c0_i32_0 : i32, i32
  }
  func.func @transform_6(%arg0: i32, %arg1: i32, %arg2: i32) -> (i32, i32, i32) {
    %c0_i32 = arith.constant 0 : i32
    %c0_i32_0 = arith.constant 0 : i32
    return %arg0, %arg1, %c0_i32 : i32, i32, i32
  }
}

module attributes {stable_mosaic.version = 11 : i64} {
  func.func @_layernorm_kernel(%arg0: i32, %arg1: memref<16x128xbf16, #tpu.memory_space<vmem>>, %arg2: memref<1x128xf32, #tpu.memory_space<vmem>>, %arg3: memref<1x128xf32, #tpu.memory_space<vmem>>, %arg4: memref<16x128xf32, #tpu.memory_space<vmem>>) attributes {dimension_semantics = [#tpu.dimension_semantics<parallel>], iteration_bounds = array<i64: 1>, scalar_prefetch = 0 : i64, scratch_operands = 0 : i64, tpu.core_type = #tpu.core_type<tc>, window_params = [{transform_indices = @transform_0, window_bounds = array<i64: 16, 128>}, {pipeline_mode = #tpu.pipeline_mode<synchronous>, transform_indices = @transform_1, window_bounds = array<i64: 1, 128>}, {pipeline_mode = #tpu.pipeline_mode<synchronous>, transform_indices = @transform_2, window_bounds = array<i64: 1, 128>}, {transform_indices = @transform_3, window_bounds = array<i64: 16, 128>}]} {
    %c0 = arith.constant 0 : index
    %c0_0 = arith.constant 0 : index
    %0 = vector.load %arg1[%c0, %c0_0] : memref<16x128xbf16, #tpu.memory_space<vmem>>, vector<16x128xbf16>
    %1 = arith.extf %0 : vector<16x128xbf16> to vector<16x128xf32>
    %c0_1 = arith.constant 0 : index
    %c0_2 = arith.constant 0 : index
    %2 = vector.load %arg2[%c0_1, %c0_2] : memref<1x128xf32, #tpu.memory_space<vmem>>, vector<1x128xf32>
    %c0_3 = arith.constant 0 : index
    %c0_4 = arith.constant 0 : index
    %3 = vector.load %arg3[%c0_3, %c0_4] : memref<1x128xf32, #tpu.memory_space<vmem>>, vector<1x128xf32>
    %cst = arith.constant dense<0.000000e+00> : vector<16xf32>
    %4 = vector.multi_reduction <add>, %1, %cst [1] : vector<16x128xf32> to vector<16xf32>
    %5 = vector.shape_cast %4 : vector<16xf32> to vector<16x1xf32>
    %cst_5 = arith.constant 1.280000e+02 : f32
    %6 = vector.broadcast %cst_5 : f32 to vector<16x1xf32>
    %7 = arith.divf %5, %6 : vector<16x1xf32>
    %8 = vector.broadcast %7 : vector<16x1xf32> to vector<16x128xf32>
    %9 = arith.subf %1, %8 : vector<16x128xf32>
    %10 = arith.mulf %9, %9 : vector<16x128xf32>
    %cst_6 = arith.constant dense<0.000000e+00> : vector<16xf32>
    %11 = vector.multi_reduction <add>, %10, %cst_6 [1] : vector<16x128xf32> to vector<16xf32>
    %12 = vector.shape_cast %11 : vector<16xf32> to vector<16x1xf32>
    %cst_7 = arith.constant 1.270000e+02 : f32
    %13 = vector.broadcast %cst_7 : f32 to vector<16x1xf32>
    %14 = arith.divf %12, %13 : vector<16x1xf32>
    %15 = vector.broadcast %2 : vector<1x128xf32> to vector<16x128xf32>
    %16 = arith.mulf %15, %9 : vector<16x128xf32>
    %cst_8 = arith.constant 9.99999997E-7 : f32
    %17 = vector.broadcast %cst_8 : f32 to vector<16x1xf32>
    %18 = arith.addf %14, %17 : vector<16x1xf32>
    %19 = math.rsqrt %18 : vector<16x1xf32>
    %20 = vector.broadcast %19 : vector<16x1xf32> to vector<16x128xf32>
    %21 = arith.mulf %16, %20 : vector<16x128xf32>
    %22 = vector.broadcast %3 : vector<1x128xf32> to vector<16x128xf32>
    %23 = arith.addf %21, %22 : vector<16x128xf32>
    %c0_9 = arith.constant 0 : index
    %c0_10 = arith.constant 0 : index
    %24 = vector.load %arg4[%c0_9, %c0_10] : memref<16x128xf32, #tpu.memory_space<vmem>>, vector<16x128xf32>
    tpu.vector_store %arg4[%c0_9, %c0_10], %23 {strides = array<i32>} : memref<16x128xf32, #tpu.memory_space<vmem>>, vector<16x128xf32>,
    return
  }
  func.func @transform_0(%arg0: i32) -> (i32, i32) {
    %c0_i32 = arith.constant 0 : i32
    %c0_i32_0 = arith.constant 0 : i32
    return %arg0, %c0_i32 : i32, i32
  }
  func.func @transform_1(%arg0: i32) -> (i32, i32) {
    %c0_i32 = arith.constant 0 : i32
    %c0_i32_0 = arith.constant 0 : i32
    %c0_i32_1 = arith.constant 0 : i32
    return %c0_i32, %c0_i32_0 : i32, i32
  }
  func.func @transform_2(%arg0: i32) -> (i32, i32) {
    %c0_i32 = arith.constant 0 : i32
    %c0_i32_0 = arith.constant 0 : i32
    %c0_i32_1 = arith.constant 0 : i32
    return %c0_i32, %c0_i32_0 : i32, i32
  }
  func.func @transform_3(%arg0: i32) -> (i32, i32) {
    %c0_i32 = arith.constant 0 : i32
    %c0_i32_0 = arith.constant 0 : i32
    return %arg0, %c0_i32 : i32, i32
  }
}

module attributes {stable_mosaic.version = 11 : i64} {
  func.func @_ln_ffn_kernel(%arg0: i32, %arg1: i32, %arg2: memref<16x128xbf16, #tpu.memory_space<vmem>>, %arg3: memref<1x128xf32, #tpu.memory_space<vmem>>, %arg4: memref<1x128xf32, #tpu.memory_space<vmem>>, %arg5: memref<128x256xbf16, #tpu.memory_space<vmem>>, %arg6: memref<1x256xf32, #tpu.memory_space<vmem>>, %arg7: memref<256x128xbf16, #tpu.memory_space<vmem>>, %arg8: memref<1x128xf32, #tpu.memory_space<vmem>>, %arg9: memref<16x128xbf16, #tpu.memory_space<vmem>>, %arg10: memref<16x128xbf16, #tpu.memory_space<vmem>>, %arg11: memref<16x128xf32, #tpu.memory_space<vmem>>) attributes {dimension_semantics = [#tpu.dimension_semantics<parallel>, #tpu.dimension_semantics<arbitrary>], iteration_bounds = array<i64: 1, 1>, scalar_prefetch = 0 : i64, scratch_operands = 2 : i64, tpu.core_type = #tpu.core_type<tc>, window_params = [{transform_indices = @transform_0, window_bounds = array<i64: 16, 128>}, {pipeline_mode = #tpu.pipeline_mode<synchronous>, transform_indices = @transform_1, window_bounds = array<i64: 1, 128>}, {pipeline_mode = #tpu.pipeline_mode<synchronous>, transform_indices = @transform_2, window_bounds = array<i64: 1, 128>}, {transform_indices = @transform_3, window_bounds = array<i64: 128, 256>}, {transform_indices = @transform_4, window_bounds = array<i64: 1, 256>}, {transform_indices = @transform_5, window_bounds = array<i64: 256, 128>}, {pipeline_mode = #tpu.pipeline_mode<synchronous>, transform_indices = @transform_6, window_bounds = array<i64: 1, 128>}, {transform_indices = @transform_7, window_bounds = array<i64: 16, 128>}]} {
    %c0_i32 = arith.constant 0 : i32
    %0 = arith.cmpi eq, %arg1, %c0_i32 : i32
    %1 = arith.extui %0 : i1 to i32
    %c0_i32_0 = arith.constant 0 : i32
    %2 = arith.cmpi ne, %1, %c0_i32_0 : i32
    scf.if %2 {
      %c0_16 = arith.constant 0 : index
      %c0_17 = arith.constant 0 : index
      %20 = vector.load %arg2[%c0_16, %c0_17] : memref<16x128xbf16, #tpu.memory_space<vmem>>, vector<16x128xbf16>
      %21 = arith.extf %20 : vector<16x128xbf16> to vector<16x128xf32>
      %c0_18 = arith.constant 0 : index
      %c0_19 = arith.constant 0 : index
      %22 = vector.load %arg3[%c0_18, %c0_19] : memref<1x128xf32, #tpu.memory_space<vmem>>, vector<1x128xf32>
      %c0_20 = arith.constant 0 : index
      %c0_21 = arith.constant 0 : index
      %23 = vector.load %arg4[%c0_20, %c0_21] : memref<1x128xf32, #tpu.memory_space<vmem>>, vector<1x128xf32>
      %cst_22 = arith.constant dense<0.000000e+00> : vector<16xf32>
      %24 = vector.multi_reduction <add>, %21, %cst_22 [1] : vector<16x128xf32> to vector<16xf32>
      %25 = vector.shape_cast %24 : vector<16xf32> to vector<16x1xf32>
      %cst_23 = arith.constant 1.280000e+02 : f32
      %26 = vector.broadcast %cst_23 : f32 to vector<16x1xf32>
      %27 = arith.divf %25, %26 : vector<16x1xf32>
      %28 = vector.broadcast %27 : vector<16x1xf32> to vector<16x128xf32>
      %29 = arith.subf %21, %28 : vector<16x128xf32>
      %30 = arith.mulf %29, %29 : vector<16x128xf32>
      %cst_24 = arith.constant dense<0.000000e+00> : vector<16xf32>
      %31 = vector.multi_reduction <add>, %30, %cst_24 [1] : vector<16x128xf32> to vector<16xf32>
      %32 = vector.shape_cast %31 : vector<16xf32> to vector<16x1xf32>
      %cst_25 = arith.constant 1.270000e+02 : f32
      %33 = vector.broadcast %cst_25 : f32 to vector<16x1xf32>
      %34 = arith.divf %32, %33 : vector<16x1xf32>
      %35 = vector.broadcast %22 : vector<1x128xf32> to vector<16x128xf32>
      %36 = arith.mulf %35, %29 : vector<16x128xf32>
      %cst_26 = arith.constant 9.99999997E-7 : f32
      %37 = vector.broadcast %cst_26 : f32 to vector<16x1xf32>
      %38 = arith.addf %34, %37 : vector<16x1xf32>
      %39 = math.rsqrt %38 : vector<16x1xf32>
      %40 = vector.broadcast %39 : vector<16x1xf32> to vector<16x128xf32>
      %41 = arith.mulf %36, %40 : vector<16x128xf32>
      %42 = vector.broadcast %23 : vector<1x128xf32> to vector<16x128xf32>
      %43 = arith.addf %41, %42 : vector<16x128xf32>
      %44 = arith.truncf %43 : vector<16x128xf32> to vector<16x128xbf16>
      %c0_27 = arith.constant 0 : index
      %c0_28 = arith.constant 0 : index
      %45 = vector.load %arg10[%c0_27, %c0_28] : memref<16x128xbf16, #tpu.memory_space<vmem>>, vector<16x128xbf16>
      tpu.vector_store %arg10[%c0_27, %c0_28], %44 {strides = array<i32>} : memref<16x128xbf16, #tpu.memory_space<vmem>>, vector<16x128xbf16>,
      %cst_29 = arith.constant 0.000000e+00 : f32
      %46 = vector.broadcast %cst_29 : f32 to vector<16x128xf32>
      %c0_30 = arith.constant 0 : index
      %c0_31 = arith.constant 0 : index
      %47 = vector.load %arg11[%c0_30, %c0_31] : memref<16x128xf32, #tpu.memory_space<vmem>>, vector<16x128xf32>
      tpu.vector_store %arg11[%c0_30, %c0_31], %46 {strides = array<i32>} : memref<16x128xf32, #tpu.memory_space<vmem>>, vector<16x128xf32>,
    } else {
    }
    %c0 = arith.constant 0 : index
    %c0_1 = arith.constant 0 : index
    %3 = vector.load %arg10[%c0, %c0_1] : memref<16x128xbf16, #tpu.memory_space<vmem>>, vector<16x128xbf16>
    %c0_2 = arith.constant 0 : index
    %c0_3 = arith.constant 0 : index
    %4 = vector.load %arg5[%c0_2, %c0_3] : memref<128x256xbf16, #tpu.memory_space<vmem>>, vector<128x256xbf16>
    %cst = arith.constant dense<0.000000e+00> : vector<16x256xf32>
    %5 = tpu.matmul %3, %4, %cst {dimension_numbers = #tpu.dot_dimension_numbers<[1], [0], [0], [1], [0, 0, 1, 1], [], []>} : vector<16x128xbf16>, vector<128x256xbf16>, vector<16x256xf32> -> vector<16x256xf32>
    %c0_4 = arith.constant 0 : index
    %c0_5 = arith.constant 0 : index
    %6 = vector.load %arg6[%c0_4, %c0_5] : memref<1x256xf32, #tpu.memory_space<vmem>>, vector<1x256xf32>
    %7 = vector.broadcast %6 : vector<1x256xf32> to vector<16x256xf32>
    %8 = arith.addf %5, %7 : vector<16x256xf32>
    %cst_6 = arith.constant 0.000000e+00 : f32
    %9 = vector.broadcast %cst_6 : f32 to vector<16x256xf32>
    %10 = arith.maximumf %8, %9 : vector<16x256xf32>
    %c0_7 = arith.constant 0 : index
    %c0_8 = arith.constant 0 : index
    %11 = vector.load %arg11[%c0_7, %c0_8] : memref<16x128xf32, #tpu.memory_space<vmem>>, vector<16x128xf32>
    %12 = arith.truncf %10 : vector<16x256xf32> to vector<16x256xbf16>
    %c0_9 = arith.constant 0 : index
    %c0_10 = arith.constant 0 : index
    %13 = vector.load %arg7[%c0_9, %c0_10] : memref<256x128xbf16, #tpu.memory_space<vmem>>, vector<256x128xbf16>
    %cst_11 = arith.constant dense<0.000000e+00> : vector<16x128xf32>
    %14 = tpu.matmul %12, %13, %cst_11 {dimension_numbers = #tpu.dot_dimension_numbers<[1], [0], [0], [1], [0, 0, 1, 1], [], []>} : vector<16x256xbf16>, vector<256x128xbf16>, vector<16x128xf32> -> vector<16x128xf32>
    %15 = arith.addf %11, %14 : vector<16x128xf32>
    %c0_12 = arith.constant 0 : index
    %c0_13 = arith.constant 0 : index
    %16 = vector.load %arg11[%c0_12, %c0_13] : memref<16x128xf32, #tpu.memory_space<vmem>>, vector<16x128xf32>
    tpu.vector_store %arg11[%c0_12, %c0_13], %15 {strides = array<i32>} : memref<16x128xf32, #tpu.memory_space<vmem>>, vector<16x128xf32>,
    %c0_i32_14 = arith.constant 0 : i32
    %17 = arith.cmpi eq, %arg1, %c0_i32_14 : i32
    %18 = arith.extui %17 : i1 to i32
    %c0_i32_15 = arith.constant 0 : i32
    %19 = arith.cmpi ne, %18, %c0_i32_15 : i32
    scf.if %19 {
      %c0_16 = arith.constant 0 : index
      %c0_17 = arith.constant 0 : index
      %20 = vector.load %arg2[%c0_16, %c0_17] : memref<16x128xbf16, #tpu.memory_space<vmem>>, vector<16x128xbf16>
      %21 = arith.extf %20 : vector<16x128xbf16> to vector<16x128xf32>
      %c0_18 = arith.constant 0 : index
      %c0_19 = arith.constant 0 : index
      %22 = vector.load %arg11[%c0_18, %c0_19] : memref<16x128xf32, #tpu.memory_space<vmem>>, vector<16x128xf32>
      %23 = arith.addf %21, %22 : vector<16x128xf32>
      %c0_20 = arith.constant 0 : index
      %c0_21 = arith.constant 0 : index
      %24 = vector.load %arg8[%c0_20, %c0_21] : memref<1x128xf32, #tpu.memory_space<vmem>>, vector<1x128xf32>
      %25 = vector.broadcast %24 : vector<1x128xf32> to vector<16x128xf32>
      %26 = arith.addf %23, %25 : vector<16x128xf32>
      %27 = arith.truncf %26 : vector<16x128xf32> to vector<16x128xbf16>
      %c0_22 = arith.constant 0 : index
      %c0_23 = arith.constant 0 : index
      %28 = vector.load %arg9[%c0_22, %c0_23] : memref<16x128xbf16, #tpu.memory_space<vmem>>, vector<16x128xbf16>
      tpu.vector_store %arg9[%c0_22, %c0_23], %27 {strides = array<i32>} : memref<16x128xbf16, #tpu.memory_space<vmem>>, vector<16x128xbf16>,
    } else {
    }
    return
  }
  func.func @transform_0(%arg0: i32, %arg1: i32) -> (i32, i32) {
    %c0_i32 = arith.constant 0 : i32
    %c0_i32_0 = arith.constant 0 : i32
    return %arg0, %c0_i32 : i32, i32
  }
  func.func @transform_1(%arg0: i32, %arg1: i32) -> (i32, i32) {
    %c0_i32 = arith.constant 0 : i32
    %c0_i32_0 = arith.constant 0 : i32
    %c0_i32_1 = arith.constant 0 : i32
    return %c0_i32, %c0_i32_0 : i32, i32
  }
  func.func @transform_2(%arg0: i32, %arg1: i32) -> (i32, i32) {
    %c0_i32 = arith.constant 0 : i32
    %c0_i32_0 = arith.constant 0 : i32
    %c0_i32_1 = arith.constant 0 : i32
    return %c0_i32, %c0_i32_0 : i32, i32
  }
  func.func @transform_3(%arg0: i32, %arg1: i32) -> (i32, i32) {
    %c0_i32 = arith.constant 0 : i32
    %c0_i32_0 = arith.constant 0 : i32
    return %c0_i32, %arg1 : i32, i32
  }
  func.func @transform_4(%arg0: i32, %arg1: i32) -> (i32, i32) {
    %c0_i32 = arith.constant 0 : i32
    %c0_i32_0 = arith.constant 0 : i32
    return %c0_i32, %arg1 : i32, i32
  }
  func.func @transform_5(%arg0: i32, %arg1: i32) -> (i32, i32) {
    %c0_i32 = arith.constant 0 : i32
    %c0_i32_0 = arith.constant 0 : i32
    return %arg1, %c0_i32 : i32, i32
  }
  func.func @transform_6(%arg0: i32, %arg1: i32) -> (i32, i32) {
    %c0_i32 = arith.constant 0 : i32
    %c0_i32_0 = arith.constant 0 : i32
    %c0_i32_1 = arith.constant 0 : i32
    return %c0_i32, %c0_i32_0 : i32, i32
  }
  func.func @transform_7(%arg0: i32, %arg1: i32) -> (i32, i32) {
    %c0_i32 = arith.constant 0 : i32
    %c0_i32_0 = arith.constant 0 : i32
    return %arg0, %c0_i32 : i32, i32
  }
}

module attributes {stable_mosaic.version = 11 : i64} {
  func.func @_flash_attn_kernel(%arg0: i32, %arg1: i32, %arg2: i32, %arg3: memref<1x8x128xbf16, #tpu.memory_space<vmem>>, %arg4: memref<1x8x256xbf16, #tpu.memory_space<vmem>>, %arg5: memref<1x1x8xi8, #tpu.memory_space<vmem>>, %arg6: memref<1x8x128xbf16, #tpu.memory_space<vmem>>, %arg7: memref<128x128xbf16, #tpu.memory_space<vmem>>, %arg8: memref<1x128xf32, #tpu.memory_space<vmem>>, %arg9: memref<1x8x128xbf16, #tpu.memory_space<vmem>>, %arg10: memref<4x8x1xf32, #tpu.memory_space<vmem>>, %arg11: memref<4x8x1xf32, #tpu.memory_space<vmem>>, %arg12: memref<4x8x32xf32, #tpu.memory_space<vmem>>) attributes {dimension_semantics = [#tpu.dimension_semantics<parallel>, #tpu.dimension_semantics<parallel>, #tpu.dimension_semantics<arbitrary>], iteration_bounds = array<i64: 2, 1, 1>, scalar_prefetch = 0 : i64, scratch_operands = 3 : i64, tpu.core_type = #tpu.core_type<tc>, window_params = [{transform_indices = @transform_0, window_bounds = array<i64: 1, 8, 128>}, {transform_indices = @transform_1, window_bounds = array<i64: 1, 8, 256>}, {transform_indices = @transform_2, window_bounds = array<i64: 1, 1, 8>}, {transform_indices = @transform_3, window_bounds = array<i64: 1, 8, 128>}, {pipeline_mode = #tpu.pipeline_mode<synchronous>, transform_indices = @transform_4, window_bounds = array<i64: 128, 128>}, {pipeline_mode = #tpu.pipeline_mode<synchronous>, transform_indices = @transform_5, window_bounds = array<i64: 1, 128>}, {transform_indices = @transform_6, window_bounds = array<i64: 1, 8, 128>}]} {
    %c0_i32 = arith.constant 0 : i32
    %0 = arith.cmpi eq, %arg2, %c0_i32 : i32
    %1 = arith.extui %0 : i1 to i32
    %c0_i32_0 = arith.constant 0 : i32
    %2 = arith.cmpi ne, %1, %c0_i32_0 : i32
    scf.if %2 {
      %cst_102 = arith.constant 0xFF800000 : f32
      %178 = vector.broadcast %cst_102 : f32 to vector<4x8x1xf32>
      %c0_103 = arith.constant 0 : index
      %c0_104 = arith.constant 0 : index
      %c0_105 = arith.constant 0 : index
      %179 = vector.load %arg10[%c0_103, %c0_104, %c0_105] : memref<4x8x1xf32, #tpu.memory_space<vmem>>, vector<4x8x1xf32>
      tpu.vector_store %arg10[%c0_103, %c0_104, %c0_105], %178 {strides = array<i32>} : memref<4x8x1xf32, #tpu.memory_space<vmem>>, vector<4x8x1xf32>,
      %cst_106 = arith.constant 0.000000e+00 : f32
      %180 = vector.broadcast %cst_106 : f32 to vector<4x8x1xf32>
      %c0_107 = arith.constant 0 : index
      %c0_108 = arith.constant 0 : index
      %c0_109 = arith.constant 0 : index
      %181 = vector.load %arg11[%c0_107, %c0_108, %c0_109] : memref<4x8x1xf32, #tpu.memory_space<vmem>>, vector<4x8x1xf32>
      tpu.vector_store %arg11[%c0_107, %c0_108, %c0_109], %180 {strides = array<i32>} : memref<4x8x1xf32, #tpu.memory_space<vmem>>, vector<4x8x1xf32>,
      %cst_110 = arith.constant 0.000000e+00 : f32
      %182 = vector.broadcast %cst_110 : f32 to vector<4x8x32xf32>
      %c0_111 = arith.constant 0 : index
      %c0_112 = arith.constant 0 : index
      %c0_113 = arith.constant 0 : index
      %183 = vector.load %arg12[%c0_111, %c0_112, %c0_113] : memref<4x8x32xf32, #tpu.memory_space<vmem>>, vector<4x8x32xf32>
      tpu.vector_store %arg12[%c0_111, %c0_112, %c0_113], %182 {strides = array<i32>} : memref<4x8x32xf32, #tpu.memory_space<vmem>>, vector<4x8x32xf32>,
    } else {
    }
    %c0 = arith.constant 0 : index
    %c0_1 = arith.constant 0 : index
    %c0_2 = arith.constant 0 : index
    %3 = vector.load %arg3[%c0, %c0_1, %c0_2] : memref<1x8x128xbf16, #tpu.memory_space<vmem>>, vector<1x8x128xbf16>
    %4 = vector.shape_cast %3 : vector<1x8x128xbf16> to vector<8x128xbf16>
    %c0_3 = arith.constant 0 : index
    %c0_4 = arith.constant 0 : index
    %c0_5 = arith.constant 0 : index
    %5 = vector.load %arg4[%c0_3, %c0_4, %c0_5] : memref<1x8x256xbf16, #tpu.memory_space<vmem>>, vector<1x8x256xbf16>
    %6 = vector.shape_cast %5 : vector<1x8x256xbf16> to vector<8x256xbf16>
    %c0_6 = arith.constant 0 : index
    %c0_7 = arith.constant 0 : index
    %c0_8 = arith.constant 0 : index
    %7 = vector.load %arg5[%c0_6, %c0_7, %c0_8] : memref<1x1x8xi8, #tpu.memory_space<vmem>>, vector<1x1x8xi8>
    %8 = vector.shape_cast %7 : vector<1x1x8xi8> to vector<1x8xi8>
    %9 = arith.sitofp %8 : vector<1x8xi8> to vector<1x8xf32>
    %cst = arith.constant 0.000000e+00 : f32
    %10 = vector.broadcast %cst : f32 to vector<1x8xf32>
    %11 = arith.cmpf ogt, %9, %10 : vector<1x8xf32>
    %cst_9 = arith.constant 0.000000e+00 : f32
    %cst_10 = arith.constant -1.000000e+09 : f32
    %12 = vector.broadcast %cst_9 : f32 to vector<1x8xf32>
    %13 = vector.broadcast %cst_10 : f32 to vector<1x8xf32>
    %14 = arith.select %11, %12, %13 : vector<1x8xi1>, vector<1x8xf32>
    %15 = vector.extract_strided_slice %4 {offsets = [0, 0], sizes = [8, 32], strides = [1, 1]} : vector<8x128xbf16> to vector<8x32xbf16>
    %16 = vector.extract_strided_slice %6 {offsets = [0, 0], sizes = [8, 32], strides = [1, 1]} : vector<8x256xbf16> to vector<8x32xbf16>
    %17 = vector.extract_strided_slice %6 {offsets = [0, 128], sizes = [8, 32], strides = [1, 1]} : vector<8x256xbf16> to vector<8x32xbf16>
    %cst_11 = arith.constant dense<0.000000e+00> : vector<8x8xf32>
    %18 = tpu.matmul %15, %16, %cst_11 {dimension_numbers = #tpu.dot_dimension_numbers<[1], [1], [0], [0], [0, 0, 1, 0], [], []>} : vector<8x32xbf16>, vector<8x32xbf16>, vector<8x8xf32> -> vector<8x8xf32>
    %cst_12 = arith.constant 0.176776692 : f32
    %19 = vector.broadcast %cst_12 : f32 to vector<8x8xf32>
    %20 = arith.mulf %18, %19 : vector<8x8xf32>
    %21 = vector.broadcast %14 : vector<1x8xf32> to vector<8x8xf32>
    %22 = arith.addf %20, %21 : vector<8x8xf32>
    %c0_13 = arith.constant 0 : index
    %c0_14 = arith.constant 0 : index
    %c0_15 = arith.constant 0 : index
    %23 = vector.load %arg10[%c0_13, %c0_14, %c0_15] : memref<4x8x1xf32, #tpu.memory_space<vmem>>, vector<1x8x1xf32>
    %24 = vector.shape_cast %23 : vector<1x8x1xf32> to vector<8x1xf32>
    %cst_16 = arith.constant dense<0xFF800000> : vector<8xf32>
    %25 = vector.multi_reduction <maximumf>, %22, %cst_16 [1] : vector<8x8xf32> to vector<8xf32>
    %26 = vector.shape_cast %25 : vector<8xf32> to vector<8x1xf32>
    %27 = arith.maximumf %24, %26 : vector<8x1xf32>
    %28 = arith.subf %24, %27 : vector<8x1xf32>
    %29 = math.exp %28 : vector<8x1xf32>
    %30 = vector.broadcast %27 : vector<8x1xf32> to vector<8x8xf32>
    %31 = arith.subf %22, %30 : vector<8x8xf32>
    %32 = math.exp %31 : vector<8x8xf32>
    %c0_17 = arith.constant 0 : index
    %c0_18 = arith.constant 0 : index
    %c0_19 = arith.constant 0 : index
    %33 = vector.load %arg11[%c0_17, %c0_18, %c0_19] : memref<4x8x1xf32, #tpu.memory_space<vmem>>, vector<1x8x1xf32>
    %34 = vector.shape_cast %33 : vector<1x8x1xf32> to vector<8x1xf32>
    %35 = arith.mulf %29, %34 : vector<8x1xf32>
    %cst_20 = arith.constant dense<0.000000e+00> : vector<8xf32>
    %36 = vector.multi_reduction <add>, %32, %cst_20 [1] : vector<8x8xf32> to vector<8xf32>
    %37 = vector.shape_cast %36 : vector<8xf32> to vector<8x1xf32>
    %38 = arith.addf %35, %37 : vector<8x1xf32>
    %c0_21 = arith.constant 0 : index
    %c0_22 = arith.constant 0 : index
    %c0_23 = arith.constant 0 : index
    %39 = vector.load %arg11[%c0_21, %c0_22, %c0_23] : memref<4x8x1xf32, #tpu.memory_space<vmem>>, vector<1x8x1xf32>
    %40 = vector.shape_cast %39 : vector<1x8x1xf32> to vector<8x1xf32>
    %41 = vector.shape_cast %38 : vector<8x1xf32> to vector<1x8x1xf32>
    tpu.vector_store %arg11[%c0_21, %c0_22, %c0_23], %41 {strides = array<i32>} : memref<4x8x1xf32, #tpu.memory_space<vmem>>, vector<1x8x1xf32>,
    %c0_24 = arith.constant 0 : index
    %c0_25 = arith.constant 0 : index
    %c0_26 = arith.constant 0 : index
    %42 = vector.load %arg12[%c0_24, %c0_25, %c0_26] : memref<4x8x32xf32, #tpu.memory_space<vmem>>, vector<1x8x32xf32>
    %43 = vector.shape_cast %42 : vector<1x8x32xf32> to vector<8x32xf32>
    %44 = vector.broadcast %29 : vector<8x1xf32> to vector<8x32xf32>
    %45 = arith.mulf %44, %43 : vector<8x32xf32>
    %46 = arith.truncf %32 : vector<8x8xf32> to vector<8x8xbf16>
    %cst_27 = arith.constant dense<0.000000e+00> : vector<8x32xf32>
    %47 = tpu.matmul %46, %17, %cst_27 {dimension_numbers = #tpu.dot_dimension_numbers<[1], [0], [0], [1], [0, 0, 1, 1], [], []>} : vector<8x8xbf16>, vector<8x32xbf16>, vector<8x32xf32> -> vector<8x32xf32>
    %48 = arith.addf %45, %47 : vector<8x32xf32>
    %c0_28 = arith.constant 0 : index
    %c0_29 = arith.constant 0 : index
    %c0_30 = arith.constant 0 : index
    %49 = vector.load %arg12[%c0_28, %c0_29, %c0_30] : memref<4x8x32xf32, #tpu.memory_space<vmem>>, vector<1x8x32xf32>
    %50 = vector.shape_cast %49 : vector<1x8x32xf32> to vector<8x32xf32>
    %51 = vector.shape_cast %48 : vector<8x32xf32> to vector<1x8x32xf32>
    tpu.vector_store %arg12[%c0_28, %c0_29, %c0_30], %51 {strides = array<i32>} : memref<4x8x32xf32, #tpu.memory_space<vmem>>, vector<1x8x32xf32>,
    %c0_31 = arith.constant 0 : index
    %c0_32 = arith.constant 0 : index
    %c0_33 = arith.constant 0 : index
    %52 = vector.load %arg10[%c0_31, %c0_32, %c0_33] : memref<4x8x1xf32, #tpu.memory_space<vmem>>, vector<1x8x1xf32>
    %53 = vector.shape_cast %52 : vector<1x8x1xf32> to vector<8x1xf32>
    %54 = vector.shape_cast %27 : vector<8x1xf32> to vector<1x8x1xf32>
    tpu.vector_store %arg10[%c0_31, %c0_32, %c0_33], %54 {strides = array<i32>} : memref<4x8x1xf32, #tpu.memory_space<vmem>>, vector<1x8x1xf32>,
    %55 = vector.extract_strided_slice %4 {offsets = [0, 32], sizes = [8, 32], strides = [1, 1]} : vector<8x128xbf16> to vector<8x32xbf16>
    %56 = vector.extract_strided_slice %6 {offsets = [0, 32], sizes = [8, 32], strides = [1, 1]} : vector<8x256xbf16> to vector<8x32xbf16>
    %57 = vector.extract_strided_slice %6 {offsets = [0, 160], sizes = [8, 32], strides = [1, 1]} : vector<8x256xbf16> to vector<8x32xbf16>
    %cst_34 = arith.constant dense<0.000000e+00> : vector<8x8xf32>
    %58 = tpu.matmul %55, %56, %cst_34 {dimension_numbers = #tpu.dot_dimension_numbers<[1], [1], [0], [0], [0, 0, 1, 0], [], []>} : vector<8x32xbf16>, vector<8x32xbf16>, vector<8x8xf32> -> vector<8x8xf32>
    %cst_35 = arith.constant 0.176776692 : f32
    %59 = vector.broadcast %cst_35 : f32 to vector<8x8xf32>
    %60 = arith.mulf %58, %59 : vector<8x8xf32>
    %61 = vector.broadcast %14 : vector<1x8xf32> to vector<8x8xf32>
    %62 = arith.addf %60, %61 : vector<8x8xf32>
    %c1 = arith.constant 1 : index
    %c0_36 = arith.constant 0 : index
    %c0_37 = arith.constant 0 : index
    %63 = vector.load %arg10[%c1, %c0_36, %c0_37] : memref<4x8x1xf32, #tpu.memory_space<vmem>>, vector<1x8x1xf32>
    %64 = vector.shape_cast %63 : vector<1x8x1xf32> to vector<8x1xf32>
    %cst_38 = arith.constant dense<0xFF800000> : vector<8xf32>
    %65 = vector.multi_reduction <maximumf>, %62, %cst_38 [1] : vector<8x8xf32> to vector<8xf32>
    %66 = vector.shape_cast %65 : vector<8xf32> to vector<8x1xf32>
    %67 = arith.maximumf %64, %66 : vector<8x1xf32>
    %68 = arith.subf %64, %67 : vector<8x1xf32>
    %69 = math.exp %68 : vector<8x1xf32>
    %70 = vector.broadcast %67 : vector<8x1xf32> to vector<8x8xf32>
    %71 = arith.subf %62, %70 : vector<8x8xf32>
    %72 = math.exp %71 : vector<8x8xf32>
    %c1_39 = arith.constant 1 : index
    %c0_40 = arith.constant 0 : index
    %c0_41 = arith.constant 0 : index
    %73 = vector.load %arg11[%c1_39, %c0_40, %c0_41] : memref<4x8x1xf32, #tpu.memory_space<vmem>>, vector<1x8x1xf32>
    %74 = vector.shape_cast %73 : vector<1x8x1xf32> to vector<8x1xf32>
    %75 = arith.mulf %69, %74 : vector<8x1xf32>
    %cst_42 = arith.constant dense<0.000000e+00> : vector<8xf32>
    %76 = vector.multi_reduction <add>, %72, %cst_42 [1] : vector<8x8xf32> to vector<8xf32>
    %77 = vector.shape_cast %76 : vector<8xf32> to vector<8x1xf32>
    %78 = arith.addf %75, %77 : vector<8x1xf32>
    %c1_43 = arith.constant 1 : index
    %c0_44 = arith.constant 0 : index
    %c0_45 = arith.constant 0 : index
    %79 = vector.load %arg11[%c1_43, %c0_44, %c0_45] : memref<4x8x1xf32, #tpu.memory_space<vmem>>, vector<1x8x1xf32>
    %80 = vector.shape_cast %79 : vector<1x8x1xf32> to vector<8x1xf32>
    %81 = vector.shape_cast %78 : vector<8x1xf32> to vector<1x8x1xf32>
    tpu.vector_store %arg11[%c1_43, %c0_44, %c0_45], %81 {strides = array<i32>} : memref<4x8x1xf32, #tpu.memory_space<vmem>>, vector<1x8x1xf32>,
    %c1_46 = arith.constant 1 : index
    %c0_47 = arith.constant 0 : index
    %c0_48 = arith.constant 0 : index
    %82 = vector.load %arg12[%c1_46, %c0_47, %c0_48] : memref<4x8x32xf32, #tpu.memory_space<vmem>>, vector<1x8x32xf32>
    %83 = vector.shape_cast %82 : vector<1x8x32xf32> to vector<8x32xf32>
    %84 = vector.broadcast %69 : vector<8x1xf32> to vector<8x32xf32>
    %85 = arith.mulf %84, %83 : vector<8x32xf32>
    %86 = arith.truncf %72 : vector<8x8xf32> to vector<8x8xbf16>
    %cst_49 = arith.constant dense<0.000000e+00> : vector<8x32xf32>
    %87 = tpu.matmul %86, %57, %cst_49 {dimension_numbers = #tpu.dot_dimension_numbers<[1], [0], [0], [1], [0, 0, 1, 1], [], []>} : vector<8x8xbf16>, vector<8x32xbf16>, vector<8x32xf32> -> vector<8x32xf32>
    %88 = arith.addf %85, %87 : vector<8x32xf32>
    %c1_50 = arith.constant 1 : index
    %c0_51 = arith.constant 0 : index
    %c0_52 = arith.constant 0 : index
    %89 = vector.load %arg12[%c1_50, %c0_51, %c0_52] : memref<4x8x32xf32, #tpu.memory_space<vmem>>, vector<1x8x32xf32>
    %90 = vector.shape_cast %89 : vector<1x8x32xf32> to vector<8x32xf32>
    %91 = vector.shape_cast %88 : vector<8x32xf32> to vector<1x8x32xf32>
    tpu.vector_store %arg12[%c1_50, %c0_51, %c0_52], %91 {strides = array<i32>} : memref<4x8x32xf32, #tpu.memory_space<vmem>>, vector<1x8x32xf32>,
    %c1_53 = arith.constant 1 : index
    %c0_54 = arith.constant 0 : index
    %c0_55 = arith.constant 0 : index
    %92 = vector.load %arg10[%c1_53, %c0_54, %c0_55] : memref<4x8x1xf32, #tpu.memory_space<vmem>>, vector<1x8x1xf32>
    %93 = vector.shape_cast %92 : vector<1x8x1xf32> to vector<8x1xf32>
    %94 = vector.shape_cast %67 : vector<8x1xf32> to vector<1x8x1xf32>
    tpu.vector_store %arg10[%c1_53, %c0_54, %c0_55], %94 {strides = array<i32>} : memref<4x8x1xf32, #tpu.memory_space<vmem>>, vector<1x8x1xf32>,
    %95 = vector.extract_strided_slice %4 {offsets = [0, 64], sizes = [8, 32], strides = [1, 1]} : vector<8x128xbf16> to vector<8x32xbf16>
    %96 = vector.extract_strided_slice %6 {offsets = [0, 64], sizes = [8, 32], strides = [1, 1]} : vector<8x256xbf16> to vector<8x32xbf16>
    %97 = vector.extract_strided_slice %6 {offsets = [0, 192], sizes = [8, 32], strides = [1, 1]} : vector<8x256xbf16> to vector<8x32xbf16>
    %cst_56 = arith.constant dense<0.000000e+00> : vector<8x8xf32>
    %98 = tpu.matmul %95, %96, %cst_56 {dimension_numbers = #tpu.dot_dimension_numbers<[1], [1], [0], [0], [0, 0, 1, 0], [], []>} : vector<8x32xbf16>, vector<8x32xbf16>, vector<8x8xf32> -> vector<8x8xf32>
    %cst_57 = arith.constant 0.176776692 : f32
    %99 = vector.broadcast %cst_57 : f32 to vector<8x8xf32>
    %100 = arith.mulf %98, %99 : vector<8x8xf32>
    %101 = vector.broadcast %14 : vector<1x8xf32> to vector<8x8xf32>
    %102 = arith.addf %100, %101 : vector<8x8xf32>
    %c2 = arith.constant 2 : index
    %c0_58 = arith.constant 0 : index
    %c0_59 = arith.constant 0 : index
    %103 = vector.load %arg10[%c2, %c0_58, %c0_59] : memref<4x8x1xf32, #tpu.memory_space<vmem>>, vector<1x8x1xf32>
    %104 = vector.shape_cast %103 : vector<1x8x1xf32> to vector<8x1xf32>
    %cst_60 = arith.constant dense<0xFF800000> : vector<8xf32>
    %105 = vector.multi_reduction <maximumf>, %102, %cst_60 [1] : vector<8x8xf32> to vector<8xf32>
    %106 = vector.shape_cast %105 : vector<8xf32> to vector<8x1xf32>
    %107 = arith.maximumf %104, %106 : vector<8x1xf32>
    %108 = arith.subf %104, %107 : vector<8x1xf32>
    %109 = math.exp %108 : vector<8x1xf32>
    %110 = vector.broadcast %107 : vector<8x1xf32> to vector<8x8xf32>
    %111 = arith.subf %102, %110 : vector<8x8xf32>
    %112 = math.exp %111 : vector<8x8xf32>
    %c2_61 = arith.constant 2 : index
    %c0_62 = arith.constant 0 : index
    %c0_63 = arith.constant 0 : index
    %113 = vector.load %arg11[%c2_61, %c0_62, %c0_63] : memref<4x8x1xf32, #tpu.memory_space<vmem>>, vector<1x8x1xf32>
    %114 = vector.shape_cast %113 : vector<1x8x1xf32> to vector<8x1xf32>
    %115 = arith.mulf %109, %114 : vector<8x1xf32>
    %cst_64 = arith.constant dense<0.000000e+00> : vector<8xf32>
    %116 = vector.multi_reduction <add>, %112, %cst_64 [1] : vector<8x8xf32> to vector<8xf32>
    %117 = vector.shape_cast %116 : vector<8xf32> to vector<8x1xf32>
    %118 = arith.addf %115, %117 : vector<8x1xf32>
    %c2_65 = arith.constant 2 : index
    %c0_66 = arith.constant 0 : index
    %c0_67 = arith.constant 0 : index
    %119 = vector.load %arg11[%c2_65, %c0_66, %c0_67] : memref<4x8x1xf32, #tpu.memory_space<vmem>>, vector<1x8x1xf32>
    %120 = vector.shape_cast %119 : vector<1x8x1xf32> to vector<8x1xf32>
    %121 = vector.shape_cast %118 : vector<8x1xf32> to vector<1x8x1xf32>
    tpu.vector_store %arg11[%c2_65, %c0_66, %c0_67], %121 {strides = array<i32>} : memref<4x8x1xf32, #tpu.memory_space<vmem>>, vector<1x8x1xf32>,
    %c2_68 = arith.constant 2 : index
    %c0_69 = arith.constant 0 : index
    %c0_70 = arith.constant 0 : index
    %122 = vector.load %arg12[%c2_68, %c0_69, %c0_70] : memref<4x8x32xf32, #tpu.memory_space<vmem>>, vector<1x8x32xf32>
    %123 = vector.shape_cast %122 : vector<1x8x32xf32> to vector<8x32xf32>
    %124 = vector.broadcast %109 : vector<8x1xf32> to vector<8x32xf32>
    %125 = arith.mulf %124, %123 : vector<8x32xf32>
    %126 = arith.truncf %112 : vector<8x8xf32> to vector<8x8xbf16>
    %cst_71 = arith.constant dense<0.000000e+00> : vector<8x32xf32>
    %127 = tpu.matmul %126, %97, %cst_71 {dimension_numbers = #tpu.dot_dimension_numbers<[1], [0], [0], [1], [0, 0, 1, 1], [], []>} : vector<8x8xbf16>, vector<8x32xbf16>, vector<8x32xf32> -> vector<8x32xf32>
    %128 = arith.addf %125, %127 : vector<8x32xf32>
    %c2_72 = arith.constant 2 : index
    %c0_73 = arith.constant 0 : index
    %c0_74 = arith.constant 0 : index
    %129 = vector.load %arg12[%c2_72, %c0_73, %c0_74] : memref<4x8x32xf32, #tpu.memory_space<vmem>>, vector<1x8x32xf32>
    %130 = vector.shape_cast %129 : vector<1x8x32xf32> to vector<8x32xf32>
    %131 = vector.shape_cast %128 : vector<8x32xf32> to vector<1x8x32xf32>
    tpu.vector_store %arg12[%c2_72, %c0_73, %c0_74], %131 {strides = array<i32>} : memref<4x8x32xf32, #tpu.memory_space<vmem>>, vector<1x8x32xf32>,
    %c2_75 = arith.constant 2 : index
    %c0_76 = arith.constant 0 : index
    %c0_77 = arith.constant 0 : index
    %132 = vector.load %arg10[%c2_75, %c0_76, %c0_77] : memref<4x8x1xf32, #tpu.memory_space<vmem>>, vector<1x8x1xf32>
    %133 = vector.shape_cast %132 : vector<1x8x1xf32> to vector<8x1xf32>
    %134 = vector.shape_cast %107 : vector<8x1xf32> to vector<1x8x1xf32>
    tpu.vector_store %arg10[%c2_75, %c0_76, %c0_77], %134 {strides = array<i32>} : memref<4x8x1xf32, #tpu.memory_space<vmem>>, vector<1x8x1xf32>,
    %135 = vector.extract_strided_slice %4 {offsets = [0, 96], sizes = [8, 32], strides = [1, 1]} : vector<8x128xbf16> to vector<8x32xbf16>
    %136 = vector.extract_strided_slice %6 {offsets = [0, 96], sizes = [8, 32], strides = [1, 1]} : vector<8x256xbf16> to vector<8x32xbf16>
    %137 = vector.extract_strided_slice %6 {offsets = [0, 224], sizes = [8, 32], strides = [1, 1]} : vector<8x256xbf16> to vector<8x32xbf16>
    %cst_78 = arith.constant dense<0.000000e+00> : vector<8x8xf32>
    %138 = tpu.matmul %135, %136, %cst_78 {dimension_numbers = #tpu.dot_dimension_numbers<[1], [1], [0], [0], [0, 0, 1, 0], [], []>} : vector<8x32xbf16>, vector<8x32xbf16>, vector<8x8xf32> -> vector<8x8xf32>
    %cst_79 = arith.constant 0.176776692 : f32
    %139 = vector.broadcast %cst_79 : f32 to vector<8x8xf32>
    %140 = arith.mulf %138, %139 : vector<8x8xf32>
    %141 = vector.broadcast %14 : vector<1x8xf32> to vector<8x8xf32>
    %142 = arith.addf %140, %141 : vector<8x8xf32>
    %c3 = arith.constant 3 : index
    %c0_80 = arith.constant 0 : index
    %c0_81 = arith.constant 0 : index
    %143 = vector.load %arg10[%c3, %c0_80, %c0_81] : memref<4x8x1xf32, #tpu.memory_space<vmem>>, vector<1x8x1xf32>
    %144 = vector.shape_cast %143 : vector<1x8x1xf32> to vector<8x1xf32>
    %cst_82 = arith.constant dense<0xFF800000> : vector<8xf32>
    %145 = vector.multi_reduction <maximumf>, %142, %cst_82 [1] : vector<8x8xf32> to vector<8xf32>
    %146 = vector.shape_cast %145 : vector<8xf32> to vector<8x1xf32>
    %147 = arith.maximumf %144, %146 : vector<8x1xf32>
    %148 = arith.subf %144, %147 : vector<8x1xf32>
    %149 = math.exp %148 : vector<8x1xf32>
    %150 = vector.broadcast %147 : vector<8x1xf32> to vector<8x8xf32>
    %151 = arith.subf %142, %150 : vector<8x8xf32>
    %152 = math.exp %151 : vector<8x8xf32>
    %c3_83 = arith.constant 3 : index
    %c0_84 = arith.constant 0 : index
    %c0_85 = arith.constant 0 : index
    %153 = vector.load %arg11[%c3_83, %c0_84, %c0_85] : memref<4x8x1xf32, #tpu.memory_space<vmem>>, vector<1x8x1xf32>
    %154 = vector.shape_cast %153 : vector<1x8x1xf32> to vector<8x1xf32>
    %155 = arith.mulf %149, %154 : vector<8x1xf32>
    %cst_86 = arith.constant dense<0.000000e+00> : vector<8xf32>
    %156 = vector.multi_reduction <add>, %152, %cst_86 [1] : vector<8x8xf32> to vector<8xf32>
    %157 = vector.shape_cast %156 : vector<8xf32> to vector<8x1xf32>
    %158 = arith.addf %155, %157 : vector<8x1xf32>
    %c3_87 = arith.constant 3 : index
    %c0_88 = arith.constant 0 : index
    %c0_89 = arith.constant 0 : index
    %159 = vector.load %arg11[%c3_87, %c0_88, %c0_89] : memref<4x8x1xf32, #tpu.memory_space<vmem>>, vector<1x8x1xf32>
    %160 = vector.shape_cast %159 : vector<1x8x1xf32> to vector<8x1xf32>
    %161 = vector.shape_cast %158 : vector<8x1xf32> to vector<1x8x1xf32>
    tpu.vector_store %arg11[%c3_87, %c0_88, %c0_89], %161 {strides = array<i32>} : memref<4x8x1xf32, #tpu.memory_space<vmem>>, vector<1x8x1xf32>,
    %c3_90 = arith.constant 3 : index
    %c0_91 = arith.constant 0 : index
    %c0_92 = arith.constant 0 : index
    %162 = vector.load %arg12[%c3_90, %c0_91, %c0_92] : memref<4x8x32xf32, #tpu.memory_space<vmem>>, vector<1x8x32xf32>
    %163 = vector.shape_cast %162 : vector<1x8x32xf32> to vector<8x32xf32>
    %164 = vector.broadcast %149 : vector<8x1xf32> to vector<8x32xf32>
    %165 = arith.mulf %164, %163 : vector<8x32xf32>
    %166 = arith.truncf %152 : vector<8x8xf32> to vector<8x8xbf16>
    %cst_93 = arith.constant dense<0.000000e+00> : vector<8x32xf32>
    %167 = tpu.matmul %166, %137, %cst_93 {dimension_numbers = #tpu.dot_dimension_numbers<[1], [0], [0], [1], [0, 0, 1, 1], [], []>} : vector<8x8xbf16>, vector<8x32xbf16>, vector<8x32xf32> -> vector<8x32xf32>
    %168 = arith.addf %165, %167 : vector<8x32xf32>
    %c3_94 = arith.constant 3 : index
    %c0_95 = arith.constant 0 : index
    %c0_96 = arith.constant 0 : index
    %169 = vector.load %arg12[%c3_94, %c0_95, %c0_96] : memref<4x8x32xf32, #tpu.memory_space<vmem>>, vector<1x8x32xf32>
    %170 = vector.shape_cast %169 : vector<1x8x32xf32> to vector<8x32xf32>
    %171 = vector.shape_cast %168 : vector<8x32xf32> to vector<1x8x32xf32>
    tpu.vector_store %arg12[%c3_94, %c0_95, %c0_96], %171 {strides = array<i32>} : memref<4x8x32xf32, #tpu.memory_space<vmem>>, vector<1x8x32xf32>,
    %c3_97 = arith.constant 3 : index
    %c0_98 = arith.constant 0 : index
    %c0_99 = arith.constant 0 : index
    %172 = vector.load %arg10[%c3_97, %c0_98, %c0_99] : memref<4x8x1xf32, #tpu.memory_space<vmem>>, vector<1x8x1xf32>
    %173 = vector.shape_cast %172 : vector<1x8x1xf32> to vector<8x1xf32>
    %174 = vector.shape_cast %147 : vector<8x1xf32> to vector<1x8x1xf32>
    tpu.vector_store %arg10[%c3_97, %c0_98, %c0_99], %174 {strides = array<i32>} : memref<4x8x1xf32, #tpu.memory_space<vmem>>, vector<1x8x1xf32>,
    %c0_i32_100 = arith.constant 0 : i32
    %175 = arith.cmpi eq, %arg2, %c0_i32_100 : i32
    %176 = arith.extui %175 : i1 to i32
    %c0_i32_101 = arith.constant 0 : i32
    %177 = arith.cmpi ne, %176, %c0_i32_101 : i32
    scf.if %177 {
      %c0_102 = arith.constant 0 : index
      %c0_103 = arith.constant 0 : index
      %c0_104 = arith.constant 0 : index
      %178 = vector.load %arg6[%c0_102, %c0_103, %c0_104] : memref<1x8x128xbf16, #tpu.memory_space<vmem>>, vector<1x8x128xbf16>
      %179 = vector.shape_cast %178 : vector<1x8x128xbf16> to vector<8x128xbf16>
      %180 = arith.extf %179 : vector<8x128xbf16> to vector<8x128xf32>
      %c0_105 = arith.constant 0 : index
      %c0_106 = arith.constant 0 : index
      %181 = vector.load %arg8[%c0_105, %c0_106] : memref<1x128xf32, #tpu.memory_space<vmem>>, vector<1x128xf32>
      %182 = vector.broadcast %181 : vector<1x128xf32> to vector<8x128xf32>
      %183 = arith.addf %180, %182 : vector<8x128xf32>
      %c0_107 = arith.constant 0 : index
      %c0_108 = arith.constant 0 : index
      %c0_109 = arith.constant 0 : index
      %184 = vector.load %arg11[%c0_107, %c0_108, %c0_109] : memref<4x8x1xf32, #tpu.memory_space<vmem>>, vector<1x8x1xf32>
      %185 = vector.shape_cast %184 : vector<1x8x1xf32> to vector<8x1xf32>
      %186 = tpu.reciprocal %185 {approx = true} : vector<8x1xf32> -> vector<8x1xf32>
      %c0_110 = arith.constant 0 : index
      %c0_111 = arith.constant 0 : index
      %c0_112 = arith.constant 0 : index
      %187 = vector.load %arg12[%c0_110, %c0_111, %c0_112] : memref<4x8x32xf32, #tpu.memory_space<vmem>>, vector<1x8x32xf32>
      %188 = vector.shape_cast %187 : vector<1x8x32xf32> to vector<8x32xf32>
      %189 = vector.broadcast %186 : vector<8x1xf32> to vector<8x32xf32>
      %190 = arith.mulf %188, %189 : vector<8x32xf32>
      %191 = arith.truncf %190 : vector<8x32xf32> to vector<8x32xbf16>
      %c0_113 = arith.constant 0 : index
      %c0_114 = arith.constant 0 : index
      %192 = vector.load %arg7[%c0_113, %c0_114] : memref<128x128xbf16, #tpu.memory_space<vmem>>, vector<32x128xbf16>
      %cst_115 = arith.constant dense<0.000000e+00> : vector<8x128xf32>
      %193 = tpu.matmul %191, %192, %cst_115 {dimension_numbers = #tpu.dot_dimension_numbers<[1], [0], [0], [1], [0, 0, 1, 1], [], []>} : vector<8x32xbf16>, vector<32x128xbf16>, vector<8x128xf32> -> vector<8x128xf32>
      %194 = arith.addf %183, %193 : vector<8x128xf32>
      %c1_116 = arith.constant 1 : index
      %c0_117 = arith.constant 0 : index
      %c0_118 = arith.constant 0 : index
      %195 = vector.load %arg11[%c1_116, %c0_117, %c0_118] : memref<4x8x1xf32, #tpu.memory_space<vmem>>, vector<1x8x1xf32>
      %196 = vector.shape_cast %195 : vector<1x8x1xf32> to vector<8x1xf32>
      %197 = tpu.reciprocal %196 {approx = true} : vector<8x1xf32> -> vector<8x1xf32>
      %c1_119 = arith.constant 1 : index
      %c0_120 = arith.constant 0 : index
      %c0_121 = arith.constant 0 : index
      %198 = vector.load %arg12[%c1_119, %c0_120, %c0_121] : memref<4x8x32xf32, #tpu.memory_space<vmem>>, vector<1x8x32xf32>
      %199 = vector.shape_cast %198 : vector<1x8x32xf32> to vector<8x32xf32>
      %200 = vector.broadcast %197 : vector<8x1xf32> to vector<8x32xf32>
      %201 = arith.mulf %199, %200 : vector<8x32xf32>
      %202 = arith.truncf %201 : vector<8x32xf32> to vector<8x32xbf16>
      %c32 = arith.constant 32 : index
      %c0_122 = arith.constant 0 : index
      %203 = vector.load %arg7[%c32, %c0_122] : memref<128x128xbf16, #tpu.memory_space<vmem>>, vector<32x128xbf16>
      %cst_123 = arith.constant dense<0.000000e+00> : vector<8x128xf32>
      %204 = tpu.matmul %202, %203, %cst_123 {dimension_numbers = #tpu.dot_dimension_numbers<[1], [0], [0], [1], [0, 0, 1, 1], [], []>} : vector<8x32xbf16>, vector<32x128xbf16>, vector<8x128xf32> -> vector<8x128xf32>
      %205 = arith.addf %194, %204 : vector<8x128xf32>
      %c2_124 = arith.constant 2 : index
      %c0_125 = arith.constant 0 : index
      %c0_126 = arith.constant 0 : index
      %206 = vector.load %arg11[%c2_124, %c0_125, %c0_126] : memref<4x8x1xf32, #tpu.memory_space<vmem>>, vector<1x8x1xf32>
      %207 = vector.shape_cast %206 : vector<1x8x1xf32> to vector<8x1xf32>
      %208 = tpu.reciprocal %207 {approx = true} : vector<8x1xf32> -> vector<8x1xf32>
      %c2_127 = arith.constant 2 : index
      %c0_128 = arith.constant 0 : index
      %c0_129 = arith.constant 0 : index
      %209 = vector.load %arg12[%c2_127, %c0_128, %c0_129] : memref<4x8x32xf32, #tpu.memory_space<vmem>>, vector<1x8x32xf32>
      %210 = vector.shape_cast %209 : vector<1x8x32xf32> to vector<8x32xf32>
      %211 = vector.broadcast %208 : vector<8x1xf32> to vector<8x32xf32>
      %212 = arith.mulf %210, %211 : vector<8x32xf32>
      %213 = arith.truncf %212 : vector<8x32xf32> to vector<8x32xbf16>
      %c64 = arith.constant 64 : index
      %c0_130 = arith.constant 0 : index
      %214 = vector.load %arg7[%c64, %c0_130] : memref<128x128xbf16, #tpu.memory_space<vmem>>, vector<32x128xbf16>
      %cst_131 = arith.constant dense<0.000000e+00> : vector<8x128xf32>
      %215 = tpu.matmul %213, %214, %cst_131 {dimension_numbers = #tpu.dot_dimension_numbers<[1], [0], [0], [1], [0, 0, 1, 1], [], []>} : vector<8x32xbf16>, vector<32x128xbf16>, vector<8x128xf32> -> vector<8x128xf32>
      %216 = arith.addf %205, %215 : vector<8x128xf32>
      %c3_132 = arith.constant 3 : index
      %c0_133 = arith.constant 0 : index
      %c0_134 = arith.constant 0 : index
      %217 = vector.load %arg11[%c3_132, %c0_133, %c0_134] : memref<4x8x1xf32, #tpu.memory_space<vmem>>, vector<1x8x1xf32>
      %218 = vector.shape_cast %217 : vector<1x8x1xf32> to vector<8x1xf32>
      %219 = tpu.reciprocal %218 {approx = true} : vector<8x1xf32> -> vector<8x1xf32>
      %c3_135 = arith.constant 3 : index
      %c0_136 = arith.constant 0 : index
      %c0_137 = arith.constant 0 : index
      %220 = vector.load %arg12[%c3_135, %c0_136, %c0_137] : memref<4x8x32xf32, #tpu.memory_space<vmem>>, vector<1x8x32xf32>
      %221 = vector.shape_cast %220 : vector<1x8x32xf32> to vector<8x32xf32>
      %222 = vector.broadcast %219 : vector<8x1xf32> to vector<8x32xf32>
      %223 = arith.mulf %221, %222 : vector<8x32xf32>
      %224 = arith.truncf %223 : vector<8x32xf32> to vector<8x32xbf16>
      %c96 = arith.constant 96 : index
      %c0_138 = arith.constant 0 : index
      %225 = vector.load %arg7[%c96, %c0_138] : memref<128x128xbf16, #tpu.memory_space<vmem>>, vector<32x128xbf16>
      %cst_139 = arith.constant dense<0.000000e+00> : vector<8x128xf32>
      %226 = tpu.matmul %224, %225, %cst_139 {dimension_numbers = #tpu.dot_dimension_numbers<[1], [0], [0], [1], [0, 0, 1, 1], [], []>} : vector<8x32xbf16>, vector<32x128xbf16>, vector<8x128xf32> -> vector<8x128xf32>
      %227 = arith.addf %216, %226 : vector<8x128xf32>
      %228 = arith.truncf %227 : vector<8x128xf32> to vector<8x128xbf16>
      %c0_140 = arith.constant 0 : index
      %c0_141 = arith.constant 0 : index
      %c0_142 = arith.constant 0 : index
      %229 = vector.load %arg9[%c0_140, %c0_141, %c0_142] : memref<1x8x128xbf16, #tpu.memory_space<vmem>>, vector<1x8x128xbf16>
      %230 = vector.shape_cast %229 : vector<1x8x128xbf16> to vector<8x128xbf16>
      %231 = vector.shape_cast %228 : vector<8x128xbf16> to vector<1x8x128xbf16>
      tpu.vector_store %arg9[%c0_140, %c0_141, %c0_142], %231 {strides = array<i32>} : memref<1x8x128xbf16, #tpu.memory_space<vmem>>, vector<1x8x128xbf16>,
    } else {
    }
    return
  }
  func.func @transform_0(%arg0: i32, %arg1: i32, %arg2: i32) -> (i32, i32, i32) {
    %c0_i32 = arith.constant 0 : i32
    %c0_i32_0 = arith.constant 0 : i32
    return %arg0, %arg1, %c0_i32 : i32, i32, i32
  }
  func.func @transform_1(%arg0: i32, %arg1: i32, %arg2: i32) -> (i32, i32, i32) {
    %c0_i32 = arith.constant 0 : i32
    %c0_i32_0 = arith.constant 0 : i32
    return %arg0, %arg2, %c0_i32 : i32, i32, i32
  }
  func.func @transform_2(%arg0: i32, %arg1: i32, %arg2: i32) -> (i32, i32, i32) {
    %c0_i32 = arith.constant 0 : i32
    %c0_i32_0 = arith.constant 0 : i32
    return %arg0, %c0_i32, %arg2 : i32, i32, i32
  }
  func.func @transform_3(%arg0: i32, %arg1: i32, %arg2: i32) -> (i32, i32, i32) {
    %c0_i32 = arith.constant 0 : i32
    %c0_i32_0 = arith.constant 0 : i32
    return %arg0, %arg1, %c0_i32 : i32, i32, i32
  }
  func.func @transform_4(%arg0: i32, %arg1: i32, %arg2: i32) -> (i32, i32) {
    %c0_i32 = arith.constant 0 : i32
    %c0_i32_0 = arith.constant 0 : i32
    %c0_i32_1 = arith.constant 0 : i32
    return %c0_i32, %c0_i32_0 : i32, i32
  }
  func.func @transform_5(%arg0: i32, %arg1: i32, %arg2: i32) -> (i32, i32) {
    %c0_i32 = arith.constant 0 : i32
    %c0_i32_0 = arith.constant 0 : i32
    %c0_i32_1 = arith.constant 0 : i32
    return %c0_i32, %c0_i32_0 : i32, i32
  }
  func.func @transform_6(%arg0: i32, %arg1: i32, %arg2: i32) -> (i32, i32, i32) {
    %c0_i32 = arith.constant 0 : i32
    %c0_i32_0 = arith.constant 0 : i32
    return %arg0, %arg1, %c0_i32 : i32, i32, i32
  }
}

</mosaic_0001>

<bundles_post_ra>
// kernel: decoder_forward.16
= control target key start
LH: loop header
LB: loop body
LE: loop exit
PB: predicated region body
PF: predicated region fallthrough
CT: control target
= control target key end

     0   :  { %8 = vsyncpa [#allocation3], 0  ;;  %s291_s15 = smov [#allocation2]   ;;  %s292_s17 = smov 128   ;;  %s329_s0 = inlined_call_operand.vmem [shape: bf16[16,128], index: 0, kind: input, shape index: {}]   ;;  %s330_s1 = inlined_call_operand.hbm [shape: bf16[128,256], index: 1, kind: input, shape index: {}]   ;;  %s331_s2 = inlined_call_operand.vmem [shape: f32[1,256], index: 2, kind: input, shape index: {}]   ;;  %s332_s3 = inlined_call_operand.vmem [shape: bf16[16,256], index: 3, kind: output, shape index: {}]  }
   0x1   :  { %s15_s14 = sshll.u32 %s330_s1, 4  ;;  %s17_s16 = sshll.u32 %s291_s15, 4  ;;  %s16_s14 = int_to_ptr.hbm [resolvable:$true] %s15_s14  ;;  %s18_s16 = int_to_ptr.vmem [resolvable:$true] %s17_s16 }
   0x2   :  { %s293_s18 = smov 8  }
   0x3   :  { %23 = dma.hbm_to_vmem [thread:$0]  %s16_s14, 2048, %s18_s16, [#allocation3], %s292_s17, %s292_s17, %s293_s18  }
   0x4   :  { %289 = dma.done.wait [#allocation3], 2048  }
   0x5   :  { %290 = vsyncadd [#allocation3], 4294965248  ;;  %v239_v0 = vld [vmem:[#allocation2 + $0x70] sm:$0xf]  ;;  %v261_v1 = vld [vmem:[#allocation2 + $0x74] sm:$0xf0] }
   0x6   :  { %v260_v2 = vld [vmem:[#allocation2 + $0x74] sm:$0xf]  ;;  %v240_v3 = vor.u32 %v261_v1, %v239_v0  ;;  %v241_v4 = vld [vmem:[#allocation2 + $0x78] sm:$0xf0]  ;;  %v231_v5 = vld [vmem:[#allocation2 + $0x60] sm:$0xf] }
   0x7   :  { %v259_v6 = vld [vmem:[#allocation2 + $0x64] sm:$0xf0]  ;;  %v244_v7 = vor.u32 %v260_v2, %v241_v4  ;;  %v258_v8 = vld [vmem:[#allocation2 + $0x64] sm:$0xf]  ;;  %v233_v9 = vld [vmem:[#allocation2 + $0x68] sm:$0xf0] }
   0x8   :  { %140 = vmatpush.bf16.msra.mxu0 %v240_v3  ;;  %v232_v10 = vor.u32 %v259_v6, %v231_v5  ;;  %v236_v11 = vor.u32 %v258_v8, %v233_v9  ;;  %v223_v12 = vld [vmem:[#allocation2 + $0x50] sm:$0xf]  ;;  %v257_v13 = vld [vmem:[#allocation2 + $0x54] sm:$0xf0]  ;;  %v256_v14 = vld [vmem:[#allocation2 + $0x54] sm:$0xf] }
   0x9   :  { %154 = vmatpush.bf16.msra.mxu1 %v244_v7  ;;  %v225_v15 = vld [vmem:[#allocation2 + $0x58] sm:$0xf0]  ;;  %v224_v16 = vor.u32 %v257_v13, %v223_v12  ;;  %v215_v18 = vld [vmem:[#allocation2 + $0x40] sm:$0xf]  ;;  %v255_v19 = vld [vmem:[#allocation2 + $0x44] sm:$0xf0] }
   0xa   :  { %v228_v17 = vor.u32 %v256_v14, %v225_v15  ;;  %v254_v20 = vld [vmem:[#allocation2 + $0x44] sm:$0xf]  ;;  %v217_v21 = vld [vmem:[#allocation2 + $0x48] sm:$0xf0]  ;;  %v216_v22 = vor.u32 %v255_v19, %v215_v18  ;;  %v207_v24 = vld [vmem:[#allocation2 + $0x30] sm:$0xf] }
   0xb   :  { %v220_v23 = vor.u32 %v254_v20, %v217_v21  ;;  %v253_v25 = vld [vmem:[#allocation2 + $0x34] sm:$0xf0]  ;;  %v252_v26 = vld [vmem:[#allocation2 + $0x34] sm:$0xf]  ;;  %v209_v27 = vld [vmem:[#allocation2 + $0x38] sm:$0xf0] }
   0xc   :  { %141 = vmatpush.bf16.msra.mxu0 %v232_v10  ;;  %v208_v28 = vor.u32 %v253_v25, %v207_v24  ;;  %v212_v29 = vor.u32 %v252_v26, %v209_v27  ;;  %v199_v30 = vld [vmem:[#allocation2 + $0x20] sm:$0xf]  ;;  %v251_v31 = vld [vmem:[#allocation2 + $0x24] sm:$0xf0]  ;;  %v250_v32 = vld [vmem:[#allocation2 + $0x24] sm:$0xf] }
   0xd   :  { %155 = vmatpush.bf16.msra.mxu1 %v236_v11  ;;  %v201_v33 = vld [vmem:[#allocation2 + $0x28] sm:$0xf0]  ;;  %v200_v34 = vor.u32 %v251_v31, %v199_v30  ;;  %v191_v36 = vld [vmem:[#allocation2 + $0x10] sm:$0xf]  ;;  %v249_v37 = vld [vmem:[#allocation2 + $0x14] sm:$0xf0] }
   0xe   :  { %v204_v35 = vor.u32 %v250_v32, %v201_v33  ;;  %v248_v38 = vld [vmem:[#allocation2 + $0x14] sm:$0xf]  ;;  %v193_v39 = vld [vmem:[#allocation2 + $0x18] sm:$0xf0]  ;;  %v192_v40 = vor.u32 %v249_v37, %v191_v36  ;;  %v183_v42 = vld [vmem:[#allocation2] sm:$0xf] }
   0xf   :  { %v196_v41 = vor.u32 %v248_v38, %v193_v39  ;;  %v247_v43 = vld [vmem:[#allocation2 + $0x4] sm:$0xf0]  ;;  %v246_v44 = vld [vmem:[#allocation2 + $0x4] sm:$0xf]  ;;  %v185_v45 = vld [vmem:[#allocation2 + $0x8] sm:$0xf0] }
  0x10   :  { %142 = vmatpush.bf16.msra.mxu0 %v224_v16  ;;  %v184_v46 = vor.u32 %v247_v43, %v183_v42  ;;  %v188_v47 = vor.u32 %v246_v44, %v185_v45  ;;  %v245_v48 = vld [vmem:[%s329_s0] sm:$0xff] }
  0x11   :  { %156 = vmatpush.bf16.msra.mxu1 %v228_v17  ;;  %v48_v49 = vld [vmem:[%s331_s2] sm:$0x3] }
  0x12   :  { %v50_v50 = vperm.slane %v48_v49, 0  ;;  %v51_v51 = vperm.slane %v48_v49, 1 }
  0x14   :  { %143 = vmatpush.bf16.msra.mxu0 %v216_v22 }
  0x15   :  { %157 = vmatpush.bf16.msra.mxu1 %v220_v23 }
  0x18   :  { %144 = vmatpush.bf16.msra.mxu0 %v208_v28 }
  0x19   :  { %158 = vmatpush.bf16.msra.mxu1 %v212_v29 }
  0x1c   :  { %145 = vmatpush.bf16.msra.mxu0 %v200_v34 }
  0x1d   :  { %159 = vmatpush.bf16.msra.mxu1 %v204_v35 }
  0x20   :  { %146 = vmatpush.bf16.msra.mxu0 %v192_v40 }
  0x21   :  { %160 = vmatpush.bf16.msra.mxu1 %v196_v41 }
  0x24   :  { %147 = vmatpush.bf16.msra.mxu0 %v184_v46 }
  0x25   :  { %161 = vmatpush.bf16.msra.mxu1 %v188_v47 }
  0x27   :  { %148 = vmatmul.bf16.vlgmr.msra.gmra.mxu0 %v245_v48 }
  0x28   :  { %162 = vmatmul.bf16.vlgmr.msra.gmra.mxu1 %v245_v48 }
  0xa4   :  { %v149_v52 = vpop.f32.mrf.mxu0 }
  0xa5   :  { %v150_v53 = vadd.f32 %v149_v52, %v50_v50  ;;  %v163_v54 = vpop.f32.mrf.mxu1 }
  0xa6   :  { %v164_v55 = vadd.f32 %v163_v54, %v51_v51 }
  0xa8   :  { %v168_v56 = vpack.c.bf16 %v164_v55, %v150_v53 }
  0xaa   :  { %170 = vst [vmem:[%s332_s3] sm:$0xff] %v168_v56 }
  0xac   :  { %v151_v57 = vpop.f32.mrf.mxu0 }
  0xad   :  { %v152_v58 = vadd.f32 %v151_v57, %v50_v50  ;;  %v165_v59 = vpop.f32.mrf.mxu1 }
  0xae   :  { %v166_v60 = vadd.f32 %v165_v59, %v51_v51 }
  0xb0   :  { %v169_v61 = vpack.c.bf16 %v166_v60, %v152_v58 }
  0xb2   :  { %171 = vst [vmem:[%s332_s3 + $0x8] sm:$0xff] %v169_v61 }
  0xb3   :  { %176 = vsyncpa [#allocation3], 1 }

// kernel: decoder_forward.13
= control target key start
LH: loop header
LB: loop body
LE: loop exit
PB: predicated region body
PF: predicated region fallthrough
CT: control target
= control target key end

     0   :  { %12 = vsyncpa [#allocation3], 0  ;;  %s506_s24 = smov [#allocation2]   ;;  %s507_s26 = smov 192   ;;  %s587_s0 = inlined_call_operand.vmem [shape: bf16[16,128], index: 0, kind: input, shape index: {}]   ;;  %s588_s1 = inlined_call_operand.vmem [shape: f32[1,128], index: 1, kind: input, shape index: {}]   ;;  %s589_s2 = inlined_call_operand.vmem [shape: f32[1,128], index: 2, kind: input, shape index: {}]   ;;  %s590_s3 = inlined_call_operand.hbm [shape: bf16[128,384], index: 3, kind: input, shape index: {}]   ;;  %s591_s4 = inlined_call_operand.vmem [shape: f32[1,384], index: 4, kind: input, shape index: {}]   ;;  %s592_s5 = inlined_call_operand.vmem [shape: bf16[16,128], index: 5, kind: output, shape index: {0}]   ;;  %s593_s6 = inlined_call_operand.vmem [shape: bf16[16,256], index: 6, kind: output, shape index: {1}]  }
   0x1   :  { %s23_s23 = sshll.u32 %s590_s3, 4  ;;  %s25_s25 = sshll.u32 %s506_s24, 4  ;;  %s24_s23 = int_to_ptr.hbm [resolvable:$true] %s23_s23  ;;  %s26_s25 = int_to_ptr.vmem [resolvable:$true] %s25_s25 }
   0x2   :  { %s508_s27 = smov 12  }
   0x3   :  { %31 = dma.hbm_to_vmem [thread:$0]  %s24_s23, 3072, %s26_s25, [#allocation3], %s507_s26, %s507_s26, %s508_s27  }
   0x4   :  { %504 = dma.done.wait [#allocation3], 3072  }
   0x5   :  { %505 = vsyncadd [#allocation3], 4294964224  ;;  %v457_v0 = vld [vmem:[%s587_s0] sm:$0xff]   ;;  %v509_v3 = vmov 128.0   ;;  %v422_v18 = vld [vmem:[#allocation2 + $0xa8] sm:$0xf] }
   0x6   :  { %v458_v1 = vunpack.c.l.bf16 %v457_v0  ;;  %v459_v2 = vunpack.c.h.bf16 %v457_v0  ;;  %472 = vrcp.f32 %v509_v3  ;;  %v454_v19 = vld [vmem:[#allocation2 + $0xb0] sm:$0xf0]  ;;  %v453_v20 = vld [vmem:[#allocation2 + $0xac] sm:$0xf]  ;;  %v424_v22 = vld [vmem:[#allocation2 + $0xb4] sm:$0xf0] }
   0x7   :  { %v423_v21 = vor.u32 %v454_v19, %v422_v18  ;;  %v430_v23 = vld [vmem:[#allocation2 + $0xb0] sm:$0xf]  ;;  %v455_v24 = vld [vmem:[#allocation2 + $0xb8] sm:$0xf0]  ;;  %v510_v25 = vmov 127.0   ;;  %v427_v26 = vor.u32 %v453_v20, %v424_v22 }
   0x8   :  { %44 = vadd.xlane.f32.xlu0 %v458_v1  ;;  %474 = vrcp.f32 %v510_v25  ;;  %v431_v27 = vor.u32 %v455_v24, %v430_v23  ;;  %v410_v28 = vld [vmem:[#allocation2 + $0x90] sm:$0xf]  ;;  %v451_v29 = vld [vmem:[#allocation2 + $0x98] sm:$0xf0]  ;;  %v450_v30 = vld [vmem:[#allocation2 + $0x94] sm:$0xf] }
   0x9   :  { %277 = vmatpush.bf16.msra.mxu0 %v423_v21  ;;  %291 = vmatpush.bf16.msra.mxu1 %v427_v26  ;;  %v411_v31 = vor.u32 %v451_v29, %v410_v28  ;;  %v412_v32 = vld [vmem:[#allocation2 + $0x9c] sm:$0xf0]  ;;  %v418_v33 = vld [vmem:[#allocation2 + $0x98] sm:$0xf]  ;;  %v452_v34 = vld [vmem:[#allocation2 + $0xa0] sm:$0xf0] }
   0xa   :  { %305 = vmatpush.bf16.msra.mxu2 %v431_v27  ;;  %v415_v35 = vor.u32 %v450_v30, %v412_v32  ;;  %v419_v36 = vor.u32 %v452_v34, %v418_v33  ;;  %v398_v38 = vld [vmem:[#allocation2 + $0x78] sm:$0xf]  ;;  %v448_v39 = vld [vmem:[#allocation2 + $0x80] sm:$0xf0]  ;;  %v447_v40 = vld [vmem:[#allocation2 + $0x7c] sm:$0xf] }
   0xb   :  { %v399_v41 = vor.u32 %v448_v39, %v398_v38  ;;  %v400_v42 = vld [vmem:[#allocation2 + $0x84] sm:$0xf0]  ;;  %v406_v43 = vld [vmem:[#allocation2 + $0x80] sm:$0xf]  ;;  %v449_v44 = vld [vmem:[#allocation2 + $0x88] sm:$0xf0] }
   0xc   :  { %v473_v4 = vpop.eup %472  ;;  %v403_v45 = vor.u32 %v447_v40, %v400_v42  ;;  %v407_v46 = vor.u32 %v449_v44, %v406_v43  ;;  %v386_v48 = vld [vmem:[#allocation2 + $0x60] sm:$0xf]  ;;  %v445_v49 = vld [vmem:[#allocation2 + $0x68] sm:$0xf0]  ;;  %v444_v50 = vld [vmem:[#allocation2 + $0x64] sm:$0xf] }
   0xd   :  { %v49_v5 = vmul.f32 128.0, %v473_v4  ;;  %vm53_vm0 = vweird.f32 %v473_v4  ;;  %278 = vmatpush.bf16.msra.mxu0 %v411_v31  ;;  %292 = vmatpush.bf16.msra.mxu1 %v415_v35  ;;  %v387_v51 = vor.u32 %v445_v49, %v386_v48  ;;  %v388_v52 = vld [vmem:[#allocation2 + $0x6c] sm:$0xf0]  ;;  %v394_v53 = vld [vmem:[#allocation2 + $0x68] sm:$0xf] }
   0xe   :  { %v560_v37 = vpop.eup %474  ;;  %306 = vmatpush.bf16.msra.mxu2 %v419_v36  ;;  %v446_v54 = vld [vmem:[#allocation2 + $0x70] sm:$0xf0]  ;;  %v391_v55 = vor.u32 %v444_v50, %v388_v52  ;;  %v374_v58 = vld [vmem:[#allocation2 + $0x48] sm:$0xf]  ;;  %v441_v60 = vld [vmem:[#allocation2 + $0x4c] sm:$0xf] }
   0xf   :  { %v50_v6 = vsub.f32 1.0, %v49_v5  ;;  %v66_v47 = vmul.f32 127.0, %v560_v37  ;;  %v395_v56 = vor.u32 %v446_v54, %v394_v53  ;;  %v442_v59 = vld [vmem:[#allocation2 + $0x50] sm:$0xf0]  ;;  %v376_v62 = vld [vmem:[#allocation2 + $0x54] sm:$0xf0]  ;;  %vm70_vm1 = vweird.f32 %v560_v37 }
  0x10   :  { %46 = vadd.xlane.f32.xlu0 %v459_v2  ;;  %v375_v61 = vor.u32 %v442_v59, %v374_v58  ;;  %v382_v63 = vld [vmem:[#allocation2 + $0x50] sm:$0xf]  ;;  %v443_v0 = vld [vmem:[#allocation2 + $0x58] sm:$0xf0]  ;;  %v352_v20 = vld [vmem:[#allocation2 + $0x24] sm:$0xf0] }
  0x11   :  { %v51_v7 = vmul.f32 %v473_v4, %v50_v6  ;;  %279 = vmatpush.bf16.msra.mxu0 %v399_v41  ;;  %293 = vmatpush.bf16.msra.mxu1 %v403_v45  ;;  %v67_v57 = vsub.f32 1.0, %v66_v47  ;;  %v439_v5 = vld [vmem:[#allocation2 + $0x38] sm:$0xf0]  ;;  %v438_v6 = vld [vmem:[#allocation2 + $0x34] sm:$0xf] }
  0x12   :  { %307 = vmatpush.bf16.msra.mxu2 %v407_v46  ;;  %v435_v18 = vld [vmem:[#allocation2 + $0x1c] sm:$0xf]  ;;  %v358_v21 = vld [vmem:[#allocation2 + $0x20] sm:$0xf]  ;;  %v437_v22 = vld [vmem:[#allocation2 + $0x28] sm:$0xf0] }
  0x13   :  { %v52_v8 = vadd.f32 %v473_v4, %v51_v7  ;;  %v68_v3 = vmul.f32 %v560_v37, %v67_v57  ;;  %v355_v23 = vor.u32 %v435_v18, %v352_v20  ;;  %v359_v24 = vor.u32 %v437_v22, %v358_v21  ;;  %v338_v26 = vld [vmem:[#allocation2] sm:$0xf]  ;;  %v433_v27 = vld [vmem:[#allocation2 + $0x8] sm:$0xf0]  ;;  %v432_v28 = vld [vmem:[#allocation2 + $0x4] sm:$0xf] }
  0x14   :  { %v339_v29 = vor.u32 %v433_v27, %v338_v26  ;;  %v340_v30 = vld [vmem:[#allocation2 + $0xc] sm:$0xf0]  ;;  %v346_v31 = vld [vmem:[#allocation2 + $0x8] sm:$0xf]  ;;  %v434_v32 = vld [vmem:[#allocation2 + $0x10] sm:$0xf0] }
  0x15   :  { %v54_v9 = vsel %vm53_vm0, %v473_v4, %v52_v8  ;;  %280 = vmatpush.bf16.msra.mxu0 %v387_v51  ;;  %294 = vmatpush.bf16.msra.mxu1 %v391_v55  ;;  %v362_v4 = vld [vmem:[#allocation2 + $0x30] sm:$0xf]  ;;  %v364_v8 = vld [vmem:[#allocation2 + $0x3c] sm:$0xf0]  ;;  %v343_v34 = vor.u32 %v432_v28, %v340_v30  ;;  %v347_v35 = vor.u32 %v434_v32, %v346_v31 }
  0x16   :  { %308 = vmatpush.bf16.msra.mxu2 %v395_v56  ;;  %v363_v7 = vor.u32 %v439_v5, %v362_v4  ;;  %v470_v50 = vld [vmem:[%s588_s1] ss:$0 sm:$0xff] }
  0x17   :  { %v471_v58 = vld [vmem:[%s589_s2] ss:$0 sm:$0xff] }
  0x19   :  { %281 = vmatpush.bf16.msra.mxu0 %v375_v61 }
  0x1d   :  { %282 = vmatpush.bf16.msra.mxu0 %v363_v7 }
  0x7b   :  { %v45_v10 = vpop.xlane.xlu0 %44 }
  0x7c   :  { %v55_v11 = vmul.f32 %v54_v9, %v45_v10  ;;  %v440_v10 = vld [vmem:[#allocation2 + $0x40] sm:$0xf0] }
  0x7e   :  { %v552_v12 = vsub.f32 %v458_v1, %v55_v11  ;;  %v379_v1 = vor.u32 %v441_v60, %v376_v62  ;;  %v367_v11 = vor.u32 %v438_v6, %v364_v8 }
  0x80   :  { %v59_v13 = vmul.f32 %v552_v12, %v552_v12  ;;  %295 = vmatpush.bf16.msra.mxu1 %v379_v1  ;;  %v77_v54 = vmul.f32 %v470_v50, %v552_v12  ;;  %v141_v12 = vld [vmem:[%s591_s4] sm:$0x7] }
  0x81   :  { %v144_v1 = vperm.slane %v141_v12, 1 }
  0x82   :  { %61 = vadd.xlane.f32.xlu1 %v59_v13 }
  0x83   :  { %v47_v14 = vpop.xlane.xlu0 %46 }
  0x84   :  { %v56_v15 = vmul.f32 %v54_v9, %v47_v14  ;;  %v370_v9 = vld [vmem:[#allocation2 + $0x38] sm:$0xf]  ;;  %v69_v14 = vadd.f32 %v560_v37, %v68_v3  ;;  %296 = vmatpush.bf16.msra.mxu1 %v367_v11  ;;  %v143_v3 = vperm.slane %v141_v12, 0 }
  0x85   :  { %v371_v13 = vor.u32 %v440_v10, %v370_v9 }
  0x86   :  { %v556_v16 = vsub.f32 %v459_v2, %v56_v15  ;;  %v383_v2 = vor.u32 %v443_v0, %v382_v63  ;;  %v350_v15 = vld [vmem:[#allocation2 + $0x18] sm:$0xf]  ;;  %v71_v25 = vsel %vm70_vm1, %v560_v37, %v69_v14 }
  0x88   :  { %v60_v17 = vmul.f32 %v556_v16, %v556_v16  ;;  %309 = vmatpush.bf16.msra.mxu2 %v383_v2  ;;  %297 = vmatpush.bf16.msra.mxu1 %v355_v23  ;;  %v78_v56 = vmul.f32 %v470_v50, %v556_v16  ;;  %v145_v2 = vperm.slane %v141_v12, 2 }
  0x8a   :  { %63 = vadd.xlane.f32.xlu1 %v60_v17  ;;  %v436_v17 = vld [vmem:[#allocation2 + $0x20] sm:$0xf0] }
  0x8b   :  { %v351_v19 = vor.u32 %v436_v17, %v350_v15 }
  0x8c   :  { %310 = vmatpush.bf16.msra.mxu2 %v371_v13  ;;  %298 = vmatpush.bf16.msra.mxu1 %v343_v34 }
  0x8d   :  { %283 = vmatpush.bf16.msra.mxu0 %v351_v19 }
  0x90   :  { %311 = vmatpush.bf16.msra.mxu2 %v359_v24 }
  0x91   :  { %284 = vmatpush.bf16.msra.mxu0 %v339_v29 }
  0x94   :  { %312 = vmatpush.bf16.msra.mxu2 %v347_v35 }
  0xf5   :  { %v62_v33 = vpop.xlane.xlu1 %61 }
  0xf6   :  { %v72_v36 = vmul.f32 %v71_v25, %v62_v33 }
  0xf8   :  { %v79_v38 = vadd.f32 1e-06, %v72_v36 }
  0xfa   :  { %476 = vrsqrt.f32 %v79_v38  ;;  %vm87_vm3 = vweird.f32 %v79_v38 }
  0xfd   :  { %v64_v37 = vpop.xlane.xlu1 %63 }
  0xfe   :  { %v73_v39 = vmul.f32 %v71_v25, %v64_v37 }
 0x100   :  { %v477_v40 = vpop.eup %476  ;;  %v80_v41 = vadd.f32 1e-06, %v73_v39 }
 0x101   :  { %v82_v42 = vmul.f32 %v477_v40, %v79_v38  ;;  %vm88_vm2 = vweird.f32 %v477_v40 }
 0x102   :  { %478 = vrsqrt.f32 %v80_v41  ;;  %vm89_vm4 = vmor %vm87_vm3, %vm88_vm2  ;;  %vm97_vm6 = vweird.f32 %v80_v41 }
 0x103   :  { %v83_v43 = vmul.f32 %v477_v40, %v82_v42 }
 0x105   :  { %v84_v44 = vmul.f32 0.5, %v83_v43 }
 0x107   :  { %v85_v45 = vsub.f32 1.5, %v84_v44 }
 0x108   :  { %v479_v46 = vpop.eup %478 }
 0x109   :  { %v92_v47 = vmul.f32 %v479_v46, %v80_v41  ;;  %v86_v48 = vmul.f32 %v477_v40, %v85_v45  ;;  %vm98_vm5 = vweird.f32 %v479_v46 }
 0x10a   :  { %vm99_vm7 = vmor %vm97_vm6, %vm98_vm5 }
 0x10b   :  { %v93_v49 = vmul.f32 %v479_v46, %v92_v47  ;;  %v90_v52 = vsel %vm89_vm4, %v477_v40, %v86_v48 }
 0x10c   :  { %v101_v57 = vmul.f32 %v90_v52, %v77_v54 }
 0x10d   :  { %v94_v51 = vmul.f32 0.5, %v93_v49 }
 0x10e   :  { %v106_v61 = vadd.f32 %v471_v58, %v101_v57 }
 0x10f   :  { %v95_v53 = vsub.f32 1.5, %v94_v51 }
 0x111   :  { %v96_v55 = vmul.f32 %v479_v46, %v95_v53 }
 0x113   :  { %v100_v59 = vsel %vm99_vm7, %v479_v46, %v96_v55 }
 0x114   :  { %v102_v60 = vmul.f32 %v100_v59, %v78_v56 }
 0x116   :  { %v107_v62 = vadd.f32 %v471_v58, %v102_v60 }
 0x118   :  { %v108_v63 = vpack.c.bf16 %v107_v62, %v106_v61 }
 0x11a   :  { %285 = vmatmul.bf16.vlgmr.msra.gmra.mxu0 %v108_v63  ;;  %299 = vmatmul.bf16.vlgmr.msra.gmra.mxu1 %v108_v63 }
 0x11b   :  { %313 = vmatmul.bf16.vlgmr.msra.gmra.mxu2 %v108_v63 }
 0x197   :  { %v286_v0 = vpop.f32.mrf.mxu0  ;;  %v300_v16 = vpop.f32.mrf.mxu1 }
 0x198   :  { %v301_v5 = vadd.f32 %v300_v16, %v144_v1  ;;  %v287_v8 = vadd.f32 %v286_v0, %v143_v3 }
 0x19e   :  { %v314_v4 = vpop.f32.mrf.mxu2 }
 0x19f   :  { %v315_v6 = vadd.f32 %v314_v4, %v145_v2  ;;  %v288_v7 = vpop.f32.mrf.mxu0  ;;  %v302_v13 = vpop.f32.mrf.mxu1 }
 0x1a0   :  { %v289_v9 = vadd.f32 %v288_v7, %v143_v3  ;;  %v303_v15 = vadd.f32 %v302_v13, %v144_v1 }
 0x1a1   :  { %v323_v10 = vpack.c.bf16 %v315_v6, %v301_v5 }
 0x1a2   :  { %v463_v11 = vpack.c.bf16 %v289_v9, %v287_v8 }
 0x1a3   :  { %325 = vst [vmem:[%s593_s6] sm:$0xff] %v323_v10 }
 0x1a4   :  { %464 = vst [vmem:[%s592_s5] sm:$0xff] %v463_v11  }
 0x1a6   :  { %v316_v14 = vpop.f32.mrf.mxu2 }
 0x1a7   :  { %v317_v17 = vadd.f32 %v316_v14, %v145_v2 }
 0x1a9   :  { %v324_v18 = vpack.c.bf16 %v317_v17, %v303_v15 }
 0x1ab   :  { %326 = vst [vmem:[%s593_s6 + $0x8] sm:$0xff] %v324_v18 }
 0x1ac   :  { %335 = vsyncpa [#allocation3], 1 }

// kernel: decoder_forward.15
= control target key start
LH: loop header
LB: loop body
LE: loop exit
PB: predicated region body
PF: predicated region fallthrough
CT: control target
= control target key end

     0   :  { %10 = vsyncpa [#allocation3], 0  ;;  %s289_s21 = smov [#allocation2]   ;;  %s290_s23 = smov 64   ;;  %s342_s0 = inlined_call_operand.vmem [shape: bf16[16,128], index: 0, kind: input, shape index: {}]   ;;  %s343_s1 = inlined_call_operand.vmem [shape: f32[1,128], index: 1, kind: input, shape index: {}]   ;;  %s344_s2 = inlined_call_operand.vmem [shape: f32[1,128], index: 2, kind: input, shape index: {}]   ;;  %s345_s3 = inlined_call_operand.hbm [shape: bf16[128,128], index: 3, kind: input, shape index: {}]   ;;  %s346_s4 = inlined_call_operand.vmem [shape: f32[1,128], index: 4, kind: input, shape index: {}]   ;;  %s347_s5 = inlined_call_operand.vmem [shape: bf16[16,128], index: 5, kind: output, shape index: {}]  }
   0x1   :  { %s21_s20 = sshll.u32 %s345_s3, 4  ;;  %s23_s22 = sshll.u32 %s289_s21, 4  ;;  %s22_s20 = int_to_ptr.hbm [resolvable:$true] %s21_s20  ;;  %s24_s22 = int_to_ptr.vmem [resolvable:$true] %s23_s22 }
   0x2   :  { %s291_s24 = smov 4  }
   0x3   :  { %29 = dma.hbm_to_vmem [thread:$0]  %s22_s20, 1024, %s24_s22, [#allocation3], %s290_s23, %s290_s23, %s291_s24  }
   0x4   :  { %287 = dma.done.wait [#allocation3], 1024  }
   0x5   :  { %288 = vsyncadd [#allocation3], 4294966272  ;;  %v239_v0 = vld [vmem:[%s342_s0] sm:$0xff]   ;;  %v292_v3 = vmov 128.0   ;;  %v237_v18 = vld [vmem:[#allocation2 + $0x38] sm:$0xff]  ;;  %v293_v19 = vmov 127.0  }
   0x6   :  { %v240_v1 = vunpack.c.l.bf16 %v239_v0  ;;  %v241_v2 = vunpack.c.h.bf16 %v239_v0  ;;  %255 = vrcp.f32 %v292_v3  ;;  %175 = vmatpush.bf16.msra.mxu0 %v237_v18  ;;  %v236_v20 = vld [vmem:[#allocation2 + $0x30] sm:$0xff]  ;;  %v235_v22 = vld [vmem:[#allocation2 + $0x28] sm:$0xff]  ;;  %v234_v24 = vld [vmem:[#allocation2 + $0x20] sm:$0xff] }
   0x7   :  { %257 = vrcp.f32 %v293_v19  ;;  %v233_v26 = vld [vmem:[#allocation2 + $0x18] sm:$0xff]  ;;  %v232_v28 = vld [vmem:[#allocation2 + $0x10] sm:$0xff]  ;;  %v231_v30 = vld [vmem:[#allocation2 + $0x8] sm:$0xff] }
   0x8   :  { %42 = vadd.xlane.f32.xlu0 %v240_v1  ;;  %v230_v32 = vld [vmem:[#allocation2] sm:$0xff] }
   0x9   :  { %v252_v48 = vld [vmem:[%s343_s1] ss:$0 sm:$0xff] }
   0xa   :  { %176 = vmatpush.bf16.msra.mxu0 %v236_v20  ;;  %v253_v56 = vld [vmem:[%s344_s2] ss:$0 sm:$0xff] }
   0xb   :  { %v254_v63 = vld [vmem:[%s346_s4] ss:$0 sm:$0xff] }
   0xc   :  { %v256_v4 = vpop.eup %255 }
   0xd   :  { %v47_v5 = vmul.f32 128.0, %v256_v4  ;;  %vm51_vm0 = vweird.f32 %v256_v4  ;;  %v258_v21 = vpop.eup %257 }
   0xe   :  { %v64_v23 = vmul.f32 127.0, %v258_v21  ;;  %177 = vmatpush.bf16.msra.mxu0 %v235_v22  ;;  %vm68_vm1 = vweird.f32 %v258_v21 }
   0xf   :  { %v48_v6 = vsub.f32 1.0, %v47_v5 }
  0x10   :  { %44 = vadd.xlane.f32.xlu0 %v241_v2  ;;  %v65_v25 = vsub.f32 1.0, %v64_v23 }
  0x11   :  { %v49_v7 = vmul.f32 %v256_v4, %v48_v6 }
  0x12   :  { %178 = vmatpush.bf16.msra.mxu0 %v234_v24  ;;  %v66_v27 = vmul.f32 %v258_v21, %v65_v25 }
  0x13   :  { %v50_v8 = vadd.f32 %v256_v4, %v49_v7 }
  0x14   :  { %v67_v29 = vadd.f32 %v258_v21, %v66_v27 }
  0x15   :  { %v52_v9 = vsel %vm51_vm0, %v256_v4, %v50_v8 }
  0x16   :  { %179 = vmatpush.bf16.msra.mxu0 %v233_v26  ;;  %v69_v31 = vsel %vm68_vm1, %v258_v21, %v67_v29 }
  0x1a   :  { %180 = vmatpush.bf16.msra.mxu0 %v232_v28 }
  0x1e   :  { %181 = vmatpush.bf16.msra.mxu0 %v231_v30 }
  0x22   :  { %182 = vmatpush.bf16.msra.mxu0 %v230_v32 }
  0x7b   :  { %v43_v10 = vpop.xlane.xlu0 %42 }
  0x7c   :  { %v53_v11 = vmul.f32 %v52_v9, %v43_v10 }
  0x7e   :  { %v55_v12 = vsub.f32 %v240_v1, %v53_v11 }
  0x80   :  { %v57_v13 = vmul.f32 %v55_v12, %v55_v12  ;;  %v75_v52 = vmul.f32 %v252_v48, %v55_v12 }
  0x82   :  { %59 = vadd.xlane.f32.xlu1 %v57_v13 }
  0x83   :  { %v45_v14 = vpop.xlane.xlu0 %44 }
  0x84   :  { %v54_v15 = vmul.f32 %v52_v9, %v45_v14 }
  0x86   :  { %v56_v16 = vsub.f32 %v241_v2, %v54_v15 }
  0x88   :  { %v58_v17 = vmul.f32 %v56_v16, %v56_v16  ;;  %v76_v54 = vmul.f32 %v252_v48, %v56_v16 }
  0x8a   :  { %61 = vadd.xlane.f32.xlu1 %v58_v17 }
  0xf5   :  { %v60_v33 = vpop.xlane.xlu1 %59 }
  0xf6   :  { %v70_v34 = vmul.f32 %v69_v31, %v60_v33 }
  0xf8   :  { %v77_v35 = vadd.f32 1e-06, %v70_v34 }
  0xfa   :  { %259 = vrsqrt.f32 %v77_v35  ;;  %vm85_vm3 = vweird.f32 %v77_v35 }
  0xfd   :  { %v62_v36 = vpop.xlane.xlu1 %61 }
  0xfe   :  { %v71_v37 = vmul.f32 %v69_v31, %v62_v36 }
 0x100   :  { %v260_v38 = vpop.eup %259  ;;  %v78_v39 = vadd.f32 1e-06, %v71_v37 }
 0x101   :  { %v80_v40 = vmul.f32 %v260_v38, %v77_v35  ;;  %vm86_vm2 = vweird.f32 %v260_v38 }
 0x102   :  { %261 = vrsqrt.f32 %v78_v39  ;;  %vm87_vm4 = vmor %vm85_vm3, %vm86_vm2  ;;  %vm95_vm6 = vweird.f32 %v78_v39 }
 0x103   :  { %v81_v41 = vmul.f32 %v260_v38, %v80_v40 }
 0x105   :  { %v82_v42 = vmul.f32 0.5, %v81_v41 }
 0x107   :  { %v83_v43 = vsub.f32 1.5, %v82_v42 }
 0x108   :  { %v262_v44 = vpop.eup %261 }
 0x109   :  { %v90_v45 = vmul.f32 %v262_v44, %v78_v39  ;;  %v84_v46 = vmul.f32 %v260_v38, %v83_v43  ;;  %vm96_vm5 = vweird.f32 %v262_v44 }
 0x10a   :  { %vm97_vm7 = vmor %vm95_vm6, %vm96_vm5 }
 0x10b   :  { %v91_v47 = vmul.f32 %v262_v44, %v90_v45  ;;  %v88_v51 = vsel %vm87_vm4, %v260_v38, %v84_v46 }
 0x10c   :  { %v99_v55 = vmul.f32 %v88_v51, %v75_v52 }
 0x10d   :  { %v92_v49 = vmul.f32 0.5, %v91_v47 }
 0x10e   :  { %v104_v59 = vadd.f32 %v253_v56, %v99_v55 }
 0x10f   :  { %v93_v50 = vsub.f32 1.5, %v92_v49 }
 0x111   :  { %v94_v53 = vmul.f32 %v262_v44, %v93_v50 }
 0x113   :  { %v98_v57 = vsel %vm97_vm7, %v262_v44, %v94_v53 }
 0x114   :  { %v100_v58 = vmul.f32 %v98_v57, %v76_v54 }
 0x116   :  { %v105_v60 = vadd.f32 %v253_v56, %v100_v58 }
 0x118   :  { %v106_v61 = vpack.c.bf16 %v105_v60, %v104_v59 }
 0x11a   :  { %183 = vmatmul.bf16.vlgmr.msra.gmra.mxu0 %v106_v61 }
 0x197   :  { %v184_v62 = vpop.f32.mrf.mxu0 }
 0x198   :  { %v185_v1 = vadd.f32 %v254_v63, %v184_v62 }
 0x19f   :  { %v186_v0 = vpop.f32.mrf.mxu0 }
 0x1a0   :  { %v187_v2 = vadd.f32 %v254_v63, %v186_v0 }
 0x1a2   :  { %v245_v3 = vpack.c.bf16 %v187_v2, %v185_v1 }
 0x1a4   :  { %246 = vst [vmem:[%s347_s5] sm:$0xff] %v245_v3  }
 0x1a5   :  { %197 = vsyncpa [#allocation3], 1 }

// kernel: decoder_forward.14
= control target key start
LH: loop header
LB: loop body
LE: loop exit
PB: predicated region body
PF: predicated region fallthrough
CT: control target
= control target key end

     0   :  { %11 = vsyncpa [#allocation6], 0  ;;  %s1328_s21 = smov 0   ;;  %s1330_s22 = smov 0   ;;  %s1477_s0 = inlined_call_operand.vmem [shape: bf16[2,8,128], index: 0, kind: input, shape index: {}]   ;;  %s1478_s1 = inlined_call_operand.vmem [shape: bf16[2,8,256], index: 1, kind: input, shape index: {}]   ;;  %s1479_s2 = inlined_call_operand.vmem [shape: s8[2,1,8], index: 2, kind: input, shape index: {}]   ;;  %s1480_s3 = inlined_call_operand.vmem [shape: bf16[2,8,128], index: 3, kind: input, shape index: {}]   ;;  %s1481_s4 = inlined_call_operand.hbm [shape: bf16[128,128], index: 4, kind: input, shape index: {}]   ;;  %s1482_s5 = inlined_call_operand.vmem [shape: f32[1,128], index: 5, kind: input, shape index: {}]   ;;  %s1483_s6 = inlined_call_operand.vmem [shape: bf16[2,8,128], index: 6, kind: output, shape index: {}]  }
   0x1   :  { %s1332_s23 = smov 0  }
   0x2 LB: > { %s1086_s24 = sadd.s32 4294967295, %s1281_s23   ;;  %s36_s25 = sadd.s32 1, %s1277_s22  ;;  %s1281_s23 = sphi %s1332_s23, %s17_s23   ;;  %s1277_s22 = sphi %s1330_s22, %s1485_s22   ;;  %s1273_s21 = sphi %s1328_s21, %s1484_s21  }
   0x3   : > { %p38_p0 = scmp.ge.s32.totalorder %s36_s25, 2  ;;  %p1088_p1 = scmp.ge.s32.totalorder %s1281_s23, 1 }
   0x4   : > { %p223_p2 = scmp.lt.s32.totalorder %s1281_s23, 3  ;;  %p1161_p4 = scmp.eq.s32.totalorder %s1086_s24, 0 }
   0x5   : > { %s1487_s25 = smov (%p38_p0, %s36_s25), 0  ;;  %s234_s28 = sshll.u32 %s1481_s4, 4  ;;  %s235_s28 = int_to_ptr.hbm [resolvable:$true] %s234_s28 }
   0x6   : > { %p224_p3 = pnand %p1088_p1, %p223_p2  ;;  %s1283_s29 = smov [#allocation5]  }
   0x7   : > { %s236_s30 = sshll.u32 %s1283_s29, 4  ;;  %s1284_s7 = smov 64   ;;  %s237_s30 = int_to_ptr.vmem [resolvable:$true] %s236_s30 }
   0x8   : > { %p1157_p5 = pneg %p224_p3  ;;  %s1285_s8 = smov 4  }
   0x9   : > { %296 = sbr.rel (%p224_p3) target bundleno = 1177 (0x499), region = 44 }
   0xa   : > { %p1158_p6 = pnand %p1161_p4, %p1157_p5 }
   0xc   : > { %1160 = dma.hbm_to_vmem [thread:$0]  (!%p1158_p6), %s235_s28, 1024, %s237_s30, [#allocation6], %s1284_s7, %s1284_s7, %s1285_s8  }
   0xe   : > { %1268 = dma.done.wait (%p1161_p4), [#allocation6], 1024  }
   0xf   : > { %1270 = vsyncadd (%p1161_p4), [#allocation6], 4294966272  ;;  %p353_p7 = scmp.lt.s32.totalorder %s1273_s21, 1  ;;  %vm403_vm0 = vcmask 261120   ;;  %vm394_vm1 = vcmask 7168   ;;  %v1286_v3 = vmov -inf   ;;  %v416_v7 = vlaneseq }
  0x10   : > { %395 = vst.msk [vmem:[#allocation2] sm:$0xff] %vm394_vm1, %v1286_v3  ;;  %v1287_v10 = vmov -1e+09   ;;  %vm452_vm4 = vcmask 64512   ;;  %v1288_v22 = vmov 0   ;;  %s1289_s20 = smov 96  }
  0x11   : > { %s1489_s21 = smov (!%p353_p7, %s1273_s21), 1  ;;  %396 = vst.msk [vmem:[#allocation2 + $0x8] sm:$0xff] %vm394_vm1, %v1286_v3  ;;  %v417_v8 = vshrl.u32 %v416_v7, 7  ;;  %v422_v9 = vand.u32 127, %v416_v7  ;;  %1197 = vset.pattern.permute.xlu1 %v1288_v22  ;;  %1198 = vset.pattern.permute.xlu2 %v1288_v22  ;;  %v1291_v23 = vmov 0.0   ;;  %s1292_s24 = smov 64  }
  0x12   : > { %s1144_s9 = sshll.u32 %s1489_s21, 3  ;;  %s1355_s13 = sshll.u32 %s1489_s21, 2  ;;  %397 = vst.msk [vmem:[#allocation2 + $0x10] sm:$0xff] %vm394_vm1, %v1286_v3  ;;  %1199 = vset.pattern.permute.xlu0 %v1288_v22  ;;  %vm490_vm5 = vcmask 1043456  }
  0x13   : > { %s368_s12 = scalar_lea.vmem %s1478_s1, %s1144_s9  ;;  %s359_s16 = scalar_lea.vmem %s1477_s0, %s1355_s13  ;;  %398 = vst.msk [vmem:[#allocation2 + $0x18] sm:$0xff] %vm394_vm1, %v1286_v3  ;;  %vm425_vm3 = vcmp.le.s32.totalorder %v422_v9, %v417_v8 }
  0x14   : > { %v1353_v0 = vld [vmem:[%s368_s12] sm:$0xff]  ;;  %s374_s19 = scalar_lea.vmem %s1479_s2, %s1489_s21  ;;  %v426_v13 = vsel %vm425_vm3, 0.0, %v1287_v10  ;;  %s1290_s21 = smov 32   ;;  %399 = vst.msk [vmem:[#allocation3] sm:$0xff] %vm394_vm1, %v1291_v23 }
  0x15   : > { %v434_v1 = vsel %vm403_vm0, %v1353_v0, 0  ;;  %v408_v2 = vld [vmem:[%s359_s16] sm:$0xf]  ;;  %v515_v20 = vunpack.c.l.b16 %v1353_v0  ;;  %400 = vst.msk [vmem:[#allocation3 + $0x8] sm:$0xff] %vm394_vm1, %v1291_v23  ;;  %v485_v32 = vunpack.c.h.b16 %v1353_v0  ;;  %s381_s28 = scalar_lea.vmem %s1480_s3, %s1355_s13  ;;  %s388_s9 = scalar_lea.vmem %s1483_s6, %s1355_s13 }
  0x16   : > { %443 = vmatpush.bf16.xpose.msra.mxu0 %v434_v1  ;;  %v410_v4 = vld [vmem:[%s374_s19] sm:$0x1]  ;;  %401 = vst.msk [vmem:[#allocation3 + $0x10] sm:$0xff] %vm394_vm1, %v1291_v23  ;;  %v511_v24 = vunpack.c.l.b16 %v408_v2 }
  0x17   : > { %v411_v5 = vunpack.c.0.s8 %v410_v4  ;;  %v516_v21 = vpack.c.b16 %v515_v20, %v515_v20  ;;  %402 = vst.msk [vmem:[#allocation3 + $0x18] sm:$0xff] %vm394_vm1, %v1291_v23  ;;  %v1388_v26 = vld [vmem:[#allocation2] sm:$0xff]  ;;  %v486_v35 = vpack.c.b16 %v485_v32, %v485_v32 }
  0x18   : > { %404 = vst.msk [vmem:[#allocation4] sm:$0xff] %vm403_vm0, %v1291_v23  ;;  %v512_v25 = vpack.c.b16 %v511_v24, %v511_v24  ;;  %v1422_v0 = vld [vmem:[#allocation2 + $0x8] sm:$0xff] }
  0x19   : > { %v412_v6 = vcvt.s32.f32 %v411_v5  ;;  %683 = vrot.lane.b32.xlu2 %v516_v21, %s1290_s21  ;;  %405 = vst.msk [vmem:[#allocation4 + $0x8] sm:$0xff] %vm403_vm0, %v1291_v23  ;;  %v492_v36 = vsel %vm490_vm5, %v486_v35, 0  ;;  %v624_v8 = vld [vmem:[#allocation2 + $0x10] sm:$0xff] }
  0x1a   : > { %406 = vst.msk [vmem:[#allocation4 + $0x10] sm:$0xff] %vm403_vm0, %v1291_v23  ;;  %501 = vmatpush.bf16.msra.mxu1 %v492_v36 }
  0x1b   : > { %vm413_vm2 = vcmp.gt.f32.partialorder %v412_v6, 0.0  ;;  %407 = vst.msk [vmem:[#allocation4 + $0x18] sm:$0xff] %vm403_vm0, %v1291_v23 }
  0x1c   : > { %v414_v11 = vsel %vm413_vm2, 0.0, %v1287_v10 }
  0x1d   : > { %1098 = vmatmul.msk.bf16.vlgmr.msra.gmra.mxu0 %vm403_vm0, %v408_v2  ;;  %v427_v12 = vperm.slane %v414_v11, 0  ;;  %v707_v2 = vld [vmem:[#allocation2 + $0x18] sm:$0xff] }
  0x1f   : > { %v1371_v14 = vadd.f32 %v427_v12, %v426_v13 }
  0x21   : > { %600 = vrot.lane.b32.xlu2 %v516_v21, %s1292_s24 }
  0x29   : > { %598 = vrot.lane.b32.xlu2 %v512_v25, %s1292_s24 }
  0x73   : > { %v684_v33 = vpop.permute.xlu2 %683 }
  0x74   : > { %v689_v34 = vsel %vm403_vm0, %v684_v33, 0 }
  0x75   : > { %698 = vmatpush.bf16.xpose.msrb.mxu0 %v689_v34 }
  0x7b   : > { %v601_v37 = vpop.permute.xlu2 %600 }
  0x7c   : > { %v606_v38 = vsel %vm403_vm0, %v601_v37, 0 }
  0x7d   : > { %615 = vmatpush.bf16.xpose.msrb.mxu1 %v606_v38 }
  0x83   : > { %v599_v46 = vpop.permute.xlu2 %598 }
  0x9a   : > { %v445_v15 = vpop.f32.mrf.mxu0 }
  0x9b   : > { %v449_v16 = vmul.f32 0.17677669, %v445_v15 }
  0x9d   : > { %v450_v17 = vadd.f32 %v449_v16, %v1371_v14 }
  0x9f   : > { %v453_v18 = vsel %vm452_vm4, %v450_v17, -inf }
  0xa0   : > { %454 = vmax.xlane.f32.xlu0 %v453_v18 }
  0xa2   : > { %v447_v19 = vpop.f32.mrf.mxu0 }
  0xb4   : > { %517 = vrot.lane.b32.xlu0 %v516_v21, %s1289_s20 }
 0x113   : > { %v455_v27 = vpop.xlane.xlu0 %454 }
 0x114   : > { %v1391_v28 = vmax.f32 %v1388_v26, %v455_v27 }
 0x116   : > { %v457_v29 = vsub.f32 %v1388_v26, %v1391_v28  ;;  %509 = vst.msk [vmem:[#allocation2] sm:$0xff] %vm394_vm1, %v1391_v28  ;;  %462 = vperm.xlu1 %1197, %v1391_v28  }
 0x118   : > { %v458_v13 = vmul.f32 1.442695, %v457_v29 }
 0x11e   : > { %513 = vrot.lane.b32.xlu1 %v512_v25, %s1289_s20 }
 0x126   : > { %681 = vrot.lane.b32.xlu1 %v512_v25, %s1290_s21  ;;  %v518_v30 = vpop.permute.xlu0 %517 }
 0x127   : > { %v523_v31 = vsel %vm403_vm0, %v518_v30, 0 }
 0x128   : > { %532 = vmatpush.bf16.xpose.msra.mxu2 %v523_v31 }
 0x188   : > { %v463_v39 = vpop.permute.xlu1 %462 }
 0x189   : > { %v465_v40 = vsub.f32 %v450_v17, %v463_v39 }
 0x18b   : > { %v466_v41 = vmul.f32 1.442695, %v465_v40 }
 0x18d   : > { %1201 = vpow2.f32 %v466_v41 }
 0x18e   : > { %1203 = vpow2.f32 %v458_v13 }
 0x190   : > { %v514_v42 = vpop.permute.xlu1 %513 }
 0x191   : > { %1100 = vmatmul.msk.bf16.vlgmr.msra.gmra.mxu2 %vm403_vm0, %v514_v42 }
 0x193   : > { %v1202_v43 = vpop.eup %1201 }
 0x194   : > { %v483_v44 = vpack.c.bf16 %v1202_v43, %v1202_v43  ;;  %v470_v12 = vsel %vm452_vm4, %v1202_v43, 0.0 }
 0x196   : > { %1099 = vmatmul.msk.bf16.vlgmr.msra.gmra.mxu1 %vm452_vm4, %v483_v44  ;;  %v468_v44 = vld [vmem:[#allocation3] sm:$0xff] }
 0x198   : > { %v682_v45 = vpop.permute.xlu1 %681 }
 0x199   : > { %1104 = vmatmul.msk.bf16.vlgmr.msrb.gmra.mxu0 %vm403_vm0, %v682_v45 }
 0x1a6   : > { %1102 = vmatmul.msk.bf16.vlgmr.msrb.gmra.mxu1 %vm403_vm0, %v599_v46 }
 0x213   : > { %v1409_v47 = vpop.f32.mrf.mxu1 }
 0x214   : > { %v534_v48 = vpop.f32.mrf.mxu2 }
 0x215   : > { %v538_v49 = vmul.f32 0.17677669, %v534_v48 }
 0x216   : > { %v700_v50 = vpop.f32.mrf.mxu0 }
 0x217   : > { %v704_v51 = vmul.f32 0.17677669, %v700_v50  ;;  %v539_v52 = vadd.f32 %v538_v49, %v1371_v14 }
 0x219   : > { %v542_v53 = vsel %vm452_vm4, %v539_v52, -inf  ;;  %v1414_v54 = vadd.f32 %v704_v51, %v1371_v14 }
 0x21a   : > { %543 = vmax.xlane.f32.xlu1 %v542_v53 }
 0x21b   : > { %v505_v55 = vpop.f32.mrf.mxu1  ;;  %v708_v56 = vsel %vm452_vm4, %v1414_v54, -inf }
 0x21c   : > { %v536_v57 = vpop.f32.mrf.mxu2  ;;  %709 = vmax.xlane.f32.xlu2 %v708_v56  ;;  %v558_v56 = vld [vmem:[#allocation3 + $0x8] sm:$0xff] }
 0x21e   : > { %v702_v58 = vpop.f32.mrf.mxu0 }
 0x223   : > { %v617_v59 = vpop.f32.mrf.mxu1 }
 0x224   : > { %v621_v60 = vmul.f32 0.17677669, %v617_v59 }
 0x226   : > { %v622_v61 = vadd.f32 %v621_v60, %v1371_v14  ;;  %v1204_v14 = vpop.eup %1203 }
 0x227   : > { %v469_v45 = vmul.f32 %v1204_v14, %v468_v44 }
 0x228   : > { %v625_v62 = vsel %vm452_vm4, %v622_v61, -inf }
 0x229   : > { %626 = vmax.xlane.f32.xlu0 %v625_v62 }
 0x22b   : > { %v619_v63 = vpop.f32.mrf.mxu1 }
 0x22c   : > { %v1146_v63 = vld [vmem:[#allocation5 + $0x8] sm:$0xff] }
 0x22d   : > { %809 = vmatpush.bf16.msra.mxu1 %v1146_v63 }
 0x233   : > { %574 = vrot.lane.b32.xlu1 %v486_v35, %s1289_s20 }
 0x23b   : > { %740 = vrot.lane.b32.xlu1 %v486_v35, %s1290_s21 }
 0x28d   : > { %v544_v1 = vpop.xlane.xlu1 %543 }
 0x28e   : > { %v545_v3 = vmax.f32 %v1422_v0, %v544_v1 }
 0x28f   : > { %v710_v4 = vpop.xlane.xlu2 %709 }
 0x290   : > { %v546_v5 = vsub.f32 %v1422_v0, %v545_v3  ;;  %597 = vst.msk [vmem:[#allocation2 + $0x8] sm:$0xff] %vm394_vm1, %v545_v3  ;;  %v711_v6 = vmax.f32 %v707_v2, %v710_v4  ;;  %551 = vperm.xlu2 %1198, %v545_v3   ;;  %v724_v4 = vld [vmem:[#allocation3 + $0x18] sm:$0xff] }
 0x292   : > { %v712_v7 = vsub.f32 %v707_v2, %v711_v6  ;;  %763 = vst.msk [vmem:[#allocation2 + $0x18] sm:$0xff] %vm394_vm1, %v711_v6  ;;  %717 = vperm.xlu0 %1199, %v711_v6   ;;  %v547_v41 = vmul.f32 1.442695, %v546_v5  ;;  %v1148_v5 = vld [vmem:[#allocation5 + $0x18] sm:$0xff] }
 0x294   : > { %v713_v39 = vmul.f32 1.442695, %v712_v7 }
 0x29c   : > { %v627_v9 = vpop.xlane.xlu0 %626 }
 0x29d   : > { %v628_v10 = vmax.f32 %v624_v8, %v627_v9 }
 0x29f   : > { %v629_v11 = vsub.f32 %v624_v8, %v628_v10  ;;  %680 = vst.msk [vmem:[#allocation2 + $0x10] sm:$0xff] %vm394_vm1, %v628_v10  ;;  %634 = vperm.xlu2 %1198, %v628_v10  }
 0x2a1   : > { %v630_v42 = vmul.f32 1.442695, %v629_v11 }
 0x2a5   : > { %v575_v15 = vpop.permute.xlu1 %574 }
 0x2a6   : > { %v580_v16 = vsel %vm490_vm5, %v575_v15, 0 }
 0x2a7   : > { %657 = vrot.lane.b32.xlu2 %v486_v35, %s1292_s24  ;;  %589 = vmatpush.bf16.msra.mxu3 %v580_v16 }
 0x2ad   : > { %v741_v17 = vpop.permute.xlu1 %740 }
 0x2ae   : > { %v746_v19 = vsel %vm490_vm5, %v741_v17, 0 }
 0x2af   : > { %755 = vmatpush.bf16.msrb.mxu2 %v746_v19 }
 0x2bc   : > { %471 = vadd.xlane.f32.xlu0 %v470_v12  ;;  %v566_v12 = vld [vmem:[#allocation4 + $0x8] sm:$0xff] }
 0x2d0   : > { %479 = vperm.xlu0 %1199, %v1204_v14  }
 0x2ea   : > { %v552_v18 = vpop.permute.xlu2 %551 }
 0x2eb   : > { %v554_v20 = vsub.f32 %v539_v52, %v552_v18  ;;  %v476_v52 = vld [vmem:[#allocation4] sm:$0xff]  ;;  %v732_v18 = vld [vmem:[#allocation4 + $0x18] sm:$0xff] }
 0x2ed   : > { %v555_v21 = vmul.f32 1.442695, %v554_v20  ;;  %v649_v20 = vld [vmem:[#allocation4 + $0x10] sm:$0xff] }
 0x2ef   : > { %1205 = vpow2.f32 %v555_v21 }
 0x2f5   : > { %v1206_v22 = vpop.eup %1205 }
 0x2f6   : > { %v560_v23 = vsel %vm452_vm4, %v1206_v22, 0.0  ;;  %v573_v24 = vpack.c.bf16 %v1206_v22, %v1206_v22 }
 0x2f7   : > { %561 = vadd.xlane.f32.xlu1 %v560_v23 }
 0x2f8   : > { %1101 = vmatmul.msk.bf16.vlgmr.msra.gmra.mxu3 %vm452_vm4, %v573_v24 }
 0x2f9   : > { %v635_v25 = vpop.permute.xlu2 %634 }
 0x2fa   : > { %v637_v26 = vsub.f32 %v622_v61, %v635_v25  ;;  %v641_v61 = vld [vmem:[#allocation3 + $0x10] sm:$0xff] }
 0x2fc   : > { %v638_v27 = vmul.f32 1.442695, %v637_v26 }
 0x2fe   : > { %1207 = vpow2.f32 %v638_v27 }
 0x301   : > { %v658_v28 = vpop.permute.xlu2 %657 }
 0x302   : > { %v663_v29 = vsel %vm490_vm5, %v658_v28, 0 }
 0x303   : > { %672 = vmatpush.bf16.msrb.mxu3 %v663_v29 }
 0x304   : > { %v1208_v30 = vpop.eup %1207  ;;  %v718_v31 = vpop.permute.xlu0 %717 }
 0x305   : > { %v720_v32 = vsub.f32 %v1414_v54, %v718_v31  ;;  %v643_v33 = vsel %vm452_vm4, %v1208_v30, 0.0  ;;  %v656_v34 = vpack.c.bf16 %v1208_v30, %v1208_v30 }
 0x306   : > { %644 = vadd.xlane.f32.xlu1 %v643_v33 }
 0x307   : > { %v721_v35 = vmul.f32 1.442695, %v720_v32  ;;  %852 = vmatpush.bf16.msra.mxu3 %v1148_v5 }
 0x308   : > { %1103 = vmatmul.msk.bf16.vlgmr.msrb.gmra.mxu3 %vm452_vm4, %v656_v34  ;;  %v1147_v34 = vld [vmem:[#allocation5 + $0x10] sm:$0xff] }
 0x309   : > { %1209 = vpow2.f32 %v721_v35  ;;  %v1150_v35 = vld [vmem:[#allocation5 + $0x28] sm:$0xff] }
 0x30a   : > { %1211 = vpow2.f32 %v713_v39  ;;  %895 = vmatpush.bf16.msra.mxu0 %v1150_v35 }
 0x30b   : > { %1213 = vpow2.f32 %v547_v41  ;;  %853 = vmatpush.bf16.msra.mxu3 %v1147_v34 }
 0x30c   : > { %1215 = vpow2.f32 %v630_v42 }
 0x30f   : > { %v1210_v36 = vpop.eup %1209 }
 0x310   : > { %v726_v37 = vsel %vm452_vm4, %v1210_v36, 0.0  ;;  %v739_v38 = vpack.c.bf16 %v1210_v36, %v1210_v36  ;;  %v1212_v40 = vpop.eup %1211  ;;  %v1152_v36 = vld [vmem:[#allocation5 + $0x38] sm:$0xff] }
 0x311   : > { %727 = vadd.xlane.f32.xlu2 %v726_v37  ;;  %v1214_v43 = vpop.eup %1213  ;;  %v725_v7 = vmul.f32 %v1212_v40, %v724_v4  ;;  %938 = vmatpush.bf16.msra.mxu2 %v1152_v36  ;;  %v1149_v37 = vld [vmem:[#allocation5 + $0x20] sm:$0xff] }
 0x312   : > { %1105 = vmatmul.msk.bf16.vlgmr.msrb.gmra.mxu2 %vm452_vm4, %v739_v38  ;;  %v1216_v48 = vpop.eup %1215  ;;  %v559_v57 = vmul.f32 %v1214_v43, %v558_v56  ;;  %896 = vmatpush.bf16.msra.mxu0 %v1149_v37  ;;  %v1151_v38 = vld [vmem:[#allocation5 + $0x30] sm:$0xff] }
 0x313   : > { %v642_v62 = vmul.f32 %v1216_v48, %v641_v61 }
 0x315   : > { %939 = vmatpush.bf16.msra.mxu2 %v1151_v38 }
 0x31f   : > { %735 = vperm.xlu1 %1197, %v1212_v40  }
 0x329   : > { %569 = vperm.xlu2 %1198, %v1214_v43  }
 0x32f   : > { %v472_v46 = vpop.xlane.xlu0 %471 }
 0x330   : > { %v473_v49 = vadd.f32 %v472_v46, %v469_v45 }
 0x331   : > { %652 = vperm.xlu2 %1198, %v1216_v48  }
 0x332   : > { %475 = vst.msk [vmem:[#allocation3] sm:$0xff] %vm394_vm1, %v473_v49 }
 0x339   : > { %v774_v50 = vld [vmem:[#allocation3] sm:$0xff] }
 0x33a   : > { %1217 = vrcp.f32 %v774_v50 }
 0x340   : > { %v1218_v51 = vpop.eup %1217 }
 0x341   : > { %779 = vperm.xlu2 %1198, %v1218_v51  }
 0x342   : > { %v480_v53 = vpop.permute.xlu0 %479 }
 0x343   : > { %v482_v54 = vmul.f32 %v480_v53, %v476_v52 }
 0x345   : > { %v507_v55 = vadd.f32 %v1409_v47, %v482_v54  ;;  %v1145_v47 = vld [vmem:[#allocation5] sm:$0xff] }
 0x346   : > { %810 = vmatpush.bf16.msra.mxu1 %v1145_v47 }
 0x347   : > { %508 = vst.msk [vmem:[#allocation4] sm:$0xff] %vm403_vm0, %v507_v55 }
 0x34e   : > { %v776_v29 = vld [vmem:[#allocation4] sm:$0xff] }
 0x36a   : > { %v562_v58 = vpop.xlane.xlu1 %561 }
 0x36b   : > { %v563_v59 = vadd.f32 %v562_v58, %v559_v57  ;;  %v767_v57 = vld [vmem:[%s381_s28] sm:$0xf] }
 0x36c   : > { %v768_v58 = vunpack.c.l.bf16 %v767_v57 }
 0x36d   : > { %564 = vst.msk [vmem:[#allocation3 + $0x8] sm:$0xff] %vm394_vm1, %v563_v59  ;;  %v1200_v59 = vld [vmem:[%s1482_s5] ss:$0 sm:$0xff] }
 0x374   : > { %v817_v60 = vld [vmem:[#allocation3 + $0x8] sm:$0xff] }
 0x375   : > { %1219 = vrcp.f32 %v817_v60  ;;  %v773_v60 = vadd.f32 %v1200_v59, %v768_v58 }
 0x379   : > { %v645_v0 = vpop.xlane.xlu1 %644 }
 0x37a   : > { %v646_v1 = vadd.f32 %v645_v0, %v642_v62 }
 0x37b   : > { %v1220_v2 = vpop.eup %1219  ;;  %v591_v3 = vpop.f32.mrf.mxu3 }
 0x37c   : > { %647 = vst.msk [vmem:[#allocation3 + $0x10] sm:$0xff] %vm394_vm1, %v646_v1  ;;  %822 = vperm.xlu0 %1199, %v1220_v2  }
 0x383   : > { %v593_v6 = vpop.f32.mrf.mxu3  ;;  %v860_v8 = vld [vmem:[#allocation3 + $0x10] sm:$0xff] }
 0x384   : > { %v728_v9 = vpop.xlane.xlu2 %727  ;;  %1221 = vrcp.f32 %v860_v8 }
 0x385   : > { %v729_v10 = vadd.f32 %v728_v9, %v725_v7 }
 0x387   : > { %730 = vst.msk [vmem:[#allocation3 + $0x18] sm:$0xff] %vm394_vm1, %v729_v10 }
 0x38a   : > { %v1222_v11 = vpop.eup %1221 }
 0x38b   : > { %v674_v13 = vpop.f32.mrf.mxu3  ;;  %865 = vperm.xlu0 %1199, %v1222_v11  }
 0x38c   : > { %v570_v14 = vpop.permute.xlu2 %569 }
 0x38d   : > { %v572_v15 = vmul.f32 %v570_v14, %v566_v12 }
 0x38e   : > { %v903_v16 = vld [vmem:[#allocation3 + $0x18] sm:$0xff] }
 0x38f   : > { %v595_v17 = vadd.f32 %v591_v3, %v572_v15  ;;  %1223 = vrcp.f32 %v903_v16 }
 0x391   : > { %596 = vst.msk [vmem:[#allocation4 + $0x8] sm:$0xff] %vm403_vm0, %v595_v17  ;;  %v736_v19 = vpop.permute.xlu1 %735 }
 0x392   : > { %v738_v22 = vmul.f32 %v736_v19, %v732_v18 }
 0x393   : > { %v676_v21 = vpop.f32.mrf.mxu3 }
 0x394   : > { %v653_v23 = vpop.permute.xlu2 %652 }
 0x395   : > { %v1224_v24 = vpop.eup %1223  ;;  %v655_v25 = vmul.f32 %v653_v23, %v649_v20  ;;  %v757_v26 = vpop.f32.mrf.mxu2 }
 0x396   : > { %v761_v27 = vadd.f32 %v757_v26, %v738_v22  ;;  %908 = vperm.xlu1 %1197, %v1224_v24  }
 0x397   : > { %v678_v28 = vadd.f32 %v674_v13, %v655_v25 }
 0x398   : > { %762 = vst.msk [vmem:[#allocation4 + $0x18] sm:$0xff] %vm403_vm0, %v761_v27  ;;  %v819_v39 = vld [vmem:[#allocation4 + $0x8] sm:$0xff] }
 0x399   : > { %679 = vst.msk [vmem:[#allocation4 + $0x10] sm:$0xff] %vm403_vm0, %v678_v28 }
 0x39c   : > { %v780_v30 = vpop.permute.xlu2 %779 }
 0x39d   : > { %v782_v31 = vmul.f32 %v780_v30, %v776_v29  ;;  %v759_v32 = vpop.f32.mrf.mxu2 }
 0x39f   : > { %v783_v33 = vpack.c.bf16 %v782_v31, %v782_v31  ;;  %v905_v48 = vld [vmem:[#allocation4 + $0x18] sm:$0xff] }
 0x3a0   : > { %v862_v43 = vld [vmem:[#allocation4 + $0x10] sm:$0xff] }
 0x3a1   : > { %1114 = vmatmul.msk.bf16.vlgmr.msra.gmra.mxu1 %vm403_vm0, %v783_v33 }
 0x3ee   : > { %v823_v40 = vpop.permute.xlu0 %822 }
 0x3ef   : > { %v825_v41 = vmul.f32 %v823_v40, %v819_v39 }
 0x3f1   : > { %v826_v42 = vpack.c.bf16 %v825_v41, %v825_v41 }
 0x3f3   : > { %1123 = vmatmul.msk.bf16.vlgmr.msra.gmra.mxu3 %vm403_vm0, %v826_v42 }
 0x3fd   : > { %v866_v44 = vpop.permute.xlu0 %865 }
 0x3fe   : > { %v868_v45 = vmul.f32 %v866_v44, %v862_v43 }
 0x400   : > { %v869_v46 = vpack.c.bf16 %v868_v45, %v868_v45 }
 0x402   : > { %1132 = vmatmul.msk.bf16.vlgmr.msra.gmra.mxu0 %vm403_vm0, %v869_v46 }
 0x408   : > { %v909_v49 = vpop.permute.xlu1 %908 }
 0x409   : > { %v911_v50 = vmul.f32 %v909_v49, %v905_v48 }
 0x40b   : > { %v912_v51 = vpack.c.bf16 %v911_v50, %v911_v50 }
 0x40d   : > { %1141 = vmatmul.msk.bf16.vlgmr.msra.gmra.mxu2 %vm403_vm0, %v912_v51 }
 0x41e   : > { %v812_v52 = vpop.f32.mrf.mxu1 }
 0x41f   : > { %v816_v62 = vadd.f32 %v812_v52, %v773_v60 }
 0x426   : > { %v814_v53 = vpop.f32.mrf.mxu1 }
 0x476   : > { %v855_v54 = vpop.f32.mrf.mxu3 }
 0x477   : > { %v859_v63 = vadd.f32 %v855_v54, %v816_v62 }
 0x47e   : > { %v857_v55 = vpop.f32.mrf.mxu3 }
 0x47f   : > { %v898_v56 = vpop.f32.mrf.mxu0 }
 0x480   : > { %v902_v0 = vadd.f32 %v898_v56, %v859_v63 }
 0x487   : > { %v900_v61 = vpop.f32.mrf.mxu0 }
 0x490   : > { %v941_v1 = vpop.f32.mrf.mxu2 }
 0x491   : > { %v945_v2 = vadd.f32 %v941_v1, %v902_v0 }
 0x493   : > { %v946_v3 = vpack.c.bf16 %v945_v2, %v945_v2 }
 0x495   : > { %947 = vst [vmem:[%s388_s9] sm:$0xf] %v946_v3 }
 0x498   : > { %v943_v47 = vpop.f32.mrf.mxu2 }
 0x499 PF: > { %s17_s23 = sadd.s32 1, %s1281_s23   ;;  %s1484_s21 = smov %s1277_s22 }
 0x49a   : > { %p14_p8 = scmp.ge.s32.totalorder %s17_s23, 4   ;;  %s1485_s22 = smov %s1487_s25 }
 0x49c   :  { %16 = sbr.rel (!%p14_p8) target bundleno = 2 (0x2), region = 105 }
 0x4a1   :  { %973 = vsyncpa [#allocation6], 1 }
 0x4a2   :  { %975 = vsyncpa [#allocation6 + $0x1], 1 }

// kernel: decoder_forward.25
= control target key start
LH: loop header
LB: loop body
LE: loop exit
PB: predicated region body
PF: predicated region fallthrough
CT: control target
= control target key end

     0   :  { %s187_s0 = inlined_call_operand.vmem [shape: bf16[16,128], index: 0, kind: input, shape index: {}]   ;;  %s188_s1 = inlined_call_operand.vmem [shape: f32[1,128], index: 1, kind: input, shape index: {}]   ;;  %s189_s2 = inlined_call_operand.vmem [shape: f32[1,128], index: 2, kind: input, shape index: {}]   ;;  %s190_s3 = inlined_call_operand.hbm [shape: f32[16,128], index: 3, kind: output, shape index: {}]  }
   0x1   :  { %v106_v0 = vld [vmem:[%s187_s0] sm:$0xff]  }
   0x2   :  { %v107_v1 = vunpack.c.l.bf16 %v106_v0 }
   0x3   :  { %8 = vsyncpa [#allocation3], 0  ;;  %v108_v2 = vunpack.c.h.bf16 %v106_v0  ;;  %v150_v3 = vmov 128.0   ;;  %v151_v18 = vmov 127.0   ;;  %v114_v35 = vld [vmem:[%s188_s1] ss:$0 sm:$0xff] }
   0x4   :  { %21 = vadd.xlane.f32.xlu0 %v107_v1  ;;  %116 = vrcp.f32 %v150_v3  ;;  %v115_v41 = vld [vmem:[%s189_s2] ss:$0 sm:$0xff]  ;;  %s152_s1 = smov [#allocation2]   ;;  %s93_s20 = sshll.u32 %s190_s3, 4  ;;  %s94_s20 = int_to_ptr.hbm [resolvable:$true] %s93_s20 }
   0x5   :  { %118 = vrcp.f32 %v151_v18  ;;  %s91_s17 = sshll.u32 %s152_s1, 4  ;;  %s153_s2 = smov 128   ;;  %s92_s17 = int_to_ptr.vmem [resolvable:$true] %s91_s17 }
   0x6   :  { %s154_s21 = smov 8  }
   0xa   :  { %v117_v4 = vpop.eup %116 }
   0xb   :  { %v26_v5 = vmul.f32 128.0, %v117_v4  ;;  %vm30_vm0 = vweird.f32 %v117_v4  ;;  %v119_v19 = vpop.eup %118 }
   0xc   :  { %23 = vadd.xlane.f32.xlu0 %v108_v2  ;;  %v43_v20 = vmul.f32 127.0, %v119_v19  ;;  %vm47_vm1 = vweird.f32 %v119_v19 }
   0xd   :  { %v27_v6 = vsub.f32 1.0, %v26_v5 }
   0xe   :  { %v44_v21 = vsub.f32 1.0, %v43_v20 }
   0xf   :  { %v28_v7 = vmul.f32 %v117_v4, %v27_v6 }
  0x10   :  { %v45_v22 = vmul.f32 %v119_v19, %v44_v21 }
  0x11   :  { %v29_v8 = vadd.f32 %v117_v4, %v28_v7 }
  0x12   :  { %v46_v23 = vadd.f32 %v119_v19, %v45_v22 }
  0x13   :  { %v31_v9 = vsel %vm30_vm0, %v117_v4, %v29_v8 }
  0x14   :  { %v48_v24 = vsel %vm47_vm1, %v119_v19, %v46_v23 }
  0x77   :  { %v22_v10 = vpop.xlane.xlu0 %21 }
  0x78   :  { %v32_v11 = vmul.f32 %v31_v9, %v22_v10 }
  0x7a   :  { %v34_v12 = vsub.f32 %v107_v1, %v32_v11 }
  0x7c   :  { %v36_v13 = vmul.f32 %v34_v12, %v34_v12  ;;  %v54_v40 = vmul.f32 %v114_v35, %v34_v12 }
  0x7e   :  { %38 = vadd.xlane.f32.xlu1 %v36_v13 }
  0x7f   :  { %v24_v14 = vpop.xlane.xlu0 %23 }
  0x80   :  { %v33_v15 = vmul.f32 %v31_v9, %v24_v14 }
  0x82   :  { %v35_v16 = vsub.f32 %v108_v2, %v33_v15 }
  0x84   :  { %v37_v17 = vmul.f32 %v35_v16, %v35_v16  ;;  %v55_v49 = vmul.f32 %v114_v35, %v35_v16 }
  0x86   :  { %40 = vadd.xlane.f32.xlu1 %v37_v17 }
  0xf1   :  { %v39_v25 = vpop.xlane.xlu1 %38 }
  0xf2   :  { %v49_v26 = vmul.f32 %v48_v24, %v39_v25 }
  0xf4   :  { %v56_v27 = vadd.f32 1e-06, %v49_v26 }
  0xf6   :  { %120 = vrsqrt.f32 %v56_v27  ;;  %vm64_vm3 = vweird.f32 %v56_v27 }
  0xf9   :  { %v41_v28 = vpop.xlane.xlu1 %40 }
  0xfa   :  { %v50_v29 = vmul.f32 %v48_v24, %v41_v28 }
  0xfc   :  { %v121_v30 = vpop.eup %120  ;;  %v57_v31 = vadd.f32 1e-06, %v50_v29 }
  0xfd   :  { %v59_v32 = vmul.f32 %v121_v30, %v56_v27  ;;  %vm65_vm2 = vweird.f32 %v121_v30 }
  0xfe   :  { %122 = vrsqrt.f32 %v57_v31  ;;  %vm66_vm4 = vmor %vm64_vm3, %vm65_vm2  ;;  %vm74_vm6 = vweird.f32 %v57_v31 }
  0xff   :  { %v60_v33 = vmul.f32 %v121_v30, %v59_v32 }
 0x101   :  { %v61_v34 = vmul.f32 0.5, %v60_v33 }
 0x103   :  { %v62_v36 = vsub.f32 1.5, %v61_v34 }
 0x104   :  { %v123_v37 = vpop.eup %122 }
 0x105   :  { %v63_v38 = vmul.f32 %v121_v30, %v62_v36  ;;  %v69_v39 = vmul.f32 %v123_v37, %v57_v31  ;;  %vm75_vm5 = vweird.f32 %v123_v37 }
 0x106   :  { %vm76_vm7 = vmor %vm74_vm6, %vm75_vm5 }
 0x107   :  { %v67_v42 = vsel %vm66_vm4, %v121_v30, %v63_v38  ;;  %v70_v43 = vmul.f32 %v123_v37, %v69_v39 }
 0x108   :  { %v78_v44 = vmul.f32 %v67_v42, %v54_v40 }
 0x109   :  { %v71_v45 = vmul.f32 0.5, %v70_v43 }
 0x10a   :  { %v83_v46 = vadd.f32 %v115_v41, %v78_v44 }
 0x10b   :  { %v72_v47 = vsub.f32 1.5, %v71_v45 }
 0x10c   :  { %85 = vst [vmem:[#allocation2] sm:$0xff] %v83_v46 }
 0x10d   :  { %v73_v48 = vmul.f32 %v123_v37, %v72_v47 }
 0x10f   :  { %v77_v50 = vsel %vm76_vm7, %v123_v37, %v73_v48 }
 0x110   :  { %v79_v51 = vmul.f32 %v77_v50, %v55_v49 }
 0x112   :  { %v84_v52 = vadd.f32 %v115_v41, %v79_v51 }
 0x114   :  { %86 = vst [vmem:[#allocation2 + $0x8] sm:$0xff] %v84_v52 }
 0x115   :  { %99 = dma.vmem_to_hbm [thread:$0]  %s92_s17, 256, %s94_s20, [#allocation3], %s153_s2, %s153_s2, %s154_s21  }
 0x116   :  { %148 = dma.done.wait [#allocation3], 256  }
 0x117   :  { %149 = vsyncadd [#allocation3], 4294967040 }
 0x118   :  { %104 = vsyncpa [#allocation3], 1 }

// kernel: decoder_forward.18
= control target key start
LH: loop header
LB: loop body
LE: loop exit
PB: predicated region body
PF: predicated region fallthrough
CT: control target
= control target key end

     0   :  { %12 = vsyncpa [#allocation5], 0  ;;  %s817_s0 = inlined_call_operand.vmem [shape: bf16[16,128], index: 0, kind: input, shape index: {}]   ;;  %s818_s1 = inlined_call_operand.vmem [shape: f32[1,128], index: 1, kind: input, shape index: {}]   ;;  %s819_s2 = inlined_call_operand.vmem [shape: f32[1,128], index: 2, kind: input, shape index: {}]   ;;  %s820_s3 = inlined_call_operand.hbm [shape: bf16[128,256], index: 3, kind: input, shape index: {}]   ;;  %s821_s4 = inlined_call_operand.vmem [shape: f32[1,256], index: 4, kind: input, shape index: {}]   ;;  %s822_s5 = inlined_call_operand.hbm [shape: bf16[256,128], index: 5, kind: input, shape index: {}]   ;;  %s823_s6 = inlined_call_operand.vmem [shape: f32[1,128], index: 6, kind: input, shape index: {}]   ;;  %s824_s7 = inlined_call_operand.vmem [shape: bf16[16,128], index: 7, kind: output, shape index: {}]  }
   0x1   :  { %s24_s26 = sshll.u32 %s820_s3, 4  ;;  %s25_s26 = int_to_ptr.hbm [resolvable:$true] %s24_s26 }
   0x2   :  { %13 = vsyncpa [#allocation7], 0  ;;  %s725_s27 = smov [#allocation4]   ;;  %s39_s8 = sshll.u32 %s822_s5, 4  ;;  %s40_s8 = int_to_ptr.hbm [resolvable:$true] %s39_s8 }
   0x3   :  { %s26_s28 = sshll.u32 %s725_s27, 4  ;;  %s726_s9 = smov 128   ;;  %s27_s28 = int_to_ptr.vmem [resolvable:$true] %s26_s28 }
   0x4   :  { %s727_s10 = smov 8   ;;  %s728_s11 = smov [#allocation6]  }
   0x5   :  { %32 = dma.hbm_to_vmem [thread:$0]  %s25_s26, 2048, %s27_s28, [#allocation5], %s726_s9, %s726_s9, %s727_s10  }
   0x6   :  { %s41_s12 = sshll.u32 %s728_s11, 4  ;;  %s729_s13 = smov 64   ;;  %s42_s12 = int_to_ptr.vmem [resolvable:$true] %s41_s12 }
   0x7   :  { %s730_s14 = smov 4  }
   0x8   :  { %47 = dma.hbm_to_vmem [thread:$0]  %s40_s8, 2048, %s42_s12, [#allocation7], %s729_s13, %s729_s13, %s730_s14  }
   0x9   :  { %721 = dma.done.wait [#allocation5], 2048  }
   0xa   :  { %722 = vsyncadd [#allocation5], 4294965248 }
   0xb   :  { %723 = dma.done.wait [#allocation7], 2048  }
   0xc   :  { %724 = vsyncadd [#allocation7], 4294965248  ;;  %v637_v0 = vld [vmem:[%s817_s0] sm:$0xff]   ;;  %v731_v3 = vmov 128.0   ;;  %v732_v18 = vmov 127.0  }
   0xd   :  { %v782_v1 = vunpack.c.l.bf16 %v637_v0  ;;  %v785_v2 = vunpack.c.h.bf16 %v637_v0  ;;  %665 = vrcp.f32 %v731_v3  ;;  %v533_v20 = vld [vmem:[#allocation4 + $0x70] sm:$0xf]  ;;  %v619_v21 = vld [vmem:[#allocation4 + $0x74] sm:$0xf0]  ;;  %v618_v22 = vld [vmem:[#allocation4 + $0x74] sm:$0xf] }
   0xe   :  { %667 = vrcp.f32 %v732_v18  ;;  %v534_v23 = vor.u32 %v619_v21, %v533_v20  ;;  %v535_v24 = vld [vmem:[#allocation4 + $0x78] sm:$0xf0]  ;;  %v525_v27 = vld [vmem:[#allocation4 + $0x60] sm:$0xf]  ;;  %v617_v28 = vld [vmem:[#allocation4 + $0x64] sm:$0xf0] }
   0xf   :  { %68 = vadd.xlane.f32.xlu0 %v782_v1  ;;  %v538_v26 = vor.u32 %v618_v22, %v535_v24  ;;  %v616_v29 = vld [vmem:[#allocation4 + $0x64] sm:$0xf]  ;;  %v526_v30 = vor.u32 %v617_v28, %v525_v27  ;;  %v527_v31 = vld [vmem:[#allocation4 + $0x68] sm:$0xf0]  ;;  %v517_v34 = vld [vmem:[#allocation4 + $0x50] sm:$0xf] }
  0x10   :  { %248 = vmatpush.bf16.msra.mxu0 %v534_v23  ;;  %v530_v33 = vor.u32 %v616_v29, %v527_v31  ;;  %v615_v35 = vld [vmem:[#allocation4 + $0x54] sm:$0xf0]  ;;  %v614_v36 = vld [vmem:[#allocation4 + $0x54] sm:$0xf]  ;;  %v519_v38 = vld [vmem:[#allocation4 + $0x58] sm:$0xf0] }
  0x11   :  { %262 = vmatpush.bf16.msra.mxu1 %v538_v26  ;;  %v518_v37 = vor.u32 %v615_v35, %v517_v34  ;;  %v522_v40 = vor.u32 %v614_v36, %v519_v38  ;;  %v509_v41 = vld [vmem:[#allocation4 + $0x40] sm:$0xf]  ;;  %v613_v42 = vld [vmem:[#allocation4 + $0x44] sm:$0xf0]  ;;  %v612_v43 = vld [vmem:[#allocation4 + $0x44] sm:$0xf] }
  0x12   :  { %v510_v44 = vor.u32 %v613_v42, %v509_v41  ;;  %v511_v45 = vld [vmem:[#allocation4 + $0x48] sm:$0xf0]  ;;  %v501_v48 = vld [vmem:[#allocation4 + $0x30] sm:$0xf]  ;;  %v611_v49 = vld [vmem:[#allocation4 + $0x34] sm:$0xf0] }
  0x13   :  { %v666_v4 = vpop.eup %665  ;;  %v514_v47 = vor.u32 %v612_v43, %v511_v45  ;;  %v610_v50 = vld [vmem:[#allocation4 + $0x34] sm:$0xf]  ;;  %v502_v51 = vor.u32 %v611_v49, %v501_v48  ;;  %v503_v52 = vld [vmem:[#allocation4 + $0x38] sm:$0xf0]  ;;  %v493_v56 = vld [vmem:[#allocation4 + $0x20] sm:$0xf] }
  0x14   :  { %v73_v5 = vmul.f32 128.0, %v666_v4  ;;  %vm77_vm0 = vweird.f32 %v666_v4  ;;  %v668_v19 = vpop.eup %667  ;;  %249 = vmatpush.bf16.msra.mxu0 %v526_v30  ;;  %v506_v54 = vor.u32 %v610_v50, %v503_v52  ;;  %v609_v57 = vld [vmem:[#allocation4 + $0x24] sm:$0xf0]  ;;  %v608_v58 = vld [vmem:[#allocation4 + $0x24] sm:$0xf]  ;;  %v627_v22 = vld [vmem:[#allocation6 + $0x38] sm:$0xff] }
  0x15   :  { %v90_v25 = vmul.f32 127.0, %v668_v19  ;;  %263 = vmatpush.bf16.msra.mxu1 %v530_v33  ;;  %vm94_vm1 = vweird.f32 %v668_v19  ;;  %v494_v60 = vor.u32 %v609_v57, %v493_v56  ;;  %v495_v61 = vld [vmem:[#allocation4 + $0x28] sm:$0xf0]  ;;  %v485_v0 = vld [vmem:[#allocation4 + $0x10] sm:$0xf]  ;;  %v635_v23 = vld [vmem:[#allocation6 + $0x78] sm:$0xff]  ;;  %412 = vmatpush.bf16.msra.mxu2 %v627_v22 }
  0x16   :  { %v74_v6 = vsub.f32 1.0, %v73_v5  ;;  %v498_v62 = vor.u32 %v608_v58, %v495_v61  ;;  %v607_v3 = vld [vmem:[#allocation4 + $0x14] sm:$0xf0]  ;;  %426 = vmatpush.bf16.msra.mxu3 %v635_v23  ;;  %v634_v26 = vld [vmem:[#allocation6 + $0x70] sm:$0xff]  ;;  %v625_v30 = vld [vmem:[#allocation6 + $0x28] sm:$0xff] }
  0x17   :  { %70 = vadd.xlane.f32.xlu0 %v785_v2  ;;  %v91_v32 = vsub.f32 1.0, %v90_v25  ;;  %v486_v5 = vor.u32 %v607_v3, %v485_v0  ;;  %v626_v25 = vld [vmem:[#allocation6 + $0x30] sm:$0xff]  ;;  %v633_v31 = vld [vmem:[#allocation6 + $0x68] sm:$0xff]  ;;  %v662_v34 = vld [vmem:[%s818_s1] ss:$0 sm:$0xff] }
  0x18   :  { %v75_v7 = vmul.f32 %v666_v4, %v74_v6  ;;  %250 = vmatpush.bf16.msra.mxu0 %v518_v37  ;;  %v487_v6 = vld [vmem:[#allocation4 + $0x18] sm:$0xf0]  ;;  %v624_v36 = vld [vmem:[#allocation6 + $0x20] sm:$0xff]  ;;  %v663_v43 = vld [vmem:[%s819_s2] ss:$0 sm:$0xff] }
  0x19   :  { %v92_v39 = vmul.f32 %v668_v19, %v91_v32  ;;  %264 = vmatpush.bf16.msra.mxu1 %v522_v40  ;;  %413 = vmatpush.bf16.msra.mxu2 %v626_v25  ;;  %v632_v37 = vld [vmem:[#allocation6 + $0x60] sm:$0xff]  ;;  %v630_v52 = vld [vmem:[#allocation6 + $0x50] sm:$0xff]  ;;  %v156_v57 = vld [vmem:[%s821_s4] sm:$0x3] }
  0x1a   :  { %v76_v8 = vadd.f32 %v666_v4, %v75_v7  ;;  %v477_v7 = vld [vmem:[#allocation4] sm:$0xf]  ;;  %427 = vmatpush.bf16.msra.mxu3 %v634_v26  ;;  %v159_v61 = vperm.slane %v156_v57, 1 }
  0x1b   :  { %v93_v46 = vadd.f32 %v668_v19, %v92_v39  ;;  %v628_v56 = vld [vmem:[#allocation6 + $0x40] sm:$0xff] }
  0x1c   :  { %v78_v9 = vsel %vm77_vm0, %v666_v4, %v76_v8  ;;  %251 = vmatpush.bf16.msra.mxu0 %v510_v44  ;;  %v606_v4 = vld [vmem:[#allocation4 + $0x14] sm:$0xf]  ;;  %v605_v8 = vld [vmem:[#allocation4 + $0x4] sm:$0xf0] }
  0x1d   :  { %265 = vmatpush.bf16.msra.mxu1 %v514_v47  ;;  %v95_v53 = vsel %vm94_vm1, %v668_v19, %v93_v46  ;;  %414 = vmatpush.bf16.msra.mxu2 %v625_v30 }
  0x1e   :  { %428 = vmatpush.bf16.msra.mxu3 %v633_v31 }
  0x20   :  { %252 = vmatpush.bf16.msra.mxu0 %v502_v51  ;;  %v631_v51 = vld [vmem:[#allocation6 + $0x58] sm:$0xff] }
  0x21   :  { %266 = vmatpush.bf16.msra.mxu1 %v506_v54  ;;  %415 = vmatpush.bf16.msra.mxu2 %v624_v36  ;;  %v629_v54 = vld [vmem:[#allocation6 + $0x48] sm:$0xff] }
  0x22   :  { %429 = vmatpush.bf16.msra.mxu3 %v632_v37 }
  0x24   :  { %253 = vmatpush.bf16.msra.mxu0 %v494_v60  ;;  %v158_v60 = vperm.slane %v156_v57, 0 }
  0x25   :  { %267 = vmatpush.bf16.msra.mxu1 %v498_v62 }
  0x26   :  { %430 = vmatpush.bf16.msra.mxu3 %v631_v51 }
  0x28   :  { %254 = vmatpush.bf16.msra.mxu0 %v486_v5 }
  0x2a   :  { %431 = vmatpush.bf16.msra.mxu3 %v630_v52 }
  0x2e   :  { %432 = vmatpush.bf16.msra.mxu3 %v629_v54 }
  0x32   :  { %433 = vmatpush.bf16.msra.mxu3 %v628_v56 }
  0x82   :  { %v69_v10 = vpop.xlane.xlu0 %68 }
  0x83   :  { %v79_v11 = vmul.f32 %v78_v9, %v69_v10  ;;  %v604_v10 = vld [vmem:[#allocation4 + $0x4] sm:$0xf] }
  0x85   :  { %v789_v12 = vsub.f32 %v782_v1, %v79_v11  ;;  %v479_v11 = vld [vmem:[#allocation4 + $0x8] sm:$0xf0] }
  0x87   :  { %v83_v13 = vmul.f32 %v789_v12, %v789_v12  ;;  %v101_v40 = vmul.f32 %v662_v34, %v789_v12  ;;  %v623_v12 = vld [vmem:[#allocation6 + $0x18] sm:$0xff] }
  0x88   :  { %416 = vmatpush.bf16.msra.mxu2 %v623_v12 }
  0x89   :  { %85 = vadd.xlane.f32.xlu1 %v83_v13  ;;  %v478_v13 = vor.u32 %v605_v8, %v477_v7 }
  0x8a   :  { %v71_v14 = vpop.xlane.xlu0 %70 }
  0x8b   :  { %v80_v15 = vmul.f32 %v78_v9, %v71_v14  ;;  %v490_v9 = vor.u32 %v606_v4, %v487_v6  ;;  %255 = vmatpush.bf16.msra.mxu0 %v478_v13 }
  0x8d   :  { %v794_v16 = vsub.f32 %v785_v2, %v80_v15  ;;  %268 = vmatpush.bf16.msra.mxu1 %v490_v9  ;;  %v482_v15 = vor.u32 %v604_v10, %v479_v11 }
  0x8f   :  { %v84_v17 = vmul.f32 %v794_v16, %v794_v16  ;;  %v102_v42 = vmul.f32 %v662_v34, %v794_v16  ;;  %v622_v16 = vld [vmem:[#allocation6 + $0x10] sm:$0xff] }
  0x90   :  { %417 = vmatpush.bf16.msra.mxu2 %v622_v16 }
  0x91   :  { %87 = vadd.xlane.f32.xlu1 %v84_v17  ;;  %269 = vmatpush.bf16.msra.mxu1 %v482_v15 }
  0xfc   :  { %v86_v55 = vpop.xlane.xlu1 %85 }
  0xfd   :  { %v96_v59 = vmul.f32 %v95_v53, %v86_v55  ;;  %v620_v55 = vld [vmem:[#allocation6] sm:$0xff] }
  0xff   :  { %v103_v63 = vadd.f32 1e-06, %v96_v59 }
 0x101   :  { %669 = vrsqrt.f32 %v103_v63  ;;  %vm111_vm3 = vweird.f32 %v103_v63 }
 0x104   :  { %v88_v14 = vpop.xlane.xlu1 %87 }
 0x105   :  { %v97_v17 = vmul.f32 %v95_v53, %v88_v14  ;;  %v621_v53 = vld [vmem:[#allocation6 + $0x8] sm:$0xff] }
 0x106   :  { %418 = vmatpush.bf16.msra.mxu2 %v621_v53 }
 0x107   :  { %v670_v18 = vpop.eup %669  ;;  %v104_v19 = vadd.f32 1e-06, %v97_v17 }
 0x108   :  { %v106_v20 = vmul.f32 %v670_v18, %v103_v63  ;;  %vm112_vm2 = vweird.f32 %v670_v18 }
 0x109   :  { %671 = vrsqrt.f32 %v104_v19  ;;  %vm113_vm4 = vmor %vm111_vm3, %vm112_vm2  ;;  %vm121_vm6 = vweird.f32 %v104_v19 }
 0x10a   :  { %v107_v21 = vmul.f32 %v670_v18, %v106_v20  ;;  %419 = vmatpush.bf16.msra.mxu2 %v620_v55  ;;  %v664_v20 = vld [vmem:[%s823_s6] ss:$0 sm:$0xff] }
 0x10c   :  { %v108_v24 = vmul.f32 0.5, %v107_v21 }
 0x10e   :  { %v109_v27 = vsub.f32 1.5, %v108_v24 }
 0x10f   :  { %v672_v28 = vpop.eup %671 }
 0x110   :  { %v116_v29 = vmul.f32 %v672_v28, %v104_v19  ;;  %v110_v32 = vmul.f32 %v670_v18, %v109_v27  ;;  %vm122_vm5 = vweird.f32 %v672_v28 }
 0x111   :  { %vm123_vm7 = vmor %vm121_vm6, %vm122_vm5 }
 0x112   :  { %v117_v33 = vmul.f32 %v672_v28, %v116_v29  ;;  %v114_v38 = vsel %vm113_vm4, %v670_v18, %v110_v32 }
 0x113   :  { %v125_v44 = vmul.f32 %v114_v38, %v101_v40 }
 0x114   :  { %v118_v35 = vmul.f32 0.5, %v117_v33 }
 0x115   :  { %v130_v47 = vadd.f32 %v663_v43, %v125_v44 }
 0x116   :  { %v119_v39 = vsub.f32 1.5, %v118_v35 }
 0x118   :  { %v120_v41 = vmul.f32 %v672_v28, %v119_v39 }
 0x11a   :  { %v124_v45 = vsel %vm123_vm7, %v672_v28, %v120_v41 }
 0x11b   :  { %v126_v46 = vmul.f32 %v124_v45, %v102_v42 }
 0x11d   :  { %v131_v48 = vadd.f32 %v663_v43, %v126_v46 }
 0x11f   :  { %v643_v49 = vpack.c.bf16 %v131_v48, %v130_v47 }
 0x121   :  { %644 = vst [vmem:[#allocation2] sm:$0xff] %v643_v49  }
 0x128   :  { %v603_v50 = vld [vmem:[#allocation2] sm:$0xff] }
 0x129   :  { %256 = vmatmul.bf16.vlgmr.msra.gmra.mxu0 %v603_v50  ;;  %270 = vmatmul.bf16.vlgmr.msra.gmra.mxu1 %v603_v50 }
 0x1a6   :  { %v257_v58 = vpop.f32.mrf.mxu0  ;;  %v271_v59 = vpop.f32.mrf.mxu1 }
 0x1a7   :  { %v258_v62 = vadd.f32 %v257_v58, %v158_v60  ;;  %v272_v63 = vadd.f32 %v271_v59, %v159_v61 }
 0x1a9   :  { %v276_v6 = vmax.f32 %v258_v62, 0.0  ;;  %v277_v7 = vmax.f32 %v272_v63, 0.0 }
 0x1ae   :  { %v259_v0 = vpop.f32.mrf.mxu0  ;;  %v273_v3 = vpop.f32.mrf.mxu1 }
 0x1af   :  { %v260_v4 = vadd.f32 %v259_v0, %v158_v60  ;;  %v274_v5 = vadd.f32 %v273_v3, %v159_v61 }
 0x1b1   :  { %v278_v8 = vmax.f32 %v260_v4, 0.0  ;;  %v279_v9 = vmax.f32 %v274_v5, 0.0 }
 0x1b3   :  { %v282_v10 = vpack.c.bf16 %v278_v8, %v276_v6  ;;  %v283_v11 = vpack.c.bf16 %v279_v9, %v277_v7 }
 0x1b5   :  { %420 = vmatmul.bf16.vlgmr.msra.gmra.mxu2 %v282_v10  ;;  %434 = vmatmul.bf16.vlgmr.msra.gmra.mxu3 %v283_v11 }
 0x238   :  { %v421_v13 = vpop.f32.mrf.mxu2  ;;  %v435_v14 = vpop.f32.mrf.mxu3 }
 0x239   :  { %v436_v15 = vadd.f32 %v435_v14, %v421_v13 }
 0x23b   :  { %v453_v19 = vadd.f32 %v782_v1, %v436_v15 }
 0x23d   :  { %v459_v23 = vadd.f32 %v664_v20, %v453_v19 }
 0x240   :  { %v423_v17 = vpop.f32.mrf.mxu2  ;;  %v437_v18 = vpop.f32.mrf.mxu3 }
 0x241   :  { %v438_v21 = vadd.f32 %v437_v18, %v423_v17 }
 0x243   :  { %v454_v22 = vadd.f32 %v785_v2, %v438_v21 }
 0x245   :  { %v460_v24 = vadd.f32 %v664_v20, %v454_v22 }
 0x247   :  { %v652_v25 = vpack.c.bf16 %v460_v24, %v459_v23 }
 0x249   :  { %653 = vst [vmem:[%s824_s7] sm:$0xff] %v652_v25  }
 0x24a   :  { %469 = vsyncpa [#allocation5], 1 }
 0x24b   :  { %470 = vsyncpa [#allocation7], 1 }

// kernel: decoder_forward.17
= control target key start
LH: loop header
LB: loop body
LE: loop exit
PB: predicated region body
PF: predicated region fallthrough
CT: control target
= control target key end

     0   :  { %11 = vsyncpa [#allocation6], 0  ;;  %s1315_s21 = smov 0   ;;  %s1317_s22 = smov 0   ;;  %s1464_s0 = inlined_call_operand.vmem [shape: bf16[2,8,128], index: 0, kind: input, shape index: {}]   ;;  %s1465_s1 = inlined_call_operand.vmem [shape: bf16[2,8,256], index: 1, kind: input, shape index: {}]   ;;  %s1466_s2 = inlined_call_operand.vmem [shape: s8[2,1,8], index: 2, kind: input, shape index: {}]   ;;  %s1467_s3 = inlined_call_operand.vmem [shape: bf16[2,8,128], index: 3, kind: input, shape index: {}]   ;;  %s1468_s4 = inlined_call_operand.hbm [shape: bf16[128,128], index: 4, kind: input, shape index: {}]   ;;  %s1469_s5 = inlined_call_operand.vmem [shape: f32[1,128], index: 5, kind: input, shape index: {}]   ;;  %s1470_s6 = inlined_call_operand.vmem [shape: bf16[2,8,128], index: 6, kind: output, shape index: {}]  }
   0x1   :  { %s1319_s23 = smov 0  }
   0x2 LB: > { %s1073_s24 = sadd.s32 4294967295, %s1268_s23   ;;  %s36_s25 = sadd.s32 1, %s1264_s22  ;;  %s1268_s23 = sphi %s1319_s23, %s17_s23   ;;  %s1264_s22 = sphi %s1317_s22, %s1472_s22   ;;  %s1260_s21 = sphi %s1315_s21, %s1471_s21  }
   0x3   : > { %p38_p0 = scmp.ge.s32.totalorder %s36_s25, 2  ;;  %p1075_p1 = scmp.ge.s32.totalorder %s1268_s23, 1 }
   0x4   : > { %p223_p2 = scmp.lt.s32.totalorder %s1268_s23, 3  ;;  %p1148_p4 = scmp.eq.s32.totalorder %s1073_s24, 0 }
   0x5   : > { %s1474_s25 = smov (%p38_p0, %s36_s25), 0  ;;  %s234_s28 = sshll.u32 %s1468_s4, 4  ;;  %s235_s28 = int_to_ptr.hbm [resolvable:$true] %s234_s28 }
   0x6   : > { %p224_p3 = pnand %p1075_p1, %p223_p2  ;;  %s1270_s29 = smov [#allocation5]  }
   0x7   : > { %s236_s30 = sshll.u32 %s1270_s29, 4  ;;  %s1271_s7 = smov 64   ;;  %s237_s30 = int_to_ptr.vmem [resolvable:$true] %s236_s30 }
   0x8   : > { %p1144_p5 = pneg %p224_p3  ;;  %s1272_s8 = smov 4  }
   0x9   : > { %296 = sbr.rel (%p224_p3) target bundleno = 1177 (0x499), region = 44 }
   0xa   : > { %p1145_p6 = pnand %p1148_p4, %p1144_p5 }
   0xc   : > { %1147 = dma.hbm_to_vmem [thread:$0]  (!%p1145_p6), %s235_s28, 1024, %s237_s30, [#allocation6], %s1271_s7, %s1271_s7, %s1272_s8  }
   0xe   : > { %1255 = dma.done.wait (%p1148_p4), [#allocation6], 1024  }
   0xf   : > { %1257 = vsyncadd (%p1148_p4), [#allocation6], 4294966272  ;;  %p353_p7 = scmp.lt.s32.totalorder %s1260_s21, 1  ;;  %vm403_vm0 = vcmask 261120   ;;  %vm394_vm1 = vcmask 7168   ;;  %v1273_v3 = vmov -inf  }
  0x10   : > { %395 = vst.msk [vmem:[#allocation2] sm:$0xff] %vm394_vm1, %v1273_v3  ;;  %v1274_v7 = vmov -1e+09   ;;  %vm439_vm3 = vcmask 64512   ;;  %v1275_v17 = vmov 0   ;;  %s1276_s20 = smov 96  }
  0x11   : > { %s1476_s21 = smov (!%p353_p7, %s1260_s21), 1  ;;  %396 = vst.msk [vmem:[#allocation2 + $0x8] sm:$0xff] %vm394_vm1, %v1273_v3  ;;  %1184 = vset.pattern.permute.xlu1 %v1275_v17  ;;  %1185 = vset.pattern.permute.xlu2 %v1275_v17  ;;  %v1278_v18 = vmov 0.0   ;;  %s1279_s24 = smov 64   ;;  %vm477_vm4 = vcmask 1043456  }
  0x12   : > { %s1131_s9 = sshll.u32 %s1476_s21, 3  ;;  %s1342_s13 = sshll.u32 %s1476_s21, 2  ;;  %397 = vst.msk [vmem:[#allocation2 + $0x10] sm:$0xff] %vm394_vm1, %v1273_v3  ;;  %1186 = vset.pattern.permute.xlu0 %v1275_v17 }
  0x13   : > { %s368_s12 = scalar_lea.vmem %s1465_s1, %s1131_s9  ;;  %s359_s16 = scalar_lea.vmem %s1464_s0, %s1342_s13  ;;  %398 = vst.msk [vmem:[#allocation2 + $0x18] sm:$0xff] %vm394_vm1, %v1273_v3 }
  0x14   : > { %v1340_v0 = vld [vmem:[%s368_s12] sm:$0xff]  ;;  %s374_s19 = scalar_lea.vmem %s1466_s2, %s1476_s21  ;;  %s1277_s21 = smov 32   ;;  %399 = vst.msk [vmem:[#allocation3] sm:$0xff] %vm394_vm1, %v1278_v18 }
  0x15   : > { %v420_v1 = vsel %vm403_vm0, %v1340_v0, 0  ;;  %v408_v2 = vld [vmem:[%s359_s16] sm:$0xf]  ;;  %v502_v15 = vunpack.c.l.b16 %v1340_v0  ;;  %400 = vst.msk [vmem:[#allocation3 + $0x8] sm:$0xff] %vm394_vm1, %v1278_v18  ;;  %v472_v27 = vunpack.c.h.b16 %v1340_v0  ;;  %s381_s28 = scalar_lea.vmem %s1467_s3, %s1342_s13  ;;  %s388_s9 = scalar_lea.vmem %s1470_s6, %s1342_s13 }
  0x16   : > { %429 = vmatpush.bf16.xpose.msra.mxu0 %v420_v1  ;;  %v410_v4 = vld [vmem:[%s374_s19] sm:$0x1]  ;;  %401 = vst.msk [vmem:[#allocation3 + $0x10] sm:$0xff] %vm394_vm1, %v1278_v18  ;;  %v498_v19 = vunpack.c.l.b16 %v408_v2 }
  0x17   : > { %v411_v5 = vunpack.c.0.s8 %v410_v4  ;;  %v503_v16 = vpack.c.b16 %v502_v15, %v502_v15  ;;  %402 = vst.msk [vmem:[#allocation3 + $0x18] sm:$0xff] %vm394_vm1, %v1278_v18  ;;  %v1375_v21 = vld [vmem:[#allocation2] sm:$0xff]  ;;  %v473_v30 = vpack.c.b16 %v472_v27, %v472_v27 }
  0x18   : > { %404 = vst.msk [vmem:[#allocation4] sm:$0xff] %vm403_vm0, %v1278_v18  ;;  %v499_v20 = vpack.c.b16 %v498_v19, %v498_v19  ;;  %v1409_v59 = vld [vmem:[#allocation2 + $0x8] sm:$0xff] }
  0x19   : > { %v412_v6 = vcvt.s32.f32 %v411_v5  ;;  %670 = vrot.lane.b32.xlu2 %v503_v16, %s1277_s21  ;;  %405 = vst.msk [vmem:[#allocation4 + $0x8] sm:$0xff] %vm403_vm0, %v1278_v18  ;;  %v479_v31 = vsel %vm477_vm4, %v473_v30, 0  ;;  %v611_v3 = vld [vmem:[#allocation2 + $0x10] sm:$0xff] }
  0x1a   : > { %406 = vst.msk [vmem:[#allocation4 + $0x10] sm:$0xff] %vm403_vm0, %v1278_v18  ;;  %488 = vmatpush.bf16.msra.mxu1 %v479_v31  ;;  %v694_v61 = vld [vmem:[#allocation2 + $0x18] sm:$0xff] }
  0x1b   : > { %vm413_vm2 = vcmp.gt.f32.partialorder %v412_v6, 0.0  ;;  %407 = vst.msk [vmem:[#allocation4 + $0x18] sm:$0xff] %vm403_vm0, %v1278_v18 }
  0x1c   : > { %v414_v8 = vsel %vm413_vm2, 0.0, %v1274_v7 }
  0x1d   : > { %1085 = vmatmul.msk.bf16.vlgmr.msra.gmra.mxu0 %vm403_vm0, %v408_v2  ;;  %v1358_v9 = vperm.slane %v414_v8, 0 }
  0x21   : > { %587 = vrot.lane.b32.xlu2 %v503_v16, %s1279_s24 }
  0x29   : > { %585 = vrot.lane.b32.xlu2 %v499_v20, %s1279_s24 }
  0x73   : > { %v671_v28 = vpop.permute.xlu2 %670 }
  0x74   : > { %v676_v29 = vsel %vm403_vm0, %v671_v28, 0 }
  0x75   : > { %685 = vmatpush.bf16.xpose.msrb.mxu0 %v676_v29 }
  0x7b   : > { %v588_v32 = vpop.permute.xlu2 %587 }
  0x7c   : > { %v593_v33 = vsel %vm403_vm0, %v588_v32, 0 }
  0x7d   : > { %602 = vmatpush.bf16.xpose.msrb.mxu1 %v593_v33 }
  0x83   : > { %v586_v41 = vpop.permute.xlu2 %585 }
  0x9a   : > { %v431_v10 = vpop.f32.mrf.mxu0 }
  0x9b   : > { %v435_v11 = vmul.f32 0.17677669, %v431_v10 }
  0x9d   : > { %v437_v12 = vadd.f32 %v1358_v9, %v435_v11 }
  0x9f   : > { %v440_v13 = vsel %vm439_vm3, %v437_v12, -inf }
  0xa0   : > { %441 = vmax.xlane.f32.xlu0 %v440_v13 }
  0xa2   : > { %v433_v14 = vpop.f32.mrf.mxu0 }
  0xb4   : > { %504 = vrot.lane.b32.xlu0 %v503_v16, %s1276_s20 }
 0x113   : > { %v442_v22 = vpop.xlane.xlu0 %441 }
 0x114   : > { %v1378_v23 = vmax.f32 %v1375_v21, %v442_v22 }
 0x116   : > { %v444_v24 = vsub.f32 %v1375_v21, %v1378_v23  ;;  %496 = vst.msk [vmem:[#allocation2] sm:$0xff] %vm394_vm1, %v1378_v23  ;;  %449 = vperm.xlu1 %1184, %v1378_v23  }
 0x118   : > { %v445_v8 = vmul.f32 1.442695, %v444_v24 }
 0x11e   : > { %500 = vrot.lane.b32.xlu1 %v499_v20, %s1276_s20 }
 0x126   : > { %668 = vrot.lane.b32.xlu1 %v499_v20, %s1277_s21  ;;  %v505_v25 = vpop.permute.xlu0 %504 }
 0x127   : > { %v510_v26 = vsel %vm403_vm0, %v505_v25, 0 }
 0x128   : > { %519 = vmatpush.bf16.xpose.msra.mxu2 %v510_v26 }
 0x188   : > { %v450_v34 = vpop.permute.xlu1 %449 }
 0x189   : > { %v452_v35 = vsub.f32 %v437_v12, %v450_v34 }
 0x18b   : > { %v453_v36 = vmul.f32 1.442695, %v452_v35 }
 0x18d   : > { %1188 = vpow2.f32 %v453_v36 }
 0x18e   : > { %1190 = vpow2.f32 %v445_v8 }
 0x190   : > { %v501_v37 = vpop.permute.xlu1 %500 }
 0x191   : > { %1087 = vmatmul.msk.bf16.vlgmr.msra.gmra.mxu2 %vm403_vm0, %v501_v37 }
 0x193   : > { %v1189_v38 = vpop.eup %1188 }
 0x194   : > { %v470_v39 = vpack.c.bf16 %v1189_v38, %v1189_v38  ;;  %v457_v7 = vsel %vm439_vm3, %v1189_v38, 0.0 }
 0x196   : > { %1086 = vmatmul.msk.bf16.vlgmr.msra.gmra.mxu1 %vm439_vm3, %v470_v39  ;;  %v455_v39 = vld [vmem:[#allocation3] sm:$0xff] }
 0x198   : > { %v669_v40 = vpop.permute.xlu1 %668 }
 0x199   : > { %1091 = vmatmul.msk.bf16.vlgmr.msrb.gmra.mxu0 %vm403_vm0, %v669_v40 }
 0x1a6   : > { %1089 = vmatmul.msk.bf16.vlgmr.msrb.gmra.mxu1 %vm403_vm0, %v586_v41 }
 0x213   : > { %v1396_v42 = vpop.f32.mrf.mxu1 }
 0x214   : > { %v521_v43 = vpop.f32.mrf.mxu2 }
 0x215   : > { %v525_v44 = vmul.f32 0.17677669, %v521_v43 }
 0x216   : > { %v687_v45 = vpop.f32.mrf.mxu0 }
 0x217   : > { %v691_v46 = vmul.f32 0.17677669, %v687_v45  ;;  %v526_v47 = vadd.f32 %v525_v44, %v1358_v9 }
 0x219   : > { %v529_v48 = vsel %vm439_vm3, %v526_v47, -inf  ;;  %v1401_v49 = vadd.f32 %v691_v46, %v1358_v9 }
 0x21a   : > { %530 = vmax.xlane.f32.xlu1 %v529_v48 }
 0x21b   : > { %v492_v50 = vpop.f32.mrf.mxu1  ;;  %v695_v51 = vsel %vm439_vm3, %v1401_v49, -inf }
 0x21c   : > { %v523_v52 = vpop.f32.mrf.mxu2  ;;  %696 = vmax.xlane.f32.xlu2 %v695_v51  ;;  %v545_v51 = vld [vmem:[#allocation3 + $0x8] sm:$0xff] }
 0x21e   : > { %v689_v53 = vpop.f32.mrf.mxu0 }
 0x223   : > { %v604_v54 = vpop.f32.mrf.mxu1 }
 0x224   : > { %v608_v55 = vmul.f32 0.17677669, %v604_v54 }
 0x226   : > { %v609_v56 = vadd.f32 %v608_v55, %v1358_v9  ;;  %v1191_v9 = vpop.eup %1190 }
 0x227   : > { %v456_v40 = vmul.f32 %v1191_v9, %v455_v39 }
 0x228   : > { %v612_v57 = vsel %vm439_vm3, %v609_v56, -inf }
 0x229   : > { %613 = vmax.xlane.f32.xlu0 %v612_v57 }
 0x22b   : > { %v606_v58 = vpop.f32.mrf.mxu1 }
 0x22c   : > { %v1133_v58 = vld [vmem:[#allocation5 + $0x8] sm:$0xff] }
 0x22d   : > { %796 = vmatpush.bf16.msra.mxu1 %v1133_v58 }
 0x233   : > { %561 = vrot.lane.b32.xlu1 %v473_v30, %s1276_s20 }
 0x23b   : > { %727 = vrot.lane.b32.xlu1 %v473_v30, %s1277_s21 }
 0x28d   : > { %v531_v60 = vpop.xlane.xlu1 %530 }
 0x28e   : > { %v532_v62 = vmax.f32 %v1409_v59, %v531_v60 }
 0x28f   : > { %v697_v63 = vpop.xlane.xlu2 %696 }
 0x290   : > { %v533_v0 = vsub.f32 %v1409_v59, %v532_v62  ;;  %584 = vst.msk [vmem:[#allocation2 + $0x8] sm:$0xff] %vm394_vm1, %v532_v62  ;;  %v698_v1 = vmax.f32 %v694_v61, %v697_v63  ;;  %538 = vperm.xlu2 %1185, %v532_v62   ;;  %v711_v63 = vld [vmem:[#allocation3 + $0x18] sm:$0xff] }
 0x292   : > { %v699_v2 = vsub.f32 %v694_v61, %v698_v1  ;;  %750 = vst.msk [vmem:[#allocation2 + $0x18] sm:$0xff] %vm394_vm1, %v698_v1  ;;  %704 = vperm.xlu0 %1186, %v698_v1   ;;  %v534_v36 = vmul.f32 1.442695, %v533_v0  ;;  %v1135_v0 = vld [vmem:[#allocation5 + $0x18] sm:$0xff] }
 0x294   : > { %v700_v34 = vmul.f32 1.442695, %v699_v2 }
 0x29c   : > { %v614_v4 = vpop.xlane.xlu0 %613 }
 0x29d   : > { %v615_v5 = vmax.f32 %v611_v3, %v614_v4 }
 0x29f   : > { %v616_v6 = vsub.f32 %v611_v3, %v615_v5  ;;  %667 = vst.msk [vmem:[#allocation2 + $0x10] sm:$0xff] %vm394_vm1, %v615_v5  ;;  %621 = vperm.xlu2 %1185, %v615_v5  }
 0x2a1   : > { %v617_v37 = vmul.f32 1.442695, %v616_v6 }
 0x2a5   : > { %v562_v10 = vpop.permute.xlu1 %561 }
 0x2a6   : > { %v567_v11 = vsel %vm477_vm4, %v562_v10, 0 }
 0x2a7   : > { %644 = vrot.lane.b32.xlu2 %v473_v30, %s1279_s24  ;;  %576 = vmatpush.bf16.msra.mxu3 %v567_v11 }
 0x2ad   : > { %v728_v12 = vpop.permute.xlu1 %727 }
 0x2ae   : > { %v733_v14 = vsel %vm477_vm4, %v728_v12, 0 }
 0x2af   : > { %742 = vmatpush.bf16.msrb.mxu2 %v733_v14 }
 0x2bc   : > { %458 = vadd.xlane.f32.xlu0 %v457_v7  ;;  %v553_v7 = vld [vmem:[#allocation4 + $0x8] sm:$0xff] }
 0x2d0   : > { %466 = vperm.xlu0 %1186, %v1191_v9  }
 0x2ea   : > { %v539_v13 = vpop.permute.xlu2 %538 }
 0x2eb   : > { %v541_v15 = vsub.f32 %v526_v47, %v539_v13  ;;  %v463_v47 = vld [vmem:[#allocation4] sm:$0xff]  ;;  %v719_v13 = vld [vmem:[#allocation4 + $0x18] sm:$0xff] }
 0x2ed   : > { %v542_v16 = vmul.f32 1.442695, %v541_v15  ;;  %v636_v15 = vld [vmem:[#allocation4 + $0x10] sm:$0xff] }
 0x2ef   : > { %1192 = vpow2.f32 %v542_v16 }
 0x2f5   : > { %v1193_v17 = vpop.eup %1192 }
 0x2f6   : > { %v547_v18 = vsel %vm439_vm3, %v1193_v17, 0.0  ;;  %v560_v19 = vpack.c.bf16 %v1193_v17, %v1193_v17 }
 0x2f7   : > { %548 = vadd.xlane.f32.xlu1 %v547_v18 }
 0x2f8   : > { %1088 = vmatmul.msk.bf16.vlgmr.msra.gmra.mxu3 %vm439_vm3, %v560_v19 }
 0x2f9   : > { %v622_v20 = vpop.permute.xlu2 %621 }
 0x2fa   : > { %v624_v21 = vsub.f32 %v609_v56, %v622_v20  ;;  %v628_v56 = vld [vmem:[#allocation3 + $0x10] sm:$0xff] }
 0x2fc   : > { %v625_v22 = vmul.f32 1.442695, %v624_v21 }
 0x2fe   : > { %1194 = vpow2.f32 %v625_v22 }
 0x301   : > { %v645_v23 = vpop.permute.xlu2 %644 }
 0x302   : > { %v650_v24 = vsel %vm477_vm4, %v645_v23, 0 }
 0x303   : > { %659 = vmatpush.bf16.msrb.mxu3 %v650_v24 }
 0x304   : > { %v1195_v25 = vpop.eup %1194  ;;  %v705_v26 = vpop.permute.xlu0 %704 }
 0x305   : > { %v707_v27 = vsub.f32 %v1401_v49, %v705_v26  ;;  %v630_v28 = vsel %vm439_vm3, %v1195_v25, 0.0  ;;  %v643_v29 = vpack.c.bf16 %v1195_v25, %v1195_v25 }
 0x306   : > { %631 = vadd.xlane.f32.xlu1 %v630_v28 }
 0x307   : > { %v708_v30 = vmul.f32 1.442695, %v707_v27  ;;  %839 = vmatpush.bf16.msra.mxu3 %v1135_v0 }
 0x308   : > { %1090 = vmatmul.msk.bf16.vlgmr.msrb.gmra.mxu3 %vm439_vm3, %v643_v29  ;;  %v1134_v29 = vld [vmem:[#allocation5 + $0x10] sm:$0xff] }
 0x309   : > { %1196 = vpow2.f32 %v708_v30  ;;  %v1137_v30 = vld [vmem:[#allocation5 + $0x28] sm:$0xff] }
 0x30a   : > { %1198 = vpow2.f32 %v700_v34  ;;  %882 = vmatpush.bf16.msra.mxu0 %v1137_v30 }
 0x30b   : > { %1200 = vpow2.f32 %v534_v36  ;;  %840 = vmatpush.bf16.msra.mxu3 %v1134_v29 }
 0x30c   : > { %1202 = vpow2.f32 %v617_v37 }
 0x30f   : > { %v1197_v31 = vpop.eup %1196 }
 0x310   : > { %v713_v32 = vsel %vm439_vm3, %v1197_v31, 0.0  ;;  %v726_v33 = vpack.c.bf16 %v1197_v31, %v1197_v31  ;;  %v1199_v35 = vpop.eup %1198  ;;  %v1139_v31 = vld [vmem:[#allocation5 + $0x38] sm:$0xff] }
 0x311   : > { %714 = vadd.xlane.f32.xlu2 %v713_v32  ;;  %v1201_v38 = vpop.eup %1200  ;;  %v712_v2 = vmul.f32 %v1199_v35, %v711_v63  ;;  %925 = vmatpush.bf16.msra.mxu2 %v1139_v31  ;;  %v1136_v32 = vld [vmem:[#allocation5 + $0x20] sm:$0xff] }
 0x312   : > { %1092 = vmatmul.msk.bf16.vlgmr.msrb.gmra.mxu2 %vm439_vm3, %v726_v33  ;;  %v1203_v43 = vpop.eup %1202  ;;  %v546_v52 = vmul.f32 %v1201_v38, %v545_v51  ;;  %883 = vmatpush.bf16.msra.mxu0 %v1136_v32  ;;  %v1138_v33 = vld [vmem:[#allocation5 + $0x30] sm:$0xff] }
 0x313   : > { %v629_v57 = vmul.f32 %v1203_v43, %v628_v56 }
 0x315   : > { %926 = vmatpush.bf16.msra.mxu2 %v1138_v33 }
 0x31f   : > { %722 = vperm.xlu1 %1184, %v1199_v35  }
 0x329   : > { %556 = vperm.xlu2 %1185, %v1201_v38  }
 0x32f   : > { %v459_v41 = vpop.xlane.xlu0 %458 }
 0x330   : > { %v460_v44 = vadd.f32 %v459_v41, %v456_v40 }
 0x331   : > { %639 = vperm.xlu2 %1185, %v1203_v43  }
 0x332   : > { %462 = vst.msk [vmem:[#allocation3] sm:$0xff] %vm394_vm1, %v460_v44 }
 0x339   : > { %v761_v45 = vld [vmem:[#allocation3] sm:$0xff] }
 0x33a   : > { %1204 = vrcp.f32 %v761_v45 }
 0x340   : > { %v1205_v46 = vpop.eup %1204 }
 0x341   : > { %766 = vperm.xlu2 %1185, %v1205_v46  }
 0x342   : > { %v467_v48 = vpop.permute.xlu0 %466 }
 0x343   : > { %v469_v49 = vmul.f32 %v467_v48, %v463_v47 }
 0x345   : > { %v494_v50 = vadd.f32 %v1396_v42, %v469_v49  ;;  %v1132_v42 = vld [vmem:[#allocation5] sm:$0xff] }
 0x346   : > { %797 = vmatpush.bf16.msra.mxu1 %v1132_v42 }
 0x347   : > { %495 = vst.msk [vmem:[#allocation4] sm:$0xff] %vm403_vm0, %v494_v50 }
 0x34e   : > { %v763_v24 = vld [vmem:[#allocation4] sm:$0xff] }
 0x36a   : > { %v549_v53 = vpop.xlane.xlu1 %548 }
 0x36b   : > { %v550_v54 = vadd.f32 %v549_v53, %v546_v52  ;;  %v754_v52 = vld [vmem:[%s381_s28] sm:$0xf] }
 0x36c   : > { %v755_v53 = vunpack.c.l.bf16 %v754_v52 }
 0x36d   : > { %551 = vst.msk [vmem:[#allocation3 + $0x8] sm:$0xff] %vm394_vm1, %v550_v54  ;;  %v1187_v54 = vld [vmem:[%s1469_s5] ss:$0 sm:$0xff] }
 0x374   : > { %v804_v55 = vld [vmem:[#allocation3 + $0x8] sm:$0xff] }
 0x375   : > { %1206 = vrcp.f32 %v804_v55  ;;  %v760_v55 = vadd.f32 %v1187_v54, %v755_v53 }
 0x379   : > { %v632_v59 = vpop.xlane.xlu1 %631 }
 0x37a   : > { %v633_v60 = vadd.f32 %v632_v59, %v629_v57 }
 0x37b   : > { %v1207_v61 = vpop.eup %1206  ;;  %v578_v62 = vpop.f32.mrf.mxu3 }
 0x37c   : > { %634 = vst.msk [vmem:[#allocation3 + $0x10] sm:$0xff] %vm394_vm1, %v633_v60  ;;  %809 = vperm.xlu0 %1186, %v1207_v61  }
 0x383   : > { %v580_v1 = vpop.f32.mrf.mxu3  ;;  %v847_v3 = vld [vmem:[#allocation3 + $0x10] sm:$0xff] }
 0x384   : > { %v715_v4 = vpop.xlane.xlu2 %714  ;;  %1208 = vrcp.f32 %v847_v3 }
 0x385   : > { %v716_v5 = vadd.f32 %v715_v4, %v712_v2 }
 0x387   : > { %717 = vst.msk [vmem:[#allocation3 + $0x18] sm:$0xff] %vm394_vm1, %v716_v5 }
 0x38a   : > { %v1209_v6 = vpop.eup %1208 }
 0x38b   : > { %v661_v8 = vpop.f32.mrf.mxu3  ;;  %852 = vperm.xlu0 %1186, %v1209_v6  }
 0x38c   : > { %v557_v9 = vpop.permute.xlu2 %556 }
 0x38d   : > { %v559_v10 = vmul.f32 %v557_v9, %v553_v7 }
 0x38e   : > { %v890_v11 = vld [vmem:[#allocation3 + $0x18] sm:$0xff] }
 0x38f   : > { %v582_v12 = vadd.f32 %v578_v62, %v559_v10  ;;  %1210 = vrcp.f32 %v890_v11 }
 0x391   : > { %583 = vst.msk [vmem:[#allocation4 + $0x8] sm:$0xff] %vm403_vm0, %v582_v12  ;;  %v723_v14 = vpop.permute.xlu1 %722 }
 0x392   : > { %v725_v17 = vmul.f32 %v723_v14, %v719_v13 }
 0x393   : > { %v663_v16 = vpop.f32.mrf.mxu3 }
 0x394   : > { %v640_v18 = vpop.permute.xlu2 %639 }
 0x395   : > { %v1211_v19 = vpop.eup %1210  ;;  %v642_v20 = vmul.f32 %v640_v18, %v636_v15  ;;  %v744_v21 = vpop.f32.mrf.mxu2 }
 0x396   : > { %v748_v22 = vadd.f32 %v744_v21, %v725_v17  ;;  %895 = vperm.xlu1 %1184, %v1211_v19  }
 0x397   : > { %v665_v23 = vadd.f32 %v661_v8, %v642_v20 }
 0x398   : > { %749 = vst.msk [vmem:[#allocation4 + $0x18] sm:$0xff] %vm403_vm0, %v748_v22  ;;  %v806_v34 = vld [vmem:[#allocation4 + $0x8] sm:$0xff] }
 0x399   : > { %666 = vst.msk [vmem:[#allocation4 + $0x10] sm:$0xff] %vm403_vm0, %v665_v23 }
 0x39c   : > { %v767_v25 = vpop.permute.xlu2 %766 }
 0x39d   : > { %v769_v26 = vmul.f32 %v767_v25, %v763_v24  ;;  %v746_v27 = vpop.f32.mrf.mxu2 }
 0x39f   : > { %v770_v28 = vpack.c.bf16 %v769_v26, %v769_v26  ;;  %v892_v43 = vld [vmem:[#allocation4 + $0x18] sm:$0xff] }
 0x3a0   : > { %v849_v38 = vld [vmem:[#allocation4 + $0x10] sm:$0xff] }
 0x3a1   : > { %1101 = vmatmul.msk.bf16.vlgmr.msra.gmra.mxu1 %vm403_vm0, %v770_v28 }
 0x3ee   : > { %v810_v35 = vpop.permute.xlu0 %809 }
 0x3ef   : > { %v812_v36 = vmul.f32 %v810_v35, %v806_v34 }
 0x3f1   : > { %v813_v37 = vpack.c.bf16 %v812_v36, %v812_v36 }
 0x3f3   : > { %1110 = vmatmul.msk.bf16.vlgmr.msra.gmra.mxu3 %vm403_vm0, %v813_v37 }
 0x3fd   : > { %v853_v39 = vpop.permute.xlu0 %852 }
 0x3fe   : > { %v855_v40 = vmul.f32 %v853_v39, %v849_v38 }
 0x400   : > { %v856_v41 = vpack.c.bf16 %v855_v40, %v855_v40 }
 0x402   : > { %1119 = vmatmul.msk.bf16.vlgmr.msra.gmra.mxu0 %vm403_vm0, %v856_v41 }
 0x408   : > { %v896_v44 = vpop.permute.xlu1 %895 }
 0x409   : > { %v898_v45 = vmul.f32 %v896_v44, %v892_v43 }
 0x40b   : > { %v899_v46 = vpack.c.bf16 %v898_v45, %v898_v45 }
 0x40d   : > { %1128 = vmatmul.msk.bf16.vlgmr.msra.gmra.mxu2 %vm403_vm0, %v899_v46 }
 0x41e   : > { %v799_v47 = vpop.f32.mrf.mxu1 }
 0x41f   : > { %v803_v57 = vadd.f32 %v799_v47, %v760_v55 }
 0x426   : > { %v801_v48 = vpop.f32.mrf.mxu1 }
 0x476   : > { %v842_v49 = vpop.f32.mrf.mxu3 }
 0x477   : > { %v846_v58 = vadd.f32 %v842_v49, %v803_v57 }
 0x47e   : > { %v844_v50 = vpop.f32.mrf.mxu3 }
 0x47f   : > { %v885_v51 = vpop.f32.mrf.mxu0 }
 0x480   : > { %v889_v59 = vadd.f32 %v885_v51, %v846_v58 }
 0x487   : > { %v887_v56 = vpop.f32.mrf.mxu0 }
 0x490   : > { %v928_v60 = vpop.f32.mrf.mxu2 }
 0x491   : > { %v932_v61 = vadd.f32 %v928_v60, %v889_v59 }
 0x493   : > { %v933_v62 = vpack.c.bf16 %v932_v61, %v932_v61 }
 0x495   : > { %934 = vst [vmem:[%s388_s9] sm:$0xf] %v933_v62 }
 0x498   : > { %v930_v42 = vpop.f32.mrf.mxu2 }
 0x499 PF: > { %s17_s23 = sadd.s32 1, %s1268_s23   ;;  %s1471_s21 = smov %s1264_s22 }
 0x49a   : > { %p14_p8 = scmp.ge.s32.totalorder %s17_s23, 4   ;;  %s1472_s22 = smov %s1474_s25 }
 0x49c   :  { %16 = sbr.rel (!%p14_p8) target bundleno = 2 (0x2), region = 105 }
 0x4a1   :  { %960 = vsyncpa [#allocation6], 1 }
 0x4a2   :  { %962 = vsyncpa [#allocation6 + $0x1], 1 }

</bundles_post_ra>
